<compile_context>
chip_gen: v7x
topology: tpu7x:2x2x1
jax: 0.10.0
libtpu: 0.0.40
codegen_flags: <defaults>
</compile_context>

<pallas_src>
import functools

import jax
import jax.numpy as jnp
from jax.experimental import pallas as pl
from jax.experimental.pallas import tpu as pltpu


def _round_up(x, m):
    return ((x + m - 1) // m) * m


_VMEM_LIMIT = 48 * 1024 * 1024


# ----------------------------------------------------------------------------
# Generic fused GEMM + bias (+ optional LeakyReLU) Pallas kernel
# ----------------------------------------------------------------------------
def _gemm_kernel(x_ref, w_ref, b_ref, o_ref, acc_ref, *, apply_lrelu, slope):
    k = pl.program_id(2)

    @pl.when(k == 0)
    def _():
        acc_ref[...] = jnp.zeros_like(acc_ref)

    acc_ref[...] += jnp.dot(x_ref[...], w_ref[...],
                            preferred_element_type=jnp.float32)

    @pl.when(k == pl.num_programs(2) - 1)
    def _():
        y = acc_ref[...] + b_ref[...]
        if apply_lrelu:
            y = jnp.maximum(y, slope * y)      # LeakyReLU (0 < slope < 1)
        o_ref[...] = y.astype(o_ref.dtype)


def pallas_matmul_bias_act(x, w, b, *, lrelu=False, slope=0.2,
                           out_dtype=jnp.float32,
                           tm_pref=256, tn_pref=1024, tk_pref=2048):
    """act((x @ w) + b); bf16 operands, f32 accumulation, out_dtype output.

    Weights/bias are expected pre-cast (bf16 / (1,N) f32) and tile-aligned so
    the casts/pads below are no-ops in the steady state.
    """
    M, K = x.shape
    K2, N = w.shape
    assert K == K2
    b2d = b if b.ndim == 2 else b.reshape(1, N)

    # ---- tile selection -----------------------------------------------
    tm = min(tm_pref, _round_up(M, 8))
    if K <= tk_pref:
        tk, Kp = K, K                       # single reduction step, full-K block
    else:
        tk = tk_pref                        # multiple of 128
        Kp = _round_up(K, tk)
    if N <= tn_pref:
        tn, Np = N, N
    else:
        tn = tn_pref
        Np = _round_up(N, tn)
    Mp = _round_up(M, tm)

    # ---- pad / cast (no-ops when params are pre-laid-out) --------------
    xp = x if (Mp, Kp) == (M, K) else jnp.pad(x, ((0, Mp - M), (0, Kp - K)))
    wp = w if (Kp, Np) == (K, N) else jnp.pad(w, ((0, Kp - K), (0, Np - N)))
    bp = b2d if Np == N else jnp.pad(b2d, ((0, 0), (0, Np - N)))

    xp = xp.astype(jnp.bfloat16)
    wp = wp.astype(jnp.bfloat16)
    bp = bp.astype(jnp.float32)

    kernel = functools.partial(_gemm_kernel, apply_lrelu=lrelu, slope=slope)

    out = pl.pallas_call(
        kernel,
        out_shape=jax.ShapeDtypeStruct((Mp, Np), out_dtype),
        grid_spec=pltpu.PrefetchScalarGridSpec(
            num_scalar_prefetch=0,
            grid=(Mp // tm, Np // tn, Kp // tk),
            in_specs=[
                pl.BlockSpec((tm, tk), lambda i, j, k: (i, k)),
                pl.BlockSpec((tk, tn), lambda i, j, k: (k, j)),
                pl.BlockSpec((1, tn), lambda i, j, k: (0, j)),
            ],
            out_specs=pl.BlockSpec((tm, tn), lambda i, j, k: (i, j)),
            scratch_shapes=[pltpu.VMEM((tm, tn), jnp.float32)],
        ),
        compiler_params=pltpu.CompilerParams(
            dimension_semantics=("parallel", "parallel", "arbitrary"),
            vmem_limit_bytes=_VMEM_LIMIT),
    )(xp, wp, bp)

    if (Mp, Np) != (M, N):
        out = out[:M, :N]
    return out


# ----------------------------------------------------------------------------
# Layer-1 fused kernel: im2col GEMM + bias + constant-channel residual + lrelu
# ----------------------------------------------------------------------------
def _layer1_kernel(p_ref, w_ref, b_ref, case_ref, t_ref, o_ref, *, slope):
    # image-channel taps: (tm,16) bf16 @ (16,64) bf16 -> f32
    y = jnp.dot(p_ref[0], w_ref[...], preferred_element_type=jnp.float32)
    # spatially-constant char/attr channels: border-case one-hot (tm,16) f32
    # @ per-sample tap-sum table (16,64) f32 -> f32 residual (no HBM residual)
    res = jnp.dot(case_ref[...], t_ref[0], preferred_element_type=jnp.float32)
    y = y + b_ref[...] + res
    y = jnp.maximum(y, slope * y)
    o_ref[0] = y.astype(o_ref.dtype)


def pallas_conv1_fused(p1, w1, b1, case_onehot, t_taps, *, slope=0.2,
                       out_dtype=jnp.bfloat16, tm_pref=2048):
    """p1: (B, S, 16) image-channel im2col; t_taps: (B, 16, N) tap-sum table;
    case_onehot: (S, 16) border-case one-hot.  Returns (B, S, N) out_dtype."""
    B, Sp, Kt = p1.shape
    Kt2, N = w1.shape
    assert Kt == Kt2 and t_taps.shape == (B, 16, N)

    if Sp <= tm_pref:
        tm, Spp = Sp, Sp
    else:
        tm = tm_pref
        Spp = _round_up(Sp, tm)
    if Spp != Sp:
        p1 = jnp.pad(p1, ((0, 0), (0, Spp - Sp), (0, 0)))
        case_onehot = jnp.pad(case_onehot, ((0, Spp - Sp), (0, 0)))

    out = pl.pallas_call(
        functools.partial(_layer1_kernel, slope=slope),
        out_shape=jax.ShapeDtypeStruct((B, Spp, N), out_dtype),
        grid_spec=pltpu.PrefetchScalarGridSpec(
            num_scalar_prefetch=0,
            grid=(B, Spp // tm),
            in_specs=[
                pl.BlockSpec((1, tm, Kt), lambda b, s: (b, s, 0)),
                pl.BlockSpec((Kt, N), lambda b, s: (0, 0)),
                pl.BlockSpec((1, N), lambda b, s: (0, 0)),
                pl.BlockSpec((tm, 16), lambda b, s: (s, 0)),
                pl.BlockSpec((1, 16, N), lambda b, s: (b, 0, 0)),
            ],
            out_specs=pl.BlockSpec((1, tm, N), lambda b, s: (b, s, 0)),
        ),
        compiler_params=pltpu.CompilerParams(
            dimension_semantics=("parallel", "parallel"),
            vmem_limit_bytes=_VMEM_LIMIT),
    )(p1.astype(jnp.bfloat16), w1.astype(jnp.bfloat16),
      b1.astype(jnp.float32), case_onehot.astype(jnp.float32),
      t_taps.astype(jnp.float32))

    if Spp != Sp:
        out = out[:, :Sp, :]
    return out


# ----------------------------------------------------------------------------
# Glue: im2col, border cases, spectral norm reparametrization, parameter init
# ----------------------------------------------------------------------------
def im2col(x, ksize=4, stride=2, pad=1):
    """x: (B, H, W, C) -> (B*Ho*Wo, ksize*ksize*C) with (kh, kw, C) ordering."""
    B, H, W, C = x.shape
    xp = jnp.pad(x, ((0, 0), (pad, pad), (pad, pad), (0, 0)))
    Ho = (H + 2 * pad - ksize) // stride + 1
    Wo = (W + 2 * pad - ksize) // stride + 1
    cols = []
    for i in range(ksize):
        for j in range(ksize):
            cols.append(xp[:, i:i + stride * Ho:stride,
                           j:j + stride * Wo:stride, :])
    p = jnp.stack(cols, axis=3)  # (B, Ho, Wo, ksize*ksize, C)
    return p.reshape(B * Ho * Wo, ksize * ksize * C), Ho, Wo


def _border_onehot(Ho, Wo, dtype=jnp.float32):
    """Per-output-pixel one-hot of the 3x3 border case (k4/s2/p1); padded to 16."""
    r = jnp.arange(Ho)
    c = jnp.arange(Wo)
    rcase = jnp.where(r == 0, 0, jnp.where(r == Ho - 1, 2, 1))
    ccase = jnp.where(c == 0, 0, jnp.where(c == Wo - 1, 2, 1))
    case = (rcase[:, None] * 3 + ccase[None, :]).reshape(-1)   # (Ho*Wo,)
    return jax.nn.one_hot(case, 16, dtype=dtype)               # (Ho*Wo, 16)


def spectral_normalize(w2d, key, n_iters=1, eps=1e-12):
    """torch.nn.utils.spectral_norm reparametrization: W / sigma(W)."""
    out_dim, _ = w2d.shape
    u = jax.random.normal(key, (out_dim,), jnp.float32)
    u = u / (jnp.linalg.norm(u) + eps)
    v = None
    for _ in range(n_iters):
        v = w2d.T @ u
        v = v / (jnp.linalg.norm(v) + eps)
        u = w2d @ v
        u = u / (jnp.linalg.norm(u) + eps)
    sigma = u @ (w2d @ v)
    return w2d / sigma


def init_params(key, img_size, num_dimension, imp_num, char_num):
    ks = jax.random.split(key, 10)
    c_in1 = 1 + char_num + num_dimension

    # ImpEmbedding word-vector table + mask
    emb_weight = 0.02 * jax.random.normal(ks[0], (imp_num, num_dimension),
                                          jnp.float32)
    emb_mask = jnp.ones((imp_num,), jnp.float32)

    # conv1: spectral-norm the full (64, c_in1, 4, 4) weight jointly, then
    # split into (a) the image-channel GEMM part (bf16) and (b) tap-sum
    # tensors for the spatially-constant char/attr channels (3x3 border
    # cases for pad=1).
    w1 = 0.02 * jax.random.normal(ks[1], (64, c_in1, 4, 4), jnp.float32)
    w1 = spectral_normalize(w1.reshape(64, -1), ks[2]).reshape(64, c_in1, 4, 4)
    b1 = jnp.zeros((1, 64), jnp.float32)
    w1_img = jnp.transpose(w1[:, :1], (2, 3, 1, 0)).reshape(16, 64)
    w1_img = w1_img.astype(jnp.bfloat16)
    mrow = jnp.array([[0., 1., 1., 1.],
                      [1., 1., 1., 1.],
                      [1., 1., 1., 0.]], jnp.float32)   # top / mid / bottom
    S1 = jnp.einsum('rh,cw,oihw->rcio', mrow, mrow, w1[:, 1:])  # (3,3,Cc,64)

    # conv2 (pre-cast bf16, (kh,kw,cin) row order to match im2col)
    w2 = 0.02 * jax.random.normal(ks[3], (128, 64, 4, 4), jnp.float32)
    w2 = spectral_normalize(w2.reshape(128, -1), ks[4]).reshape(128, 64, 4, 4)
    w2 = jnp.transpose(w2, (2, 3, 1, 0)).reshape(16 * 64, 128).astype(jnp.bfloat16)
    b2 = jnp.zeros((1, 128), jnp.float32)

    # fc1: spectral-norm, then permute input columns from NCHW-flatten order
    # to NHWC-flatten order (so the forward pass needs no transpose), store
    # as (in, out) bf16.
    Hq = img_size // 4
    fc_in = 128 * Hq * Hq
    wf1 = 0.02 * jax.random.normal(ks[5], (1024, fc_in), jnp.float32)
    wf1 = spectral_normalize(wf1, ks[6])
    wf1 = wf1.reshape(1024, 128, Hq, Hq).transpose(0, 2, 3, 1).reshape(1024, fc_in)
    wf1 = wf1.T.astype(jnp.bfloat16)                    # (fc_in, 1024)
    bf1 = jnp.zeros((1, 1024), jnp.float32)
    wf2 = (0.02 * jax.random.normal(ks[7], (1, 1024), jnp.float32)).T  # no SN
    bf2 = jnp.zeros((1,), jnp.float32)

    return dict(emb_weight=emb_weight, emb_mask=emb_mask,
                w1_img=w1_img, S1=S1, b1=b1, w2=w2, b2=b2,
                w_fc1=wf1, b_fc1=bf1, w_fc2=wf2, b_fc2=bf2)


# ----------------------------------------------------------------------------
# CDiscriminator forward
# ----------------------------------------------------------------------------
def cdiscriminator_forward(params, img_nchw, label, char_class, *, img_size):
    B = img_nchw.shape[0]

    # TODO(synk): ImpEmbedding source was not provided; implemented as a masked
    # mean-pooled w2v embedding (sum_weight=False -> mean over active labels).
    # Tiny GEMM -> plain JAX (fused by XLA), not worth a pallas_call.
    w_emb = params["emb_weight"] * params["emb_mask"][:, None]
    attr = label @ w_emb
    attr = attr / jnp.clip(jnp.sum(label, axis=1, keepdims=True), 1.0, None)

    img = jnp.transpose(img_nchw, (0, 2, 3, 1)).astype(jnp.bfloat16)  # NHWC, C=1

    # layer1: Conv2d(1+char+dim -> 64, k4 s2 p1) + LeakyReLU(0.2).
    # Only the 1-channel image is im2col'ed; the spatially-constant char/attr
    # channels enter as a per-sample tap-sum table T (3x3 border cases for
    # pad=1) combined in-kernel with a border-case one-hot (no HBM residual).
    # TODO(synk): tap-sum trick hard-codes k=4/s=2/p=1 with even H,W and Ho,Wo>=2.
    p1, Ho, Wo = im2col(img)                             # (B*Ho*Wo, 16) bf16
    Sp = Ho * Wo
    p1 = p1.reshape(B, Sp, 16)
    v = jnp.concatenate([char_class, attr], axis=1)      # (B, char+dim) f32
    N1 = params["w1_img"].shape[1]
    T = jnp.einsum('bi,rcio->brco', v, params["S1"])     # (B, 3, 3, 64)
    T = jnp.pad(T.reshape(B, 9, N1), ((0, 0), (0, 7), (0, 0)))   # (B, 16, 64)
    case_oh = _border_onehot(Ho, Wo)                     # (Sp, 16) f32
    h1 = pallas_conv1_fused(p1, params["w1_img"], params["b1"], case_oh, T)
    h1 = h1.reshape(B, Ho, Wo, N1)                       # bf16

    # layer2: Conv2d(64 -> 128, k4 s2 p1) + LeakyReLU(0.2), bf16 output.
    p2, H2, W2 = im2col(h1)                              # bf16 im2col
    h2 = pallas_matmul_bias_act(p2, params["w2"], params["b2"],
                                lrelu=True, out_dtype=jnp.bfloat16,
                                tm_pref=512, tn_pref=1024, tk_pref=2048)
    h2 = h2.reshape(B, H2, W2, 128)

    # NHWC flatten (w_fc1 rows were permuted at init to match this order).
    flat = h2.reshape(B, -1)

    # fc_TF: Linear -> LeakyReLU(0.2) -> Linear(1024, 1)
    h3 = pallas_matmul_bias_act(flat, params["w_fc1"], params["b_fc1"],
                                lrelu=True, out_dtype=jnp.float32,
                                tm_pref=256, tn_pref=512, tk_pref=4096)
    # Final Linear(1024 -> 1): N=1 is hostile to MXU/lane layout; plain VPU dot.
    out = h3 @ params["w_fc2"] + params["b_fc2"]
    return out


# ----------------------------------------------------------------------------
if __name__ == "__main__":
    B = 2
    IMG_SIZE = 16      # small stand-in for img_size=64 (fc dim follows)
    NUM_DIM = 32       # small stand-in for num_dimension=300
    IMP_NUM = 40       # small stand-in for imp_num=1574
    CHAR_NUM = 26

    key = jax.random.PRNGKey(0)
    k_img, k_lbl, k_chr, k_par = jax.random.split(key, 4)

    img = jax.random.normal(k_img, (B, 1, IMG_SIZE, IMG_SIZE), jnp.float32)
    label = (jax.random.uniform(k_lbl, (B, IMP_NUM)) < 0.2).astype(jnp.float32)
    label = label.at[:, 0].set(1.0)  # at least one impression per sample
    char_idx = jax.random.randint(k_chr, (B,), 0, CHAR_NUM)
    char_class = jax.nn.one_hot(char_idx, CHAR_NUM, dtype=jnp.float32)

    params = init_params(k_par, IMG_SIZE, NUM_DIM, IMP_NUM, CHAR_NUM)

    fwd = jax.jit(functools.partial(cdiscriminator_forward, img_size=IMG_SIZE))
    out = fwd(params, img, label, char_class)
    jax.block_until_ready(out)
    assert out.shape == (B, 1) and out.dtype == jnp.float32
    assert bool(jnp.all(jnp.isfinite(out)))
    print("KERNEL_OK")
</pallas_src>

<mosaic_0001>
module attributes {stable_mosaic.version = 11 : i64} {
  func.func @_layer1_kernel(%arg0: i32, %arg1: i32, %arg2: memref<1x64x16xbf16, #tpu.memory_space<vmem>>, %arg3: memref<16x64xbf16, #tpu.memory_space<vmem>>, %arg4: memref<1x64xf32, #tpu.memory_space<vmem>>, %arg5: memref<64x16xf32, #tpu.memory_space<vmem>>, %arg6: memref<1x16x64xf32, #tpu.memory_space<vmem>>, %arg7: memref<1x64x64xbf16, #tpu.memory_space<vmem>>) attributes {dimension_semantics = [#tpu.dimension_semantics<parallel>, #tpu.dimension_semantics<parallel>], iteration_bounds = array<i64: 2, 1>, scalar_prefetch = 0 : i64, scratch_operands = 0 : i64, tpu.core_type = #tpu.core_type<tc>, window_params = [{transform_indices = @transform_0, window_bounds = array<i64: 1, 64, 16>}, {pipeline_mode = #tpu.pipeline_mode<synchronous>, transform_indices = @transform_1, window_bounds = array<i64: 16, 64>}, {pipeline_mode = #tpu.pipeline_mode<synchronous>, transform_indices = @transform_2, window_bounds = array<i64: 1, 64>}, {transform_indices = @transform_3, window_bounds = array<i64: 64, 16>}, {transform_indices = @transform_4, window_bounds = array<i64: 1, 16, 64>}, {transform_indices = @transform_5, window_bounds = array<i64: 1, 64, 64>}]} {
    %c0 = arith.constant 0 : index
    %c0_0 = arith.constant 0 : index
    %c0_1 = arith.constant 0 : index
    %0 = vector.load %arg2[%c0, %c0_0, %c0_1] : memref<1x64x16xbf16, #tpu.memory_space<vmem>>, vector<1x64x16xbf16>
    %1 = vector.shape_cast %0 : vector<1x64x16xbf16> to vector<64x16xbf16>
    %c0_2 = arith.constant 0 : index
    %c0_3 = arith.constant 0 : index
    %2 = vector.load %arg3[%c0_2, %c0_3] : memref<16x64xbf16, #tpu.memory_space<vmem>>, vector<16x64xbf16>
    %cst = arith.constant dense<0.000000e+00> : vector<64x64xf32>
    %3 = tpu.matmul %1, %2, %cst {dimension_numbers = #tpu.dot_dimension_numbers<[1], [0], [0], [1], [0, 0, 1, 1], [], []>} : vector<64x16xbf16>, vector<16x64xbf16>, vector<64x64xf32> -> vector<64x64xf32>
    %c0_4 = arith.constant 0 : index
    %c0_5 = arith.constant 0 : index
    %4 = vector.load %arg5[%c0_4, %c0_5] : memref<64x16xf32, #tpu.memory_space<vmem>>, vector<64x16xf32>
    %c0_6 = arith.constant 0 : index
    %c0_7 = arith.constant 0 : index
    %c0_8 = arith.constant 0 : index
    %5 = vector.load %arg6[%c0_6, %c0_7, %c0_8] : memref<1x16x64xf32, #tpu.memory_space<vmem>>, vector<1x16x64xf32>
    %6 = vector.shape_cast %5 : vector<1x16x64xf32> to vector<16x64xf32>
    %cst_9 = arith.constant dense<0.000000e+00> : vector<64x64xf32>
    %7 = tpu.matmul %4, %6, %cst_9 {dimension_numbers = #tpu.dot_dimension_numbers<[1], [0], [0], [1], [0, 0, 1, 1], [], []>} : vector<64x16xf32>, vector<16x64xf32>, vector<64x64xf32> -> vector<64x64xf32>
    %c0_10 = arith.constant 0 : index
    %c0_11 = arith.constant 0 : index
    %8 = vector.load %arg4[%c0_10, %c0_11] : memref<1x64xf32, #tpu.memory_space<vmem>>, vector<1x64xf32>
    %9 = vector.broadcast %8 : vector<1x64xf32> to vector<64x64xf32>
    %10 = arith.addf %3, %9 : vector<64x64xf32>
    %11 = arith.addf %10, %7 : vector<64x64xf32>
    %cst_12 = arith.constant 2.000000e-01 : f32
    %12 = vector.broadcast %cst_12 : f32 to vector<64x64xf32>
    %13 = arith.mulf %12, %11 : vector<64x64xf32>
    %14 = arith.maximumf %11, %13 : vector<64x64xf32>
    %15 = arith.truncf %14 : vector<64x64xf32> to vector<64x64xbf16>
    %c0_13 = arith.constant 0 : index
    %c0_14 = arith.constant 0 : index
    %c0_15 = arith.constant 0 : index
    %16 = vector.load %arg7[%c0_13, %c0_14, %c0_15] : memref<1x64x64xbf16, #tpu.memory_space<vmem>>, vector<1x64x64xbf16>
    %17 = vector.shape_cast %16 : vector<1x64x64xbf16> to vector<64x64xbf16>
    %18 = vector.shape_cast %15 : vector<64x64xbf16> to vector<1x64x64xbf16>
    tpu.vector_store %arg7[%c0_13, %c0_14, %c0_15], %18 {strides = array<i32>} : memref<1x64x64xbf16, #tpu.memory_space<vmem>>, vector<1x64x64xbf16>,
    return
  }
  func.func @transform_0(%arg0: i32, %arg1: i32) -> (i32, i32, i32) {
    %c0_i32 = arith.constant 0 : i32
    %c0_i32_0 = arith.constant 0 : i32
    return %arg0, %arg1, %c0_i32 : i32, i32, i32
  }
  func.func @transform_1(%arg0: i32, %arg1: i32) -> (i32, i32) {
    %c0_i32 = arith.constant 0 : i32
    %c0_i32_0 = arith.constant 0 : i32
    %c0_i32_1 = arith.constant 0 : i32
    return %c0_i32, %c0_i32_0 : i32, i32
  }
  func.func @transform_2(%arg0: i32, %arg1: i32) -> (i32, i32) {
    %c0_i32 = arith.constant 0 : i32
    %c0_i32_0 = arith.constant 0 : i32
    %c0_i32_1 = arith.constant 0 : i32
    return %c0_i32, %c0_i32_0 : i32, i32
  }
  func.func @transform_3(%arg0: i32, %arg1: i32) -> (i32, i32) {
    %c0_i32 = arith.constant 0 : i32
    %c0_i32_0 = arith.constant 0 : i32
    return %arg1, %c0_i32 : i32, i32
  }
  func.func @transform_4(%arg0: i32, %arg1: i32) -> (i32, i32, i32) {
    %c0_i32 = arith.constant 0 : i32
    %c0_i32_0 = arith.constant 0 : i32
    %c0_i32_1 = arith.constant 0 : i32
    return %arg0, %c0_i32, %c0_i32_0 : i32, i32, i32
  }
  func.func @transform_5(%arg0: i32, %arg1: i32) -> (i32, i32, i32) {
    %c0_i32 = arith.constant 0 : i32
    %c0_i32_0 = arith.constant 0 : i32
    return %arg0, %arg1, %c0_i32 : i32, i32, i32
  }
}

module attributes {stable_mosaic.version = 11 : i64} {
  func.func @_gemm_kernel(%arg0: i32, %arg1: i32, %arg2: i32, %arg3: memref<32x1024xbf16, #tpu.memory_space<vmem>>, %arg4: memref<1024x128xbf16, #tpu.memory_space<vmem>>, %arg5: memref<1x128xf32, #tpu.memory_space<vmem>>, %arg6: memref<32x128xbf16, #tpu.memory_space<vmem>>, %arg7: memref<32x128xf32, #tpu.memory_space<vmem>>) attributes {dimension_semantics = [#tpu.dimension_semantics<parallel>, #tpu.dimension_semantics<parallel>, #tpu.dimension_semantics<arbitrary>], iteration_bounds = array<i64: 1, 1, 1>, scalar_prefetch = 0 : i64, scratch_operands = 1 : i64, tpu.core_type = #tpu.core_type<tc>, window_params = [{transform_indices = @transform_0, window_bounds = array<i64: 32, 1024>}, {transform_indices = @transform_1, window_bounds = array<i64: 1024, 128>}, {transform_indices = @transform_2, window_bounds = array<i64: 1, 128>}, {transform_indices = @transform_3, window_bounds = array<i64: 32, 128>}]} {
    %c0_i32 = arith.constant 0 : i32
    %0 = arith.cmpi eq, %arg2, %c0_i32 : i32
    %1 = arith.extui %0 : i1 to i32
    %c0_i32_0 = arith.constant 0 : i32
    %2 = arith.cmpi ne, %1, %c0_i32_0 : i32
    scf.if %2 {
      %cst_10 = arith.constant 0.000000e+00 : f32
      %12 = vector.broadcast %cst_10 : f32 to vector<32x128xf32>
      %c0_11 = arith.constant 0 : index
      %c0_12 = arith.constant 0 : index
      %13 = vector.load %arg7[%c0_11, %c0_12] : memref<32x128xf32, #tpu.memory_space<vmem>>, vector<32x128xf32>
      tpu.vector_store %arg7[%c0_11, %c0_12], %12 {strides = array<i32>} : memref<32x128xf32, #tpu.memory_space<vmem>>, vector<32x128xf32>,
    } else {
    }
    %c0 = arith.constant 0 : index
    %c0_1 = arith.constant 0 : index
    %3 = vector.load %arg7[%c0, %c0_1] : memref<32x128xf32, #tpu.memory_space<vmem>>, vector<32x128xf32>
    %c0_2 = arith.constant 0 : index
    %c0_3 = arith.constant 0 : index
    %4 = vector.load %arg3[%c0_2, %c0_3] : memref<32x1024xbf16, #tpu.memory_space<vmem>>, vector<32x1024xbf16>
    %c0_4 = arith.constant 0 : index
    %c0_5 = arith.constant 0 : index
    %5 = vector.load %arg4[%c0_4, %c0_5] : memref<1024x128xbf16, #tpu.memory_space<vmem>>, vector<1024x128xbf16>
    %cst = arith.constant dense<0.000000e+00> : vector<32x128xf32>
    %6 = tpu.matmul %4, %5, %cst {dimension_numbers = #tpu.dot_dimension_numbers<[1], [0], [0], [1], [0, 0, 1, 1], [], []>} : vector<32x1024xbf16>, vector<1024x128xbf16>, vector<32x128xf32> -> vector<32x128xf32>
    %7 = arith.addf %3, %6 : vector<32x128xf32>
    %c0_6 = arith.constant 0 : index
    %c0_7 = arith.constant 0 : index
    %8 = vector.load %arg7[%c0_6, %c0_7] : memref<32x128xf32, #tpu.memory_space<vmem>>, vector<32x128xf32>
    tpu.vector_store %arg7[%c0_6, %c0_7], %7 {strides = array<i32>} : memref<32x128xf32, #tpu.memory_space<vmem>>, vector<32x128xf32>,
    %c0_i32_8 = arith.constant 0 : i32
    %9 = arith.cmpi eq, %arg2, %c0_i32_8 : i32
    %10 = arith.extui %9 : i1 to i32
    %c0_i32_9 = arith.constant 0 : i32
    %11 = arith.cmpi ne, %10, %c0_i32_9 : i32
    scf.if %11 {
      %c0_10 = arith.constant 0 : index
      %c0_11 = arith.constant 0 : index
      %12 = vector.load %arg7[%c0_10, %c0_11] : memref<32x128xf32, #tpu.memory_space<vmem>>, vector<32x128xf32>
      %c0_12 = arith.constant 0 : index
      %c0_13 = arith.constant 0 : index
      %13 = vector.load %arg5[%c0_12, %c0_13] : memref<1x128xf32, #tpu.memory_space<vmem>>, vector<1x128xf32>
      %14 = vector.broadcast %13 : vector<1x128xf32> to vector<32x128xf32>
      %15 = arith.addf %12, %14 : vector<32x128xf32>
      %cst_14 = arith.constant 2.000000e-01 : f32
      %16 = vector.broadcast %cst_14 : f32 to vector<32x128xf32>
      %17 = arith.mulf %16, %15 : vector<32x128xf32>
      %18 = arith.maximumf %15, %17 : vector<32x128xf32>
      %19 = arith.truncf %18 : vector<32x128xf32> to vector<32x128xbf16>
      %c0_15 = arith.constant 0 : index
      %c0_16 = arith.constant 0 : index
      %20 = vector.load %arg6[%c0_15, %c0_16] : memref<32x128xbf16, #tpu.memory_space<vmem>>, vector<32x128xbf16>
      tpu.vector_store %arg6[%c0_15, %c0_16], %19 {strides = array<i32>} : memref<32x128xbf16, #tpu.memory_space<vmem>>, vector<32x128xbf16>,
    } else {
    }
    return
  }
  func.func @transform_0(%arg0: i32, %arg1: i32, %arg2: i32) -> (i32, i32) {
    %c0_i32 = arith.constant 0 : i32
    return %arg0, %arg2 : i32, i32
  }
  func.func @transform_1(%arg0: i32, %arg1: i32, %arg2: i32) -> (i32, i32) {
    %c0_i32 = arith.constant 0 : i32
    return %arg2, %arg1 : i32, i32
  }
  func.func @transform_2(%arg0: i32, %arg1: i32, %arg2: i32) -> (i32, i32) {
    %c0_i32 = arith.constant 0 : i32
    %c0_i32_0 = arith.constant 0 : i32
    return %c0_i32, %arg1 : i32, i32
  }
  func.func @transform_3(%arg0: i32, %arg1: i32, %arg2: i32) -> (i32, i32) {
    %c0_i32 = arith.constant 0 : i32
    return %arg0, %arg1 : i32, i32
  }
}

module attributes {stable_mosaic.version = 11 : i64} {
  func.func @_gemm_kernel(%arg0: i32, %arg1: i32, %arg2: i32, %arg3: memref<8x2048xbf16, #tpu.memory_space<vmem>>, %arg4: memref<2048x512xbf16, #tpu.memory_space<vmem>>, %arg5: memref<1x512xf32, #tpu.memory_space<vmem>>, %arg6: memref<8x512xf32, #tpu.memory_space<vmem>>, %arg7: memref<8x512xf32, #tpu.memory_space<vmem>>) attributes {dimension_semantics = [#tpu.dimension_semantics<parallel>, #tpu.dimension_semantics<parallel>, #tpu.dimension_semantics<arbitrary>], iteration_bounds = array<i64: 1, 2, 1>, scalar_prefetch = 0 : i64, scratch_operands = 1 : i64, tpu.core_type = #tpu.core_type<tc>, window_params = [{transform_indices = @transform_0, window_bounds = array<i64: 8, 2048>}, {transform_indices = @transform_1, window_bounds = array<i64: 2048, 512>}, {transform_indices = @transform_2, window_bounds = array<i64: 1, 512>}, {transform_indices = @transform_3, window_bounds = array<i64: 8, 512>}]} {
    %c0_i32 = arith.constant 0 : i32
    %0 = arith.cmpi eq, %arg2, %c0_i32 : i32
    %1 = arith.extui %0 : i1 to i32
    %c0_i32_0 = arith.constant 0 : i32
    %2 = arith.cmpi ne, %1, %c0_i32_0 : i32
    scf.if %2 {
      %cst_10 = arith.constant 0.000000e+00 : f32
      %12 = vector.broadcast %cst_10 : f32 to vector<8x512xf32>
      %c0_11 = arith.constant 0 : index
      %c0_12 = arith.constant 0 : index
      %13 = vector.load %arg7[%c0_11, %c0_12] : memref<8x512xf32, #tpu.memory_space<vmem>>, vector<8x512xf32>
      tpu.vector_store %arg7[%c0_11, %c0_12], %12 {strides = array<i32>} : memref<8x512xf32, #tpu.memory_space<vmem>>, vector<8x512xf32>,
    } else {
    }
    %c0 = arith.constant 0 : index
    %c0_1 = arith.constant 0 : index
    %3 = vector.load %arg7[%c0, %c0_1] : memref<8x512xf32, #tpu.memory_space<vmem>>, vector<8x512xf32>
    %c0_2 = arith.constant 0 : index
    %c0_3 = arith.constant 0 : index
    %4 = vector.load %arg3[%c0_2, %c0_3] : memref<8x2048xbf16, #tpu.memory_space<vmem>>, vector<8x2048xbf16>
    %c0_4 = arith.constant 0 : index
    %c0_5 = arith.constant 0 : index
    %5 = vector.load %arg4[%c0_4, %c0_5] : memref<2048x512xbf16, #tpu.memory_space<vmem>>, vector<2048x512xbf16>
    %cst = arith.constant dense<0.000000e+00> : vector<8x512xf32>
    %6 = tpu.matmul %4, %5, %cst {dimension_numbers = #tpu.dot_dimension_numbers<[1], [0], [0], [1], [0, 0, 1, 1], [], []>} : vector<8x2048xbf16>, vector<2048x512xbf16>, vector<8x512xf32> -> vector<8x512xf32>
    %7 = arith.addf %3, %6 : vector<8x512xf32>
    %c0_6 = arith.constant 0 : index
    %c0_7 = arith.constant 0 : index
    %8 = vector.load %arg7[%c0_6, %c0_7] : memref<8x512xf32, #tpu.memory_space<vmem>>, vector<8x512xf32>
    tpu.vector_store %arg7[%c0_6, %c0_7], %7 {strides = array<i32>} : memref<8x512xf32, #tpu.memory_space<vmem>>, vector<8x512xf32>,
    %c0_i32_8 = arith.constant 0 : i32
    %9 = arith.cmpi eq, %arg2, %c0_i32_8 : i32
    %10 = arith.extui %9 : i1 to i32
    %c0_i32_9 = arith.constant 0 : i32
    %11 = arith.cmpi ne, %10, %c0_i32_9 : i32
    scf.if %11 {
      %c0_10 = arith.constant 0 : index
      %c0_11 = arith.constant 0 : index
      %12 = vector.load %arg7[%c0_10, %c0_11] : memref<8x512xf32, #tpu.memory_space<vmem>>, vector<8x512xf32>
      %c0_12 = arith.constant 0 : index
      %c0_13 = arith.constant 0 : index
      %13 = vector.load %arg5[%c0_12, %c0_13] : memref<1x512xf32, #tpu.memory_space<vmem>>, vector<1x512xf32>
      %14 = vector.broadcast %13 : vector<1x512xf32> to vector<8x512xf32>
      %15 = arith.addf %12, %14 : vector<8x512xf32>
      %cst_14 = arith.constant 2.000000e-01 : f32
      %16 = vector.broadcast %cst_14 : f32 to vector<8x512xf32>
      %17 = arith.mulf %16, %15 : vector<8x512xf32>
      %18 = arith.maximumf %15, %17 : vector<8x512xf32>
      %c0_15 = arith.constant 0 : index
      %c0_16 = arith.constant 0 : index
      %19 = vector.load %arg6[%c0_15, %c0_16] : memref<8x512xf32, #tpu.memory_space<vmem>>, vector<8x512xf32>
      tpu.vector_store %arg6[%c0_15, %c0_16], %18 {strides = array<i32>} : memref<8x512xf32, #tpu.memory_space<vmem>>, vector<8x512xf32>,
    } else {
    }
    return
  }
  func.func @transform_0(%arg0: i32, %arg1: i32, %arg2: i32) -> (i32, i32) {
    %c0_i32 = arith.constant 0 : i32
    return %arg0, %arg2 : i32, i32
  }
  func.func @transform_1(%arg0: i32, %arg1: i32, %arg2: i32) -> (i32, i32) {
    %c0_i32 = arith.constant 0 : i32
    return %arg2, %arg1 : i32, i32
  }
  func.func @transform_2(%arg0: i32, %arg1: i32, %arg2: i32) -> (i32, i32) {
    %c0_i32 = arith.constant 0 : i32
    %c0_i32_0 = arith.constant 0 : i32
    return %c0_i32, %arg1 : i32, i32
  }
  func.func @transform_3(%arg0: i32, %arg1: i32, %arg2: i32) -> (i32, i32) {
    %c0_i32 = arith.constant 0 : i32
    return %arg0, %arg1 : i32, i32
  }
}

</mosaic_0001>

<bundles_post_ra>
// kernel: cdiscriminator_forward.3
= control target key start
LH: loop header
LB: loop body
LE: loop exit
PB: predicated region body
PF: predicated region fallthrough
CT: control target
= control target key end

     0   :  { %10 = vsyncpa [#allocation3], 0  ;;  %s1249_s0 = inlined_call_operand.vmem [shape: bf16[2,64,16], index: 0, kind: input, shape index: {}]   ;;  %s1250_s1 = inlined_call_operand.hbm [shape: bf16[16,64], index: 1, kind: input, shape index: {}]   ;;  %s1251_s2 = inlined_call_operand.hbm [shape: f32[1,64], index: 2, kind: input, shape index: {}]   ;;  %s1252_s3 = inlined_call_operand.vmem [shape: f32[64,16], index: 3, kind: input, shape index: {}]   ;;  %s1253_s4 = inlined_call_operand.vmem [shape: f32[2,16,64], index: 4, kind: input, shape index: {}]   ;;  %s1254_s5 = inlined_call_operand.vmem [shape: bf16[2,64,64], index: 5, kind: output, shape index: {}]  }
   0x1   :  { %11 = vsyncpa [#allocation5], 0  ;;  %s1070_s18 = smov 0   ;;  %s1072_s19 = smov 0  }
   0x2   :  { %s1074_s20 = smov 0  }
   0x3 LB: > { %s796_s21 = sadd.s32 4294967295, %s1034_s20   ;;  %s29_s22 = sadd.s32 1, %s1030_s19  ;;  %s1034_s20 = sphi %s1074_s20, %s17_s20   ;;  %s1030_s19 = sphi %s1072_s19, %s1264_s19   ;;  %s1026_s18 = sphi %s1070_s18, %s1263_s18  }
   0x4   : > { %p31_p0 = scmp.ge.s32.totalorder %s29_s22, 2  ;;  %p798_p1 = scmp.ge.s32.totalorder %s1034_s20, 1 }
   0x5   : > { %p184_p2 = scmp.lt.s32.totalorder %s1034_s20, 3  ;;  %p1095_p4 = scmp.eq.s32.totalorder %s796_s21, 0 }
   0x6   : > { %s1266_s22 = smov (%p31_p0, %s29_s22), 0  ;;  %s1036_s25 = smov [#allocation2]  }
   0x7   : > { %p1091_p3 = pnand %p798_p1, %p184_p2  ;;  %s196_s26 = sshll.u32 %s1036_s25, 4  ;;  %s197_s26 = int_to_ptr.vmem [resolvable:$true] %s196_s26 }
   0x8   : > { %s1259_s24 = scalar_select %p1095_p4, 1, 0 }
   0x9   : > { %s1258_s23 = scalar_select %p1091_p3, 1, 0 }
   0xa   : > { %p904_p5 = pneg %p1091_p3  ;;  %s1037_s28 = smov [#allocation4]  }
   0xb   : > { %s210_s29 = sshll.u32 %s1037_s28, 4  ;;  %s948_s7 = scalar_lea.hbm %s1250_s1, 128  ;;  %s1107_s29 = int_to_ptr.vmem [resolvable:$true] %s210_s29 }
   0xc   : > { %p1103_p6 = pnand %p1095_p4, %p904_p5  ;;  %p949_p7 = scmp.ne.s32.totalorder %s1250_s1, %s948_s7 }
   0xd   : > { %p955_p11 = scmp.lt.u32.totalorder %s948_s7, %s1250_s1 }
   0xe   : > { %p950_p8 = pneg %p1103_p6 }
  0x10   : > { %p951_p9 = pnand %p950_p8, %p949_p7 }
  0x12   : > { %p952_p10 = pneg %p951_p9 }
  0x14   : > { %p957_p12 = pnand %p955_p11, %p952_p10 }
  0x16   : > { %960 = shalt.err (!%p957_p12)
}
  0x17   : > { %s961_s12 = scalar_lea.vmem %s197_s26, 128  ;;  %p969_p2 = scmp.lt.s32.totalorder %s197_s26, %s197_s26 }
  0x18   : > { %p962_p13 = scmp.ne.s32.totalorder %s197_s26, %s961_s12  ;;  %p970_p5 = scmp.lt.s32.totalorder %s961_s12, %s961_s12 }
  0x1a   : > { %p964_p0 = pnand %p962_p13, %p950_p8  ;;  %p971_p4 = por %p970_p5, %p969_p2 }
  0x1c   : > { %p965_p1 = pneg %p964_p0 }
  0x1e   : > { %p972_p3 = pnand %p971_p4, %p965_p1 }
  0x20   : > { %975 = shalt.err (!%p972_p3)
}
  0x21   : > { %s1038_s13 = smov 64   ;;  %s1039_s14 = smov 4  }
  0x22   : > { %907 = dma.hbm_to_vmem [thread:$0]  (!%p1103_p6), %s1250_s1, 128, %s197_s26, [#allocation3], %s1038_s13, %s1038_s13, %s1039_s14  }
  0x23   : > { %s976_s25 = scalar_lea.hbm %s1251_s2, 16 }
  0x24   : > { %p977_p7 = scmp.ne.s32.totalorder %s1251_s2, %s976_s25  ;;  %p983_p9 = scmp.lt.u32.totalorder %s976_s25, %s1251_s2 }
  0x26   : > { %p979_p3 = pnand %p977_p7, %p950_p8 }
  0x28   : > { %p980_p4 = pneg %p979_p3 }
  0x2a   : > { %p985_p10 = pnand %p983_p9, %p980_p4 }
  0x2c   : > { %988 = shalt.err (!%p985_p10)
}
  0x2d   : > { %s989_s26 = scalar_lea.vmem %s1107_s29, 16  ;;  %s996_s8 = scalar_lea.vmem %s1107_s29, 32 }
  0x2e   : > { %p990_p11 = scmp.ne.s32.totalorder %s1107_s29, %s989_s26  ;;  %p997_p0 = scmp.lt.s32.totalorder %s1107_s29, %s1107_s29 }
  0x2f   : > { %p998_p1 = scmp.lt.s32.totalorder %s996_s8, %s989_s26 }
  0x30   : > { %p992_p12 = pnand %p990_p11, %p950_p8 }
  0x31   : > { %p999_p2 = por %p998_p1, %p997_p0 }
  0x32   : > { %p993_p13 = pneg %p992_p12 }
  0x34   : > { %p1000_p5 = pnand %p999_p2, %p993_p13 }
  0x36   : > { %1003 = shalt.err (!%p1000_p5)
}
  0x37   : > { %910 = dma.hbm_to_vmem [thread:$0]  (!%p1103_p6), %s1251_s2, 16, %s1107_s29, [#allocation5]  }
  0x38   : > { %p1261_p7 = scmp.ne.s32.totalorder %s1258_s23, 0 }
  0x39   : > { %p1262_p8 = scmp.ne.s32.totalorder (!%p1261_p7), %s1259_s24, 0 }
  0x3a   : > { %253 = sbr.rel (%p1261_p7) target bundleno = 314 (0x13a), region = 40 }
  0x41   : > { %1017 = dma.done.wait (%p1262_p8), [#allocation3], 128  }
  0x42   : > { %1019 = vsyncadd (%p1262_p8), [#allocation3], 4294967168 }
  0x43   : > { %1021 = dma.done.wait (%p1262_p8), [#allocation5], 16  }
  0x44   : > { %1023 = vsyncadd (%p1262_p8), [#allocation5], 4294967280  ;;  %p304_p3 = scmp.lt.s32.totalorder %s1026_s18, 1  ;;  %vm355_vm0 = vcmask 130048   ;;  %v943_v3 = vld [vmem:[#allocation2] sm:$0xff]   ;;  %v346_v6 = vld [vmem:[%s1252_s3 + $0x8] sm:$0xff] }
  0x45   : > { %v345_v4 = vld [vmem:[%s1252_s3] sm:$0xff]  ;;  %882 = vmatprep.subr.bf16.mxu1 %v943_v3  ;;  %v347_v8 = vld [vmem:[%s1252_s3 + $0x10] sm:$0xff]  ;;  %v348_v10 = vld [vmem:[%s1252_s3 + $0x18] sm:$0xff]  ;;  %vm651_vm1 = vcmask 519168  }
  0x46   : > { %s1268_s18 = smov (!%p304_p3, %s1026_s18), 1  ;;  %870 = vmatprep.mubr.msk.f32.mxu0 %vm355_vm0, %v345_v4  ;;  %883 = vmatpush3.bf16.msra.mxu1 %v943_v3  ;;  %v349_v11 = vld [vmem:[%s1252_s3 + $0x20] sm:$0xff]  ;;  %v350_v13 = vld [vmem:[%s1252_s3 + $0x28] sm:$0xff]  ;;  %v351_v14 = vld [vmem:[%s1252_s3 + $0x30] sm:$0xff] }
  0x47   : > { %s840_s23 = sshll.u32 %s1268_s18, 5  ;;  %s841_s27 = sshll.u32 %s1268_s18, 4  ;;  %v352_v15 = vld [vmem:[%s1252_s3 + $0x38] sm:$0xff]  ;;  %v820_v16 = vld [vmem:[#allocation4] ss:$0 sm:$0xff] }
  0x48   : > { %s323_s12 = scalar_lea.vmem %s1253_s4, %s841_s27  ;;  %s311_s24 = scalar_lea.vmem %s1249_s0, %s840_s23 }
  0x49   : > { %v353_v0 = vld [vmem:[%s323_s12] sm:$0xff]  ;;  %v354_v1 = vld [vmem:[%s323_s12 + $0x8] sm:$0xff]  ;;  %v946_v9 = vld [vmem:[%s311_s24 + $0x10] sm:$0xff]   ;;  %s1222_s14 = scalar_lea.vmem %s1254_s5, %s840_s23 }
  0x4a   : > { %v892_v2 = vpack.c.bf16 %v354_v1, %v353_v0  ;;  %v944_v5 = vld [vmem:[%s311_s24] sm:$0xff]   ;;  %v945_v7 = vld [vmem:[%s311_s24 + $0x8] sm:$0xff]   ;;  %v947_v12 = vld [vmem:[%s311_s24 + $0x18] sm:$0xff]  }
  0x4b   : > { %884 = vmatprep.mubr.msk.bf16.mxu1 %vm355_vm0, %v944_v5 }
  0x4c   : > { %893 = vmatprep.subr.bf16.mxu0 %v892_v2  ;;  %885 = vmatmul.mubr.msk.bf16.vlgmr.msra.gmra.mrb[0].mxu1 %vm355_vm0, %v945_v7 }
  0x4d   : > { %895 = vmatpush3.bf16.msra.mxu0 %v892_v2  ;;  %888 = vmatprep.mubr.msk.bf16.mxu1 %vm355_vm0, %v946_v9 }
  0x50   : > { %871 = vmatmul.mubr.msk.f32.vlgmr.msra.gmra.mrb[0].mxu0 %vm355_vm0, %v346_v6 }
  0x51   : > { %873 = vmatprep.mubr.msk.f32.mxu0 %vm355_vm0, %v347_v8 }
  0x54   : > { %874 = vmatmul.mubr.msk.f32.gmra.mrb[2].mxu0 %vm355_vm0, %v348_v10  ;;  %889 = vmatmul.mubr.msk.bf16.gmra.mrb[4].mxu1 %vm355_vm0, %v947_v12 }
  0x55   : > { %876 = vmatprep.mubr.msk.f32.mxu0 %vm355_vm0, %v349_v11 }
  0x58   : > { %877 = vmatmul.mubr.msk.f32.gmra.mrb[4].mxu0 %vm355_vm0, %v350_v13 }
  0x59   : > { %879 = vmatprep.mubr.msk.f32.mxu0 %vm355_vm0, %v351_v14 }
  0x5c   : > { %880 = vmatmul.mubr.msk.f32.gmra.mrb[6].mxu0 %vm355_vm0, %v352_v15 }
 0x11f   : > { %v886_v18 = vpop.f32.mrb[0].mxu1 }
 0x120   : > { %v564_v20 = vpop.f32.mrb[1].mxu1  ;;  %v573_v25 = vadd.f32 %v886_v18, %v820_v16 }
 0x121   : > { %v565_v21 = vadd.f32 %v820_v16, %v564_v20  ;;  %v887_v22 = vpop.f32.mrb[2].mxu1 }
 0x122   : > { %v576_v23 = vadd.f32 %v887_v22, %v820_v16  ;;  %v567_v24 = vpop.f32.mrb[3].mxu1 }
 0x123   : > { %v872_v17 = vpop.f32.mrb[0].mxu0  ;;  %v568_v27 = vadd.f32 %v820_v16, %v567_v24 }
 0x124   : > { %v446_v19 = vpop.f32.mrb[1].mxu0 }
 0x125   : > { %v595_v26 = vadd.f32 %v565_v21, %v446_v19  ;;  %v596_v32 = vadd.f32 %v872_v17, %v568_v27 }
 0x127   : > { %v875_v28 = vpop.f32.mrb[2].mxu0  ;;  %v603_v31 = vmul.f32 0.2, %v595_v26  ;;  %v604_v36 = vmul.f32 0.2, %v596_v32  ;;  %v890_v39 = vpop.f32.mrb[4].mxu1 }
 0x128   : > { %v598_v29 = vadd.f32 %v875_v28, %v576_v23  ;;  %v456_v30 = vpop.f32.mrb[3].mxu0  ;;  %v580_v42 = vpop.f32.mrb[5].mxu1  ;;  %v589_v49 = vadd.f32 %v890_v39, %v820_v16 }
 0x129   : > { %v597_v33 = vadd.f32 %v573_v25, %v456_v30  ;;  %v611_v35 = vmax.f32 %v595_v26, %v603_v31  ;;  %v612_v44 = vmax.f32 %v596_v32, %v604_v36  ;;  %v581_v46 = vadd.f32 %v820_v16, %v580_v42  ;;  %v891_v47 = vpop.f32.mrb[6].mxu1 }
 0x12a   : > { %v606_v34 = vmul.f32 0.2, %v598_v29  ;;  %v592_v50 = vadd.f32 %v891_v47, %v820_v16  ;;  %v583_v51 = vpop.f32.mrb[7].mxu1 }
 0x12b   : > { %v605_v37 = vmul.f32 0.2, %v597_v33  ;;  %v878_v38 = vpop.f32.mrb[4].mxu0  ;;  %v843_v43 = vpack.c.bf16 %v611_v35, %v611_v35  ;;  %v844_v52 = vpack.c.bf16 %v612_v44, %v612_v44  ;;  %v584_v55 = vadd.f32 %v820_v16, %v583_v51 }
 0x12c   : > { %v614_v40 = vmax.f32 %v598_v29, %v606_v34  ;;  %v466_v41 = vpop.f32.mrb[5].mxu0 }
 0x12d   : > { %v613_v45 = vmax.f32 %v597_v33, %v605_v37  ;;  %652 = vst.msk [vmem:[%s1222_s14] sm:$0xf] %vm651_vm1, %v843_v43  ;;  %v599_v54 = vadd.f32 %v581_v46, %v466_v41  ;;  %653 = vst.msk [vmem:[%s1222_s14 + $0x4] sm:$0xf] %vm651_vm1, %v844_v52  ;;  %v600_v60 = vadd.f32 %v878_v38, %v584_v55 }
 0x12e   : > { %v846_v48 = vpack.c.bf16 %v614_v40, %v614_v40 }
 0x12f   : > { %v845_v53 = vpack.c.bf16 %v613_v45, %v613_v45  ;;  %v881_v56 = vpop.f32.mrb[6].mxu0  ;;  %v607_v59 = vmul.f32 0.2, %v599_v54  ;;  %v608_v0 = vmul.f32 0.2, %v600_v60 }
 0x130   : > { %655 = vst.msk [vmem:[%s1222_s14 + $0xc] sm:$0xf] %vm651_vm1, %v846_v48  ;;  %v602_v57 = vadd.f32 %v881_v56, %v592_v50  ;;  %v476_v58 = vpop.f32.mrb[7].mxu0 }
 0x131   : > { %654 = vst.msk [vmem:[%s1222_s14 + $0x8] sm:$0xf] %vm651_vm1, %v845_v53  ;;  %v601_v61 = vadd.f32 %v589_v49, %v476_v58  ;;  %v615_v63 = vmax.f32 %v599_v54, %v607_v59  ;;  %v616_v4 = vmax.f32 %v600_v60, %v608_v0 }
 0x132   : > { %v610_v62 = vmul.f32 0.2, %v602_v57 }
 0x133   : > { %v609_v1 = vmul.f32 0.2, %v601_v61  ;;  %v847_v3 = vpack.c.bf16 %v615_v63, %v615_v63  ;;  %v848_v7 = vpack.c.bf16 %v616_v4, %v616_v4 }
 0x134   : > { %v618_v2 = vmax.f32 %v602_v57, %v610_v62 }
 0x135   : > { %v617_v5 = vmax.f32 %v601_v61, %v609_v1  ;;  %656 = vst.msk [vmem:[%s1222_s14 + $0x10] sm:$0xf] %vm651_vm1, %v847_v3  ;;  %657 = vst.msk [vmem:[%s1222_s14 + $0x14] sm:$0xf] %vm651_vm1, %v848_v7 }
 0x136   : > { %v850_v6 = vpack.c.bf16 %v618_v2, %v618_v2 }
 0x137   : > { %v849_v8 = vpack.c.bf16 %v617_v5, %v617_v5 }
 0x138   : > { %659 = vst.msk [vmem:[%s1222_s14 + $0x1c] sm:$0xf] %vm651_vm1, %v850_v6 }
 0x139   : > { %658 = vst.msk [vmem:[%s1222_s14 + $0x18] sm:$0xf] %vm651_vm1, %v849_v8 }
 0x13a PF: > { %s17_s20 = sadd.s32 1, %s1034_s20   ;;  %s1263_s18 = smov %s1030_s19 }
 0x13b   : > { %p14_p6 = scmp.ge.s32.totalorder %s17_s20, 4   ;;  %s1264_s19 = smov %s1266_s22 }
 0x13d   :  { %16 = sbr.rel (!%p14_p6) target bundleno = 3 (0x3), region = 85 }
 0x144   :  { %690 = vsyncpa [#allocation3], 1 }
 0x145   :  { %692 = vsyncpa [#allocation3 + $0x1], 1 }
 0x146   :  { %693 = vsyncpa [#allocation5], 1 }

// kernel: cdiscriminator_forward.4
= control target key start
LH: loop header
LB: loop body
LE: loop exit
PB: predicated region body
PF: predicated region fallthrough
CT: control target
= control target key end

     0   :  { %8 = vsyncpa [#allocation4], 0  ;;  %s1347_s0 = inlined_call_operand.vmem [shape: bf16[32,1024], index: 0, kind: input, shape index: {}]   ;;  %s1348_s1 = inlined_call_operand.hbm [shape: bf16[1024,128], index: 1, kind: input, shape index: {}]   ;;  %s1349_s2 = inlined_call_operand.hbm [shape: f32[1,128], index: 2, kind: input, shape index: {}]   ;;  %s1350_s3 = inlined_call_operand.vmem [shape: bf16[32,128], index: 3, kind: output, shape index: {}]  }
   0x1   :  { %9 = vsyncpa [#allocation6], 0  ;;  %s1245_s12 = smov [#allocation3]   ;;  %s1197_s16 = scalar_lea.hbm %s1348_s1, 8192 }
   0x2   :  { %s17_s13 = sshll.u32 %s1245_s12, 4  ;;  %p1198_p0 = scmp.ne.s32.totalorder %s1348_s1, %s1197_s16  ;;  %s18_s13 = int_to_ptr.vmem [resolvable:$true] %s17_s13 }
   0x3   :  { %p1201_p1 = scmp.lt.u32.totalorder %s1197_s16, %s1348_s1 }
   0x5   :  { %p1203_p2 = pnand %p1201_p1, %p1198_p0 }
   0x7   :  { %1206 = shalt.err (!%p1203_p2)
}
   0x8   :  { %s1207_s21 = scalar_lea.vmem %s18_s13, 8192  ;;  %p1212_p4 = scmp.lt.s32.totalorder %s18_s13, %s18_s13 }
   0x9   :  { %p1208_p3 = scmp.ne.s32.totalorder %s18_s13, %s1207_s21  ;;  %p1213_p5 = scmp.lt.s32.totalorder %s1207_s21, %s1207_s21 }
   0xb   :  { %p1214_p6 = por %p1213_p5, %p1212_p4 }
   0xd   :  { %p1215_p7 = pnand %p1214_p6, %p1208_p3 }
   0xf   :  { %1218 = shalt.err (!%p1215_p7)
}
  0x10   :  { %s1246_s22 = smov 64   ;;  %s1247_s23 = smov 4  }
  0x11   :  { %23 = dma.hbm_to_vmem [thread:$0]  %s1348_s1, 8192, %s18_s13, [#allocation4], %s1246_s22, %s1246_s22, %s1247_s23  }
  0x12   :  { %s1248_s26 = smov [#allocation5]   ;;  %s1219_s30 = scalar_lea.hbm %s1349_s2, 16 }
  0x13   :  { %s30_s27 = sshll.u32 %s1248_s26, 4  ;;  %p1220_p8 = scmp.ne.s32.totalorder %s1349_s2, %s1219_s30  ;;  %s31_s27 = int_to_ptr.vmem [resolvable:$true] %s30_s27 }
  0x14   :  { %p1223_p9 = scmp.lt.u32.totalorder %s1219_s30, %s1349_s2 }
  0x16   :  { %p1225_p10 = pnand %p1223_p9, %p1220_p8 }
  0x18   :  { %1228 = shalt.err (!%p1225_p10)
}
  0x19   :  { %s1229_s8 = scalar_lea.vmem %s31_s27, 16  ;;  %s1233_s1 = scalar_lea.vmem %s31_s27, 32 }
  0x1a   :  { %p1230_p11 = scmp.ne.s32.totalorder %s31_s27, %s1229_s8  ;;  %p1234_p12 = scmp.lt.s32.totalorder %s31_s27, %s31_s27 }
  0x1b   :  { %p1235_p13 = scmp.lt.s32.totalorder %s1233_s1, %s1229_s8 }
  0x1d   :  { %p1236_p0 = por %p1235_p13, %p1234_p12 }
  0x1f   :  { %p1237_p1 = pnand %p1236_p0, %p1230_p11 }
  0x21   :  { %1240 = shalt.err (!%p1237_p1)
}
  0x22   :  { %33 = dma.hbm_to_vmem [thread:$0]  %s1349_s2, 16, %s31_s27, [#allocation6]  }
  0x23   :  { %1241 = dma.done.wait [#allocation4], 8192  }
  0x24   :  { %1242 = vsyncadd [#allocation4], 4294959104 }
  0x25   :  { %1243 = dma.done.wait [#allocation6], 16  }
  0x26   :  { %1244 = vsyncadd [#allocation6], 4294967280  ;;  %v1133_v0 = vld [vmem:[#allocation3 + $0x40] sm:$0xff]   ;;  %v1137_v4 = vld [vmem:[#allocation3 + $0x48] sm:$0xff]  }
  0x27   :  { %v1134_v1 = vld [vmem:[#allocation3 + $0xc0] sm:$0xff]   ;;  %1017 = vmatprep.subr.bf16.mxu0 %v1133_v0  ;;  %v1138_v5 = vld [vmem:[#allocation3 + $0xc8] sm:$0xff]   ;;  %v1141_v8 = vld [vmem:[#allocation3 + $0x50] sm:$0xff]  }
  0x28   :  { %v1135_v2 = vld [vmem:[#allocation3] sm:$0xff]   ;;  %1045 = vmatprep.subr.bf16.mxu1 %v1134_v1  ;;  %v1139_v6 = vld [vmem:[#allocation3 + $0x8] sm:$0xff]   ;;  %v1142_v9 = vld [vmem:[#allocation3 + $0xd0] sm:$0xff]  }
  0x29   :  { %v1136_v3 = vld [vmem:[#allocation3 + $0x80] sm:$0xff]   ;;  %1018 = vmatpush3.bf16.msra.mxu0 %v1135_v2  ;;  %v1140_v7 = vld [vmem:[#allocation3 + $0x88] sm:$0xff]   ;;  %v1143_v10 = vld [vmem:[#allocation3 + $0x10] sm:$0xff]  }
  0x2a   :  { %1046 = vmatpush3.bf16.msra.mxu1 %v1136_v3  ;;  %1019 = vmatprep.subr.bf16.mxu0 %v1137_v4  ;;  %v1144_v11 = vld [vmem:[#allocation3 + $0x90] sm:$0xff]   ;;  %v1145_v12 = vld [vmem:[#allocation3 + $0x58] sm:$0xff]   ;;  %v1149_v16 = vld [vmem:[#allocation3 + $0x60] sm:$0xff]  }
  0x2b   :  { %1047 = vmatprep.subr.bf16.mxu1 %v1138_v5  ;;  %v1146_v13 = vld [vmem:[#allocation3 + $0xd8] sm:$0xff]   ;;  %v1150_v17 = vld [vmem:[#allocation3 + $0xe0] sm:$0xff]   ;;  %v1153_v20 = vld [vmem:[#allocation3 + $0x68] sm:$0xff]  }
  0x2c   :  { %v1147_v14 = vld [vmem:[#allocation3 + $0x18] sm:$0xff]   ;;  %v1151_v18 = vld [vmem:[#allocation3 + $0x20] sm:$0xff]   ;;  %v1154_v21 = vld [vmem:[#allocation3 + $0xe8] sm:$0xff]  }
  0x2d   :  { %1020 = vmatpush3.bf16.msra.mxu0 %v1139_v6  ;;  %v1148_v15 = vld [vmem:[#allocation3 + $0x98] sm:$0xff]   ;;  %v1152_v19 = vld [vmem:[#allocation3 + $0xa0] sm:$0xff]   ;;  %v1155_v22 = vld [vmem:[#allocation3 + $0x28] sm:$0xff]  }
  0x2e   :  { %1048 = vmatpush3.bf16.msra.mxu1 %v1140_v7  ;;  %1021 = vmatprep.subr.bf16.mxu0 %v1141_v8  ;;  %v1156_v23 = vld [vmem:[#allocation3 + $0xa8] sm:$0xff]   ;;  %v1157_v24 = vld [vmem:[#allocation3 + $0x70] sm:$0xff]   ;;  %v1161_v28 = vld [vmem:[#allocation3 + $0x78] sm:$0xff]  }
  0x2f   :  { %1049 = vmatprep.subr.bf16.mxu1 %v1142_v9  ;;  %v1158_v25 = vld [vmem:[#allocation3 + $0xf0] sm:$0xff]   ;;  %v1162_v29 = vld [vmem:[#allocation3 + $0xf8] sm:$0xff]   ;;  %v53_v32 = vld [vmem:[%s1347_s0] sm:$0xff] }
  0x30   :  { %v1159_v26 = vld [vmem:[#allocation3 + $0x30] sm:$0xff]   ;;  %v1163_v30 = vld [vmem:[#allocation3 + $0x38] sm:$0xff]   ;;  %v57_v33 = vld [vmem:[%s1347_s0 + $0x20] sm:$0xff] }
  0x31   :  { %1022 = vmatpush3.bf16.msra.mxu0 %v1143_v10  ;;  %v1160_v27 = vld [vmem:[#allocation3 + $0xb0] sm:$0xff]   ;;  %v1164_v31 = vld [vmem:[#allocation3 + $0xb8] sm:$0xff]   ;;  %v54_v34 = vld [vmem:[%s1347_s0 + $0x8] sm:$0xff]  ;;  %v917_v35 = vcombine.low %v53_v32, %v57_v33  ;;  %v918_v36 = vcombine.high %v53_v32, %v57_v33 }
  0x32   :  { %1050 = vmatpush3.bf16.msra.mxu1 %v1144_v11  ;;  %1023 = vmatprep.subr.bf16.mxu0 %v1145_v12  ;;  %v58_v37 = vld [vmem:[%s1347_s0 + $0x28] sm:$0xff]  ;;  %v1165_v40 = vld [vmem:[#allocation3 + $0x140] sm:$0xff]   ;;  %v1173_v48 = vld [vmem:[#allocation3 + $0x150] sm:$0xff]  }
  0x33   :  { %1051 = vmatprep.subr.bf16.mxu1 %v1146_v13  ;;  %v919_v38 = vcombine.low %v54_v34, %v58_v37  ;;  %v920_v39 = vcombine.high %v54_v34, %v58_v37  ;;  %693 = vmatprep.mubr.bf16.mxu0 %v918_v36  ;;  %v1166_v41 = vld [vmem:[#allocation3 + $0x1c0] sm:$0xff]   ;;  %v1169_v44 = vld [vmem:[#allocation3 + $0x148] sm:$0xff]   ;;  %v1174_v49 = vld [vmem:[#allocation3 + $0x1d0] sm:$0xff]  }
  0x34   :  { %v1167_v42 = vld [vmem:[#allocation3 + $0x100] sm:$0xff]   ;;  %v1170_v45 = vld [vmem:[#allocation3 + $0x1c8] sm:$0xff]   ;;  %v1175_v50 = vld [vmem:[#allocation3 + $0x110] sm:$0xff]  }
  0x35   :  { %1024 = vmatpush3.bf16.msra.mxu0 %v1147_v14  ;;  %742 = vmatprep.mubr.bf16.mxu1 %v920_v39  ;;  %v1168_v43 = vld [vmem:[#allocation3 + $0x180] sm:$0xff]   ;;  %v1171_v46 = vld [vmem:[#allocation3 + $0x108] sm:$0xff]   ;;  %v1176_v51 = vld [vmem:[#allocation3 + $0x190] sm:$0xff]  }
  0x36   :  { %1052 = vmatpush3.bf16.msra.mxu1 %v1148_v15  ;;  %1025 = vmatprep.subr.bf16.mxu0 %v1149_v16  ;;  %v1172_v47 = vld [vmem:[#allocation3 + $0x188] sm:$0xff]   ;;  %v1177_v52 = vld [vmem:[#allocation3 + $0x158] sm:$0xff]   ;;  %v1181_v56 = vld [vmem:[#allocation3 + $0x160] sm:$0xff]  }
  0x37   :  { %1053 = vmatprep.subr.bf16.mxu1 %v1150_v17  ;;  %v1178_v53 = vld [vmem:[#allocation3 + $0x1d8] sm:$0xff]   ;;  %v1182_v57 = vld [vmem:[#allocation3 + $0x1e0] sm:$0xff]   ;;  %v62_v63 = vld [vmem:[%s1347_s0 + $0x48] sm:$0xff] }
  0x38   :  { %v1179_v54 = vld [vmem:[#allocation3 + $0x118] sm:$0xff]   ;;  %v1183_v58 = vld [vmem:[#allocation3 + $0x120] sm:$0xff]   ;;  %v66_v0 = vld [vmem:[%s1347_s0 + $0x68] sm:$0xff] }
  0x39   :  { %1026 = vmatpush3.bf16.msra.mxu0 %v1151_v18  ;;  %v1180_v55 = vld [vmem:[#allocation3 + $0x198] sm:$0xff]   ;;  %v1184_v59 = vld [vmem:[#allocation3 + $0x1a0] sm:$0xff]   ;;  %v928_v2 = vcombine.high %v62_v63, %v66_v0  ;;  %v1185_v3 = vld [vmem:[#allocation3 + $0x168] sm:$0xff]   ;;  %v927_v4 = vcombine.low %v62_v63, %v66_v0 }
  0x3a   :  { %1054 = vmatpush3.bf16.msra.mxu1 %v1152_v19  ;;  %1027 = vmatprep.subr.bf16.mxu0 %v1153_v20  ;;  %v61_v60 = vld [vmem:[%s1347_s0 + $0x40] sm:$0xff]  ;;  %v1186_v5 = vld [vmem:[#allocation3 + $0x1e8] sm:$0xff]   ;;  %v1189_v8 = vld [vmem:[#allocation3 + $0x170] sm:$0xff]  }
  0x3b   :  { %1055 = vmatprep.subr.bf16.mxu1 %v1154_v21  ;;  %v65_v61 = vld [vmem:[%s1347_s0 + $0x60] sm:$0xff]  ;;  %v1187_v6 = vld [vmem:[#allocation3 + $0x128] sm:$0xff]   ;;  %v1190_v9 = vld [vmem:[#allocation3 + $0x1f0] sm:$0xff]  }
  0x3c   :  { %v926_v62 = vcombine.high %v61_v60, %v65_v61  ;;  %v925_v1 = vcombine.low %v61_v60, %v65_v61  ;;  %v1188_v7 = vld [vmem:[#allocation3 + $0x1a8] sm:$0xff]   ;;  %v1191_v10 = vld [vmem:[#allocation3 + $0x130] sm:$0xff]   ;;  %v1193_v12 = vld [vmem:[#allocation3 + $0x178] sm:$0xff]  }
  0x3d   :  { %1028 = vmatpush3.bf16.msra.mxu0 %v1155_v22  ;;  %v1192_v11 = vld [vmem:[#allocation3 + $0x1b0] sm:$0xff]   ;;  %v1194_v13 = vld [vmem:[#allocation3 + $0x1f8] sm:$0xff]  }
  0x3e   :  { %1056 = vmatpush3.bf16.msra.mxu1 %v1156_v23  ;;  %1029 = vmatprep.subr.bf16.mxu0 %v1157_v24  ;;  %v1195_v14 = vld [vmem:[#allocation3 + $0x138] sm:$0xff]   ;;  %v55_v16 = vld [vmem:[%s1347_s0 + $0x10] sm:$0xff] }
  0x3f   :  { %1057 = vmatprep.subr.bf16.mxu1 %v1158_v25  ;;  %v1196_v15 = vld [vmem:[#allocation3 + $0x1b8] sm:$0xff]   ;;  %v59_v17 = vld [vmem:[%s1347_s0 + $0x30] sm:$0xff] }
  0x40   :  { %v56_v18 = vld [vmem:[%s1347_s0 + $0x18] sm:$0xff]  ;;  %v921_v20 = vcombine.low %v55_v16, %v59_v17  ;;  %v922_v21 = vcombine.high %v55_v16, %v59_v17  ;;  %v63_v24 = vld [vmem:[%s1347_s0 + $0x50] sm:$0xff] }
  0x41   :  { %1030 = vmatpush3.bf16.msra.mxu0 %v1159_v26  ;;  %v60_v19 = vld [vmem:[%s1347_s0 + $0x38] sm:$0xff]  ;;  %v67_v25 = vld [vmem:[%s1347_s0 + $0x70] sm:$0xff] }
  0x42   :  { %1058 = vmatpush3.bf16.msra.mxu1 %v1160_v27  ;;  %1031 = vmatprep.subr.bf16.mxu0 %v1161_v28  ;;  %v923_v22 = vcombine.low %v56_v18, %v60_v19  ;;  %v924_v23 = vcombine.high %v56_v18, %v60_v19  ;;  %v64_v26 = vld [vmem:[%s1347_s0 + $0x58] sm:$0xff]  ;;  %v930_v27 = vcombine.high %v63_v24, %v67_v25 }
  0x43   :  { %1059 = vmatprep.subr.bf16.mxu1 %v1162_v29  ;;  %v68_v28 = vld [vmem:[%s1347_s0 + $0x78] sm:$0xff] }
  0x44   :  { %v932_v29 = vcombine.high %v64_v26, %v68_v28 }
  0x45   :  { %1032 = vmatpush3.bf16.msra.mxu0 %v1163_v30  ;;  %v929_v30 = vcombine.low %v63_v24, %v67_v25 }
  0x46   :  { %1060 = vmatpush3.bf16.msra.mxu1 %v1164_v31  ;;  %1073 = vmatprep.subr.bf16.mxu0 %v1165_v40  ;;  %v931_v31 = vcombine.low %v64_v26, %v68_v28 }
  0x47   :  { %1101 = vmatprep.subr.bf16.mxu1 %v1166_v41 }
  0x48   :  { %694 = vmatmul.mubr.bf16.vlgmr.msra.gmra.mrb[0].mxu0 %v917_v35 }
  0x49   :  { %743 = vmatmul.mubr.bf16.vlgmr.msra.gmra.mrb[0].mxu1 %v919_v38  ;;  %1074 = vmatpush3.bf16.msra.mxu0 %v1167_v42 }
  0x4a   :  { %1102 = vmatpush3.bf16.msra.mxu1 %v1168_v43  ;;  %1075 = vmatprep.subr.bf16.mxu0 %v1169_v44 }
  0x4b   :  { %1103 = vmatprep.subr.bf16.mxu1 %v1170_v45  ;;  %701 = vmatprep.mubr.bf16.mxu0 %v926_v62 }
  0x4c   :  { %750 = vmatprep.mubr.bf16.mxu1 %v928_v2 }
  0x4d   :  { %1076 = vmatpush3.bf16.msra.mxu0 %v1171_v46 }
  0x4e   :  { %1104 = vmatpush3.bf16.msra.mxu1 %v1172_v47  ;;  %1077 = vmatprep.subr.bf16.mxu0 %v1173_v48 }
  0x4f   :  { %1105 = vmatprep.subr.bf16.mxu1 %v1174_v49 }
  0x50   :  { %702 = vmatmul.mubr.bf16.gmra.mrb[4].mxu0 %v925_v1 }
  0x51   :  { %1078 = vmatpush3.bf16.msra.mxu0 %v1175_v50  ;;  %751 = vmatmul.mubr.bf16.gmra.mrb[4].mxu1 %v927_v4 }
  0x52   :  { %1106 = vmatpush3.bf16.msra.mxu1 %v1176_v51  ;;  %1079 = vmatprep.subr.bf16.mxu0 %v1177_v52 }
  0x53   :  { %1107 = vmatprep.subr.bf16.mxu1 %v1178_v53  ;;  %791 = vmatprep.mubr.bf16.mxu0 %v922_v21 }
  0x54   :  { %840 = vmatprep.mubr.bf16.mxu1 %v924_v23 }
  0x55   :  { %1080 = vmatpush3.bf16.msra.mxu0 %v1179_v54 }
  0x56   :  { %1108 = vmatpush3.bf16.msra.mxu1 %v1180_v55  ;;  %1081 = vmatprep.subr.bf16.mxu0 %v1181_v56 }
  0x57   :  { %1109 = vmatprep.subr.bf16.mxu1 %v1182_v57 }
  0x59   :  { %1082 = vmatpush3.bf16.msra.mxu0 %v1183_v58 }
  0x5a   :  { %1110 = vmatpush3.bf16.msra.mxu1 %v1184_v59  ;;  %1083 = vmatprep.subr.bf16.mxu0 %v1185_v3 }
  0x5b   :  { %1111 = vmatprep.subr.bf16.mxu1 %v1186_v5 }
  0x5d   :  { %1084 = vmatpush3.bf16.msra.mxu0 %v1187_v6 }
  0x5e   :  { %1112 = vmatpush3.bf16.msra.mxu1 %v1188_v7  ;;  %1085 = vmatprep.subr.bf16.mxu0 %v1189_v8 }
  0x5f   :  { %1113 = vmatprep.subr.bf16.mxu1 %v1190_v9  ;;  %v997_v9 = vld [vmem:[#allocation5] ss:$0 sm:$0xff] }
  0x61   :  { %1086 = vmatpush3.bf16.msra.mxu0 %v1191_v10 }
  0x62   :  { %1114 = vmatpush3.bf16.msra.mxu1 %v1192_v11  ;;  %1087 = vmatprep.subr.bf16.mxu0 %v1193_v12 }
  0x63   :  { %1115 = vmatprep.subr.bf16.mxu1 %v1194_v13 }
  0x65   :  { %1088 = vmatpush3.bf16.msra.mxu0 %v1195_v14 }
  0x66   :  { %1116 = vmatpush3.bf16.msra.mxu1 %v1196_v15 }
  0x68   :  { %792 = vmatmul.mubr.bf16.vlgmr.msra.gmra.mrb[8].mxu0 %v921_v20 }
  0x69   :  { %841 = vmatmul.mubr.bf16.vlgmr.msra.gmra.mrb[8].mxu1 %v923_v22  ;;  %799 = vmatprep.mubr.bf16.mxu0 %v930_v27 }
  0x6a   :  { %848 = vmatprep.mubr.bf16.mxu1 %v932_v29 }
  0x70   :  { %800 = vmatmul.mubr.bf16.gmra.mrb[12].mxu0 %v929_v30 }
  0x71   :  { %849 = vmatmul.mubr.bf16.gmra.mrb[12].mxu1 %v931_v31 }
 0x11b   :  { %v1033_v32 = vpop.f32.mrb[0].mxu0 }
 0x11c   :  { %v1061_v33 = vpop.f32.mrb[0].mxu1  ;;  %v1034_v34 = vpop.f32.mrb[1].mxu0 }
 0x11d   :  { %v1035_v35 = vadd.f32 %v1034_v34, %v1033_v32  ;;  %v1062_v36 = vpop.f32.mrb[1].mxu1  ;;  %v1036_v37 = vpop.f32.mrb[2].mxu0 }
 0x11e   :  { %v1063_v38 = vadd.f32 %v1062_v36, %v1061_v33  ;;  %v1064_v39 = vpop.f32.mrb[2].mxu1  ;;  %v1037_v40 = vpop.f32.mrb[3].mxu0 }
 0x11f   :  { %v1038_v41 = vadd.f32 %v1037_v40, %v1036_v37  ;;  %v1065_v42 = vpop.f32.mrb[3].mxu1 }
 0x120   :  { %v745_v43 = vadd.f32 %v1063_v38, %v1035_v35  ;;  %v1066_v44 = vadd.f32 %v1065_v42, %v1064_v39 }
 0x122   :  { %v748_v45 = vadd.f32 %v1066_v44, %v1038_v41 }
 0x123   :  { %v1039_v46 = vpop.f32.mrb[4].mxu0 }
 0x124   :  { %v1067_v47 = vpop.f32.mrb[4].mxu1  ;;  %v1040_v48 = vpop.f32.mrb[5].mxu0 }
 0x125   :  { %v1041_v49 = vadd.f32 %v1040_v48, %v1039_v46  ;;  %v1068_v50 = vpop.f32.mrb[5].mxu1  ;;  %v1042_v51 = vpop.f32.mrb[6].mxu0 }
 0x126   :  { %v1069_v52 = vadd.f32 %v1068_v50, %v1067_v47  ;;  %v1070_v53 = vpop.f32.mrb[6].mxu1  ;;  %v1043_v54 = vpop.f32.mrb[7].mxu0 }
 0x127   :  { %v1044_v55 = vadd.f32 %v1043_v54, %v1042_v51  ;;  %v1071_v56 = vpop.f32.mrb[7].mxu1 }
 0x128   :  { %v753_v57 = vadd.f32 %v1069_v52, %v1041_v49  ;;  %v1072_v58 = vadd.f32 %v1071_v56, %v1070_v53 }
 0x12a   :  { %v756_v59 = vadd.f32 %v1072_v58, %v1044_v55 }
 0x13b   :  { %v1089_v60 = vpop.f32.mrb[8].mxu0 }
 0x13c   :  { %v1117_v61 = vpop.f32.mrb[8].mxu1  ;;  %v1090_v62 = vpop.f32.mrb[9].mxu0 }
 0x13d   :  { %v1118_v63 = vpop.f32.mrb[9].mxu1  ;;  %v1091_v0 = vadd.f32 %v1090_v62, %v1089_v60  ;;  %v1092_v2 = vpop.f32.mrb[10].mxu0 }
 0x13e   :  { %v1119_v1 = vadd.f32 %v1118_v63, %v1117_v61  ;;  %v1120_v3 = vpop.f32.mrb[10].mxu1  ;;  %v1093_v4 = vpop.f32.mrb[11].mxu0 }
 0x13f   :  { %v1121_v5 = vpop.f32.mrb[11].mxu1  ;;  %v794_v6 = vadd.f32 %v1091_v0, %v745_v43  ;;  %v1094_v7 = vadd.f32 %v1093_v4, %v1092_v2 }
 0x140   :  { %v1122_v8 = vadd.f32 %v1121_v5, %v1120_v3 }
 0x141   :  { %v843_v10 = vadd.f32 %v1119_v1, %v794_v6  ;;  %v797_v11 = vadd.f32 %v1094_v7, %v748_v45 }
 0x143   :  { %v879_v12 = vadd.f32 %v997_v9, %v843_v10  ;;  %v846_v13 = vadd.f32 %v1122_v8, %v797_v11  ;;  %v1095_v14 = vpop.f32.mrb[12].mxu0 }
 0x144   :  { %v1123_v15 = vpop.f32.mrb[12].mxu1  ;;  %v1096_v16 = vpop.f32.mrb[13].mxu0 }
 0x145   :  { %v1124_v17 = vpop.f32.mrb[13].mxu1  ;;  %v883_v18 = vmul.f32 0.2, %v879_v12  ;;  %v880_v19 = vadd.f32 %v997_v9, %v846_v13  ;;  %v1097_v20 = vadd.f32 %v1096_v16, %v1095_v14  ;;  %v1098_v22 = vpop.f32.mrb[14].mxu0 }
 0x146   :  { %v1125_v21 = vadd.f32 %v1124_v17, %v1123_v15  ;;  %v1126_v23 = vpop.f32.mrb[14].mxu1  ;;  %v1099_v24 = vpop.f32.mrb[15].mxu0 }
 0x147   :  { %v1127_v25 = vpop.f32.mrb[15].mxu1  ;;  %v884_v26 = vmul.f32 0.2, %v880_v19  ;;  %v802_v27 = vadd.f32 %v1097_v20, %v753_v57  ;;  %v1100_v28 = vadd.f32 %v1099_v24, %v1098_v22  ;;  %v887_v30 = vmax.f32 %v879_v12, %v883_v18 }
 0x148   :  { %v1128_v29 = vadd.f32 %v1127_v25, %v1126_v23 }
 0x149   :  { %v888_v31 = vmax.f32 %v880_v19, %v884_v26  ;;  %v851_v32 = vadd.f32 %v1125_v21, %v802_v27  ;;  %v805_v33 = vadd.f32 %v1100_v28, %v756_v59 }
 0x14b   :  { %v1009_v34 = vpack.c.bf16 %v888_v31, %v887_v30  ;;  %v881_v35 = vadd.f32 %v997_v9, %v851_v32  ;;  %v854_v36 = vadd.f32 %v1128_v29, %v805_v33 }
 0x14d   :  { %1010 = vst [vmem:[%s1350_s3] sm:$0xff] %v1009_v34   ;;  %v885_v37 = vmul.f32 0.2, %v881_v35  ;;  %v882_v38 = vadd.f32 %v997_v9, %v854_v36 }
 0x14f   :  { %v886_v39 = vmul.f32 0.2, %v882_v38  ;;  %v889_v40 = vmax.f32 %v881_v35, %v885_v37 }
 0x151   :  { %v890_v41 = vmax.f32 %v882_v38, %v886_v39 }
 0x153   :  { %v1014_v42 = vpack.c.bf16 %v890_v41, %v889_v40 }
 0x155   :  { %1016 = vst [vmem:[%s1350_s3 + $0x8] sm:$0xff] %v1014_v42  }
 0x156   :  { %915 = vsyncpa [#allocation4], 1 }
 0x157   :  { %916 = vsyncpa [#allocation6], 1 }

// kernel: cdiscriminator_forward.5
= control target key start
LH: loop header
LB: loop body
LE: loop exit
PB: predicated region body
PF: predicated region fallthrough
CT: control target
= control target key end

     0   :  { %8 = vsyncpa [#allocation4], 0  ;;  %s6689_s0 = inlined_call_operand.vmem [shape: bf16[8,2048], index: 0, kind: input, shape index: {}]   ;;  %s6690_s1 = inlined_call_operand.hbm [shape: bf16[2048,1024], index: 1, kind: input, shape index: {}]   ;;  %s6691_s2 = inlined_call_operand.hbm [shape: f32[1,1024], index: 2, kind: input, shape index: {}]   ;;  %s6692_s3 = inlined_call_operand.vmem [shape: f32[8,1024], index: 3, kind: output, shape index: {}]  }
   0x1   :  { %10 = vsyncpa [#allocation4 + $0x1], 0 }
   0x2   :  { %11 = vsyncpa [#allocation6], 0 }
   0x3   :  { %13 = vsyncpa [#allocation6 + $0x1], 0  ;;  %s5838_s12 = smov 0   ;;  %s5840_s13 = smov 0  }
   0x4   :  { %s5842_s14 = smov 0   ;;  %s5844_s15 = smov 0  }
   0x5   :  { %s5846_s16 = smov 0   ;;  %s5848_s17 = smov 0  }
   0x6 LB: > { %s4302_s18 = sadd.s32 4294967295, %s5811_s17   ;;  %s34_s19 = sadd.s32 1, %s5807_s16  ;;  %s5811_s17 = sphi %s5848_s17, %s19_s17   ;;  %s5807_s16 = sphi %s5846_s16, %s6706_s16   ;;  %s5803_s15 = sphi %s5844_s15, %s6705_s15   ;;  %s5799_s14 = sphi %s5842_s14, %s6704_s14   ;;  %s5795_s13 = sphi %s5840_s13, %s6703_s13   ;;  %s5791_s12 = sphi %s5838_s12, %s6702_s12  }
   0x7   : > { %p36_p0 = scmp.ge.s32.totalorder %s34_s19, 2  ;;  %s75_s20 = sadd.s32 1, %s5799_s14 }
   0x8   : > { %p82_p1 = scmp.ne.s32.totalorder %s5799_s14, %s5795_s13  ;;  %p83_p2 = scmp.eq.s32.totalorder %s5811_s17, 0 }
   0x9   : > { %s6708_s19 = smov (%p36_p0, %s34_s19), 0  ;;  %p88_p4 = scmp.ne.s32.totalorder %s5795_s13, %s5791_s12 }
   0xa   : > { %p5874_p3 = por %p83_p2, %p82_p1  ;;  %s71_s22 = ssub.s32 %s5807_s16, %s6708_s19 }
   0xb   : > { %p89_p5 = scmp.eq.s32.totalorder %s4302_s18, 0  ;;  %p73_p6 = scmp.eq.s32.totalorder %s71_s22, 0 }
   0xc   : > { %p4861_p8 = scmp.lt.s32.totalorder %s5811_s17, 2  ;;  %s5890_s25 = sand.u32 1, %s5799_s14  }
   0xd   : > { %p5881_p7 = por %p89_p5, %p88_p4  ;;  %s4848_s26 = sshll.u32 %s5807_s16, 8 }
   0xe   : > { %s5887_s24 = scalar_select %p73_p6, %s5799_s14, %s75_s20  }
   0xf   : > { %s6695_s23 = scalar_select %p5881_p7, 1, 0 }
  0x10   : > { %s4307_s27 = sshll.u32 %s5890_s25, 12  ;;  %s5897_s30 = scalar_lea.hbm %s6690_s1, %s4848_s26 }
  0x11   : > { %s183_s4 = scalar_lea.vmem [#allocation3], %s4307_s27  ;;  %p5901_p9 = pnand %p4861_p8, %p5874_p3 }
  0x12   : > { %s193_s5 = sshll.u32 %s183_s4, 4  ;;  %s180_s7 = scalar_lea.sflag [#allocation4], %s5890_s25  ;;  %s5905_s5 = int_to_ptr.vmem [resolvable:$true] %s193_s5 }
  0x13   : > { %s5697_s8 = scalar_lea.hbm %s5897_s30, 65536  ;;  %p5699_p12 = pneg %p5901_p9 }
  0x14   : > { %p5698_p11 = scmp.ne.s32.totalorder %s5897_s30, %s5697_s8  ;;  %s5702_s11 = scalar_lea.hbm %s6690_s1, 131072 }
  0x15   : > { %p5703_p1 = scmp.lt.u32.totalorder %s5897_s30, %s6690_s1  ;;  %p5704_p2 = scmp.lt.u32.totalorder %s5702_s11, %s5697_s8 }
  0x16   : > { %p5700_p13 = pnand %p5699_p12, %p5698_p11  ;;  %p5706_p4 = scmp.lt.u32.totalorder %s5697_s8, %s5897_s30 }
  0x17   : > { %p5705_p3 = por %p5704_p2, %p5703_p1 }
  0x18   : > { %p5701_p0 = pneg %p5700_p13 }
  0x19   : > { %p5707_p5 = por %p5706_p4, %p5705_p3 }
  0x1b   : > { %p5708_p6 = pnand %p5707_p5, %p5701_p0 }
  0x1d   : > { %5711 = shalt.err (!%p5708_p6)
}
  0x1e   : > { %s5712_s20 = scalar_lea.vmem %s5905_s5, 65536  ;;  %s5813_s21 = smov [#allocation3]  }
  0x1f   : > { %p5713_p8 = scmp.ne.s32.totalorder %s5905_s5, %s5712_s20  ;;  %s5717_s22 = sshll.u32 %s5813_s21, 4  ;;  %s5718_s22 = int_to_ptr.vmem [resolvable:$false] %s5717_s22 }
  0x20   : > { %s5719_s26 = scalar_lea.vmem %s5718_s22, 131072  ;;  %p5720_p10 = scmp.lt.s32.totalorder %s5905_s5, %s5718_s22 }
  0x21   : > { %p5715_p11 = pnand %p5713_p8, %p5699_p12  ;;  %p5721_p1 = scmp.lt.s32.totalorder %s5719_s26, %s5712_s20 }
  0x23   : > { %p5716_p13 = pneg %p5715_p11  ;;  %p5722_p2 = por %p5721_p1, %p5720_p10 }
  0x25   : > { %p5723_p3 = pnand %p5722_p2, %p5716_p13 }
  0x27   : > { %5726 = shalt.err (!%p5723_p3)
}
  0x28   : > { %s5814_s27 = smov 512   ;;  %s5815_s28 = smov 256  }
  0x29   : > { %s5816_s29 = smov 16   ;;  %p220_p0 = scmp.lt.s32.totalorder %s5811_s17, 3 }
  0x2a   : > { %4857 = dma.hbm_to_vmem [thread:$0]  (!%p5901_p9), %s5897_s30, 65536, %s5905_s5, %s180_s7, %s5814_s27, %s5815_s28, %s5816_s29  }
  0x2b   : > { %s4310_s4 = sshll.u32 %s5890_s25, 2  ;;  %s4849_s8 = sshll.u32 %s5807_s16, 6 }
  0x2c   : > { %p6697_p10 = scmp.ge.s32.totalorder %s5811_s17, 1  ;;  %s5948_s12 = scalar_lea.hbm %s6691_s2, %s4849_s8 }
  0x2d   : > { %s207_s18 = scalar_lea.vmem [#allocation5], %s4310_s4  ;;  %s204_s30 = scalar_lea.sflag [#allocation6], %s5890_s25 }
  0x2e   : > { %p5941_p4 = pnand %p6697_p10, %p220_p0  ;;  %s215_s20 = sshll.u32 %s207_s18, 4  ;;  %s216_s20 = int_to_ptr.vmem [resolvable:$true] %s215_s20 }
  0x2f   : > { %s5727_s5 = scalar_lea.hbm %s5948_s12, 64  ;;  %s5732_s22 = scalar_lea.hbm %s6691_s2, 128 }
  0x30   : > { %s6698_s9 = scalar_select %p5941_p4, 1, 0 }
  0x31   : > { %p5728_p5 = scmp.ne.s32.totalorder %s5948_s12, %s5727_s5  ;;  %p5733_p11 = scmp.lt.u32.totalorder %s5948_s12, %s6691_s2 }
  0x32   : > { %p5734_p13 = scmp.lt.u32.totalorder %s5732_s22, %s5727_s5  ;;  %p5736_p2 = scmp.lt.u32.totalorder %s5727_s5, %s5948_s12 }
  0x33   : > { %p5730_p6 = pnand %p5728_p5, %p5699_p12 }
  0x34   : > { %p5735_p1 = por %p5734_p13, %p5733_p11 }
  0x35   : > { %p5731_p8 = pneg %p5730_p6 }
  0x36   : > { %p5737_p3 = por %p5736_p2, %p5735_p1 }
  0x38   : > { %p5738_p0 = pnand %p5737_p3, %p5731_p8 }
  0x3a   : > { %5741 = shalt.err (!%p5738_p0)
}
  0x3b   : > { %s5742_s25 = scalar_lea.vmem %s216_s20, 64  ;;  %s5817_s28 = smov [#allocation5]  }
  0x3c   : > { %p5743_p10 = scmp.ne.s32.totalorder %s216_s20, %s5742_s25  ;;  %s5747_s29 = sshll.u32 %s5817_s28, 4  ;;  %s5748_s29 = int_to_ptr.vmem [resolvable:$false] %s5747_s29 }
  0x3d   : > { %s5749_s4 = scalar_lea.vmem %s5748_s29, 128  ;;  %p5750_p7 = scmp.lt.s32.totalorder %s216_s20, %s5748_s29 }
  0x3e   : > { %p5745_p5 = pnand %p5743_p10, %p5699_p12  ;;  %p5751_p4 = scmp.lt.s32.totalorder %s5749_s4, %s5742_s25 }
  0x40   : > { %p5746_p6 = pneg %p5745_p5  ;;  %p5752_p11 = por %p5751_p4, %p5750_p7 }
  0x42   : > { %p5753_p13 = pnand %p5752_p11, %p5746_p6 }
  0x44   : > { %5756 = shalt.err (!%p5753_p13)
}
  0x45   : > { %4860 = dma.hbm_to_vmem [thread:$0]  (!%p5901_p9), %s5948_s12, 64, %s216_s20, %s204_s30  }
  0x46   : > { %p6699_p8 = scmp.ne.s32.totalorder %s6698_s9, 0 }
  0x47   : > { %s226_s8 = sand.u32 (!%p6699_p8), 1, %s5795_s13   ;;  %p6700_p12 = scmp.ne.s32.totalorder (!%p6699_p8), %s6695_s23, 0 }
  0x48   : > { %224 = sbr.rel (%p6699_p8) target bundleno = 820 (0x334), region = 32  ;;  %s4314_s10 = sshll.u32 (!%p6699_p8), %s226_s8, 12 }
  0x49   : > { %s227_s11 = scalar_lea.sflag (!%p6699_p8), [#allocation4], %s226_s8  ;;  %s5973_s18 = scalar_lea.vmem (!%p6699_p8), [#allocation3], %s4314_s10 }
  0x4f   : > { %5782 = dma.done.wait (%p6700_p12), %s227_s11, 65536  }
  0x50   : > { %5784 = vsyncadd (%p6700_p12), %s227_s11, 4294901760  ;;  %s4315_s5 = sshll.u32 %s226_s8, 2  ;;  %s236_s6 = scalar_lea.sflag [#allocation6], %s226_s8 }
  0x51   : > { %s5979_s7 = scalar_lea.vmem [#allocation5], %s4315_s5 }
  0x52   : > { %5786 = dma.done.wait (%p6700_p12), %s236_s6, 64  }
  0x53   : > { %5788 = vsyncadd (%p6700_p12), %s236_s6, 4294967232  ;;  %v4913_v0 = vld [vmem:[%s5973_s18 + $0x4] ss:$16 sps:$4 sm:$0xff]   ;;  %v4917_v2 = vld [vmem:[%s5973_s18] ss:$16 sps:$4 sm:$0xff]   ;;  %s4316_s5 = sshll.u32 %s5803_s15, 2 }
  0x54   : > { %v4915_v1 = vld [vmem:[%s5973_s18 + $0x204] ss:$16 sps:$4 sm:$0xff]   ;;  %3451 = vmatprep.subr.bf16.mxu0 %v4913_v0  ;;  %v4918_v3 = vld [vmem:[%s5973_s18 + $0x200] ss:$16 sps:$4 sm:$0xff]   ;;  %v316_v48 = vld [vmem:[%s6689_s0 + $0x8] sm:$0xff]  ;;  %p6596_p7 = scmp.lt.s32.totalorder %s4316_s5, 7 }
  0x55   : > { %3492 = vmatprep.subr.bf16.mxu1 %v4915_v1  ;;  %v4919_v4 = vld [vmem:[%s5973_s18 + $0x24] ss:$16 sps:$4 sm:$0xff]   ;;  %3452 = vmatpush1.bf16.msra.mxu0 %v4917_v2  ;;  %v4923_v6 = vld [vmem:[%s5973_s18 + $0x20] ss:$16 sps:$4 sm:$0xff]   ;;  %v6041_v51 = vcombine.high %v316_v48, %v316_v48 }
  0x56   : > { %3493 = vmatpush1.bf16.msra.mxu1 %v4918_v3  ;;  %v4921_v5 = vld [vmem:[%s5973_s18 + $0x224] ss:$16 sps:$4 sm:$0xff]   ;;  %3453 = vmatprep.subr.bf16.mxu0 %v4919_v4  ;;  %v4924_v7 = vld [vmem:[%s5973_s18 + $0x220] ss:$16 sps:$4 sm:$0xff]   ;;  %s6710_s5 = smov (!%p6596_p7, %s4316_s5), 7 }
  0x57   : > { %3494 = vmatprep.subr.bf16.mxu1 %v4921_v5  ;;  %v4925_v8 = vld [vmem:[%s5973_s18 + $0x44] ss:$16 sps:$4 sm:$0xff]   ;;  %v4929_v10 = vld [vmem:[%s5973_s18 + $0x40] ss:$16 sps:$4 sm:$0xff]   ;;  %3524 = vmatprep.mubr.bf16.mxu1 %v6041_v51  ;;  %s4317_s15 = sshll.u32 %s6710_s5, 3 }
  0x58   : > { %v4927_v9 = vld [vmem:[%s5973_s18 + $0x244] ss:$16 sps:$4 sm:$0xff]   ;;  %v4930_v11 = vld [vmem:[%s5973_s18 + $0x240] ss:$16 sps:$4 sm:$0xff]   ;;  %s6629_s9 = scalar_lea.vmem %s6692_s3, %s4317_s15 }
  0x59   : > { %3454 = vmatpush1.bf16.msra.mxu0 %v4923_v6  ;;  %v4931_v12 = vld [vmem:[%s5973_s18 + $0x64] ss:$16 sps:$4 sm:$0xff]   ;;  %v4935_v14 = vld [vmem:[%s5973_s18 + $0x60] ss:$16 sps:$4 sm:$0xff]  }
  0x5a   : > { %3495 = vmatpush1.bf16.msra.mxu1 %v4924_v7  ;;  %3455 = vmatprep.subr.bf16.mxu0 %v4925_v8  ;;  %v4933_v13 = vld [vmem:[%s5973_s18 + $0x264] ss:$16 sps:$4 sm:$0xff]   ;;  %v4936_v15 = vld [vmem:[%s5973_s18 + $0x260] ss:$16 sps:$4 sm:$0xff]   ;;  %v6065_v7 = vcombine.low %v316_v48, %v316_v48 }
  0x5b   : > { %3496 = vmatprep.subr.bf16.mxu1 %v4927_v9  ;;  %v4937_v16 = vld [vmem:[%s5973_s18 + $0x84] ss:$16 sps:$4 sm:$0xff]   ;;  %v4941_v18 = vld [vmem:[%s5973_s18 + $0x80] ss:$16 sps:$4 sm:$0xff]  }
  0x5c   : > { %v4939_v17 = vld [vmem:[%s5973_s18 + $0x284] ss:$16 sps:$4 sm:$0xff]   ;;  %v4942_v19 = vld [vmem:[%s5973_s18 + $0x280] ss:$16 sps:$4 sm:$0xff]  }
  0x5d   : > { %3456 = vmatpush1.bf16.msra.mxu0 %v4929_v10  ;;  %v4943_v20 = vld [vmem:[%s5973_s18 + $0xa4] ss:$16 sps:$4 sm:$0xff]   ;;  %v4947_v22 = vld [vmem:[%s5973_s18 + $0xa0] ss:$16 sps:$4 sm:$0xff]  }
  0x5e   : > { %3497 = vmatpush1.bf16.msra.mxu1 %v4930_v11  ;;  %3457 = vmatprep.subr.bf16.mxu0 %v4931_v12  ;;  %v4945_v21 = vld [vmem:[%s5973_s18 + $0x2a4] ss:$16 sps:$4 sm:$0xff]   ;;  %v4948_v23 = vld [vmem:[%s5973_s18 + $0x2a0] ss:$16 sps:$4 sm:$0xff]  }
  0x5f   : > { %3498 = vmatprep.subr.bf16.mxu1 %v4933_v13  ;;  %v4949_v24 = vld [vmem:[%s5973_s18 + $0xc4] ss:$16 sps:$4 sm:$0xff]   ;;  %v4953_v26 = vld [vmem:[%s5973_s18 + $0xc0] ss:$16 sps:$4 sm:$0xff]  }
  0x60   : > { %v4951_v25 = vld [vmem:[%s5973_s18 + $0x2c4] ss:$16 sps:$4 sm:$0xff]   ;;  %v4954_v27 = vld [vmem:[%s5973_s18 + $0x2c0] ss:$16 sps:$4 sm:$0xff]  }
  0x61   : > { %3458 = vmatpush1.bf16.msra.mxu0 %v4935_v14  ;;  %v4955_v28 = vld [vmem:[%s5973_s18 + $0xe4] ss:$16 sps:$4 sm:$0xff]   ;;  %v4959_v30 = vld [vmem:[%s5973_s18 + $0xe0] ss:$16 sps:$4 sm:$0xff]  }
  0x62   : > { %3499 = vmatpush1.bf16.msra.mxu1 %v4936_v15  ;;  %3459 = vmatprep.subr.bf16.mxu0 %v4937_v16  ;;  %v4957_v29 = vld [vmem:[%s5973_s18 + $0x2e4] ss:$16 sps:$4 sm:$0xff]   ;;  %v4960_v31 = vld [vmem:[%s5973_s18 + $0x2e0] ss:$16 sps:$4 sm:$0xff]  }
  0x63   : > { %3500 = vmatprep.subr.bf16.mxu1 %v4939_v17  ;;  %v4961_v32 = vld [vmem:[%s5973_s18 + $0x104] ss:$16 sps:$4 sm:$0xff]   ;;  %v4965_v34 = vld [vmem:[%s5973_s18 + $0x100] ss:$16 sps:$4 sm:$0xff]  }
  0x64   : > { %v4963_v33 = vld [vmem:[%s5973_s18 + $0x304] ss:$16 sps:$4 sm:$0xff]   ;;  %v4966_v35 = vld [vmem:[%s5973_s18 + $0x300] ss:$16 sps:$4 sm:$0xff]  }
  0x65   : > { %3460 = vmatpush1.bf16.msra.mxu0 %v4941_v18  ;;  %v4967_v36 = vld [vmem:[%s5973_s18 + $0x124] ss:$16 sps:$4 sm:$0xff]   ;;  %v4971_v38 = vld [vmem:[%s5973_s18 + $0x120] ss:$16 sps:$4 sm:$0xff]  }
  0x66   : > { %3501 = vmatpush1.bf16.msra.mxu1 %v4942_v19  ;;  %3461 = vmatprep.subr.bf16.mxu0 %v4943_v20  ;;  %v4969_v37 = vld [vmem:[%s5973_s18 + $0x324] ss:$16 sps:$4 sm:$0xff]   ;;  %v4972_v39 = vld [vmem:[%s5973_s18 + $0x320] ss:$16 sps:$4 sm:$0xff]  }
  0x67   : > { %3502 = vmatprep.subr.bf16.mxu1 %v4945_v21  ;;  %v4973_v40 = vld [vmem:[%s5973_s18 + $0x144] ss:$16 sps:$4 sm:$0xff]   ;;  %v4977_v42 = vld [vmem:[%s5973_s18 + $0x140] ss:$16 sps:$4 sm:$0xff]  }
  0x68   : > { %v4975_v41 = vld [vmem:[%s5973_s18 + $0x344] ss:$16 sps:$4 sm:$0xff]   ;;  %v4978_v43 = vld [vmem:[%s5973_s18 + $0x340] ss:$16 sps:$4 sm:$0xff]  }
  0x69   : > { %3462 = vmatpush1.bf16.msra.mxu0 %v4947_v22  ;;  %v4979_v44 = vld [vmem:[%s5973_s18 + $0x164] ss:$16 sps:$4 sm:$0xff]   ;;  %v4983_v49 = vld [vmem:[%s5973_s18 + $0x160] ss:$16 sps:$4 sm:$0xff]  }
  0x6a   : > { %3503 = vmatpush1.bf16.msra.mxu1 %v4948_v23  ;;  %3463 = vmatprep.subr.bf16.mxu0 %v4949_v24  ;;  %v4981_v45 = vld [vmem:[%s5973_s18 + $0x364] ss:$16 sps:$4 sm:$0xff]   ;;  %v4984_v50 = vld [vmem:[%s5973_s18 + $0x360] ss:$16 sps:$4 sm:$0xff]  }
  0x6b   : > { %3504 = vmatprep.subr.bf16.mxu1 %v4951_v25  ;;  %v315_v46 = vld [vmem:[%s6689_s0] sm:$0xff] }
  0x6c   : > { %v6034_v47 = vcombine.high %v315_v46, %v315_v46  ;;  %v4985_v52 = vld [vmem:[%s5973_s18 + $0x184] ss:$16 sps:$4 sm:$0xff]   ;;  %v4989_v54 = vld [vmem:[%s5973_s18 + $0x180] ss:$16 sps:$4 sm:$0xff]   ;;  %v6063_v6 = vcombine.low %v315_v46, %v315_v46 }
  0x6d   : > { %3464 = vmatpush1.bf16.msra.mxu0 %v4953_v26  ;;  %v4987_v53 = vld [vmem:[%s5973_s18 + $0x384] ss:$16 sps:$4 sm:$0xff]   ;;  %v4990_v55 = vld [vmem:[%s5973_s18 + $0x380] ss:$16 sps:$4 sm:$0xff]  }
  0x6e   : > { %3505 = vmatpush1.bf16.msra.mxu1 %v4954_v27  ;;  %3465 = vmatprep.subr.bf16.mxu0 %v4955_v28  ;;  %v4991_v56 = vld [vmem:[%s5973_s18 + $0x1a4] ss:$16 sps:$4 sm:$0xff]   ;;  %v4995_v58 = vld [vmem:[%s5973_s18 + $0x1a0] ss:$16 sps:$4 sm:$0xff]  }
  0x6f   : > { %3506 = vmatprep.subr.bf16.mxu1 %v4957_v29  ;;  %3483 = vmatprep.mubr.bf16.mxu0 %v6034_v47  ;;  %v4993_v57 = vld [vmem:[%s5973_s18 + $0x3a4] ss:$16 sps:$4 sm:$0xff]   ;;  %v4996_v59 = vld [vmem:[%s5973_s18 + $0x3a0] ss:$16 sps:$4 sm:$0xff]  }
  0x70   : > { %v4997_v60 = vld [vmem:[%s5973_s18 + $0x1c4] ss:$16 sps:$4 sm:$0xff]   ;;  %v5001_v62 = vld [vmem:[%s5973_s18 + $0x1c0] ss:$16 sps:$4 sm:$0xff]  }
  0x71   : > { %3466 = vmatpush1.bf16.msra.mxu0 %v4959_v30  ;;  %v4999_v61 = vld [vmem:[%s5973_s18 + $0x3c4] ss:$16 sps:$4 sm:$0xff]   ;;  %v5002_v63 = vld [vmem:[%s5973_s18 + $0x3c0] ss:$16 sps:$4 sm:$0xff]  }
  0x72   : > { %3507 = vmatpush1.bf16.msra.mxu1 %v4960_v31  ;;  %3467 = vmatprep.subr.bf16.mxu0 %v4961_v32  ;;  %v5003_v0 = vld [vmem:[%s5973_s18 + $0x1e4] ss:$16 sps:$4 sm:$0xff]   ;;  %v5007_v2 = vld [vmem:[%s5973_s18 + $0x1e0] ss:$16 sps:$4 sm:$0xff]  }
  0x73   : > { %3508 = vmatprep.subr.bf16.mxu1 %v4963_v33  ;;  %v5005_v1 = vld [vmem:[%s5973_s18 + $0x3e4] ss:$16 sps:$4 sm:$0xff]   ;;  %v5008_v3 = vld [vmem:[%s5973_s18 + $0x3e0] ss:$16 sps:$4 sm:$0xff]   ;;  %v6101_v33 = vld [vmem:[%s6689_s0 + $0x18] sm:$0xff] }
  0x74   : > { %v5015_v4 = vld [vmem:[%s5973_s18 + $0x404] ss:$16 sps:$4 sm:$0xff]   ;;  %v5013_v8 = vld [vmem:[%s5973_s18 + $0x400] ss:$16 sps:$4 sm:$0xff]  }
  0x75   : > { %3468 = vmatpush1.bf16.msra.mxu0 %v4965_v34  ;;  %v5018_v5 = vld [vmem:[%s5973_s18 + $0x604] ss:$16 sps:$4 sm:$0xff]   ;;  %v5016_v9 = vld [vmem:[%s5973_s18 + $0x600] ss:$16 sps:$4 sm:$0xff]  }
  0x76   : > { %3509 = vmatpush1.bf16.msra.mxu1 %v4966_v35  ;;  %3469 = vmatprep.subr.bf16.mxu0 %v4967_v36  ;;  %v5021_v10 = vld [vmem:[%s5973_s18 + $0x424] ss:$16 sps:$4 sm:$0xff]   ;;  %v5019_v12 = vld [vmem:[%s5973_s18 + $0x420] ss:$16 sps:$4 sm:$0xff]  }
  0x77   : > { %3510 = vmatprep.subr.bf16.mxu1 %v4969_v37  ;;  %v5024_v11 = vld [vmem:[%s5973_s18 + $0x624] ss:$16 sps:$4 sm:$0xff]   ;;  %v5022_v13 = vld [vmem:[%s5973_s18 + $0x620] ss:$16 sps:$4 sm:$0xff]   ;;  %v6111_v37 = vcombine.high %v6101_v33, %v6101_v33 }
  0x78   : > { %v5027_v14 = vld [vmem:[%s5973_s18 + $0x444] ss:$16 sps:$4 sm:$0xff]   ;;  %v5025_v16 = vld [vmem:[%s5973_s18 + $0x440] ss:$16 sps:$4 sm:$0xff]  }
  0x79   : > { %3470 = vmatpush1.bf16.msra.mxu0 %v4971_v38  ;;  %v5030_v15 = vld [vmem:[%s5973_s18 + $0x644] ss:$16 sps:$4 sm:$0xff]   ;;  %v5028_v17 = vld [vmem:[%s5973_s18 + $0x640] ss:$16 sps:$4 sm:$0xff]  }
  0x7a   : > { %3511 = vmatpush1.bf16.msra.mxu1 %v4972_v39  ;;  %3471 = vmatprep.subr.bf16.mxu0 %v4973_v40  ;;  %v5033_v18 = vld [vmem:[%s5973_s18 + $0x464] ss:$16 sps:$4 sm:$0xff]   ;;  %v5031_v20 = vld [vmem:[%s5973_s18 + $0x460] ss:$16 sps:$4 sm:$0xff]  }
  0x7b   : > { %3512 = vmatprep.subr.bf16.mxu1 %v4975_v41  ;;  %v5036_v19 = vld [vmem:[%s5973_s18 + $0x664] ss:$16 sps:$4 sm:$0xff]   ;;  %v5034_v21 = vld [vmem:[%s5973_s18 + $0x660] ss:$16 sps:$4 sm:$0xff]  }
  0x7c   : > { %v5039_v22 = vld [vmem:[%s5973_s18 + $0x484] ss:$16 sps:$4 sm:$0xff]   ;;  %v5037_v24 = vld [vmem:[%s5973_s18 + $0x480] ss:$16 sps:$4 sm:$0xff]  }
  0x7d   : > { %3472 = vmatpush1.bf16.msra.mxu0 %v4977_v42  ;;  %v5042_v23 = vld [vmem:[%s5973_s18 + $0x684] ss:$16 sps:$4 sm:$0xff]   ;;  %v5040_v25 = vld [vmem:[%s5973_s18 + $0x680] ss:$16 sps:$4 sm:$0xff]  }
  0x7e   : > { %3513 = vmatpush1.bf16.msra.mxu1 %v4978_v43  ;;  %3473 = vmatprep.subr.bf16.mxu0 %v4979_v44  ;;  %v5045_v26 = vld [vmem:[%s5973_s18 + $0x4a4] ss:$16 sps:$4 sm:$0xff]   ;;  %v5043_v28 = vld [vmem:[%s5973_s18 + $0x4a0] ss:$16 sps:$4 sm:$0xff]  }
  0x7f   : > { %3514 = vmatprep.subr.bf16.mxu1 %v4981_v45  ;;  %v5048_v27 = vld [vmem:[%s5973_s18 + $0x6a4] ss:$16 sps:$4 sm:$0xff]   ;;  %v5046_v29 = vld [vmem:[%s5973_s18 + $0x6a0] ss:$16 sps:$4 sm:$0xff]  }
  0x80   : > { %v5051_v30 = vld [vmem:[%s5973_s18 + $0x4c4] ss:$16 sps:$4 sm:$0xff]   ;;  %v5049_v34 = vld [vmem:[%s5973_s18 + $0x4c0] ss:$16 sps:$4 sm:$0xff]  }
  0x81   : > { %3474 = vmatpush1.bf16.msra.mxu0 %v4983_v49  ;;  %v5054_v31 = vld [vmem:[%s5973_s18 + $0x6c4] ss:$16 sps:$4 sm:$0xff]   ;;  %v5052_v35 = vld [vmem:[%s5973_s18 + $0x6c0] ss:$16 sps:$4 sm:$0xff]  }
  0x82   : > { %3515 = vmatpush1.bf16.msra.mxu1 %v4984_v50  ;;  %3475 = vmatprep.subr.bf16.mxu0 %v4985_v52  ;;  %v6096_v32 = vld [vmem:[%s6689_s0 + $0x10] sm:$0xff] }
  0x83   : > { %3516 = vmatprep.subr.bf16.mxu1 %v4987_v53  ;;  %v6107_v36 = vcombine.high %v6096_v32, %v6096_v32  ;;  %v5057_v38 = vld [vmem:[%s5973_s18 + $0x4e4] ss:$16 sps:$4 sm:$0xff]   ;;  %v5055_v40 = vld [vmem:[%s5973_s18 + $0x4e0] ss:$16 sps:$4 sm:$0xff]  }
  0x84   : > { %v5060_v39 = vld [vmem:[%s5973_s18 + $0x6e4] ss:$16 sps:$4 sm:$0xff]   ;;  %v5058_v41 = vld [vmem:[%s5973_s18 + $0x6e0] ss:$16 sps:$4 sm:$0xff]  }
  0x85   : > { %3476 = vmatpush1.bf16.msra.mxu0 %v4989_v54  ;;  %v5063_v42 = vld [vmem:[%s5973_s18 + $0x504] ss:$16 sps:$4 sm:$0xff]   ;;  %v5061_v44 = vld [vmem:[%s5973_s18 + $0x500] ss:$16 sps:$4 sm:$0xff]  }
  0x86   : > { %3517 = vmatpush1.bf16.msra.mxu1 %v4990_v55  ;;  %3477 = vmatprep.subr.bf16.mxu0 %v4991_v56  ;;  %v5066_v43 = vld [vmem:[%s5973_s18 + $0x704] ss:$16 sps:$4 sm:$0xff]   ;;  %v5064_v45 = vld [vmem:[%s5973_s18 + $0x700] ss:$16 sps:$4 sm:$0xff]  }
  0x87   : > { %3518 = vmatprep.subr.bf16.mxu1 %v4993_v57  ;;  %v5069_v46 = vld [vmem:[%s5973_s18 + $0x524] ss:$16 sps:$4 sm:$0xff]   ;;  %v5067_v49 = vld [vmem:[%s5973_s18 + $0x520] ss:$16 sps:$4 sm:$0xff]  }
  0x88   : > { %v5072_v48 = vld [vmem:[%s5973_s18 + $0x724] ss:$16 sps:$4 sm:$0xff]   ;;  %v5070_v50 = vld [vmem:[%s5973_s18 + $0x720] ss:$16 sps:$4 sm:$0xff]  }
  0x89   : > { %3478 = vmatpush1.bf16.msra.mxu0 %v4995_v58  ;;  %v5075_v52 = vld [vmem:[%s5973_s18 + $0x544] ss:$16 sps:$4 sm:$0xff]   ;;  %v5073_v54 = vld [vmem:[%s5973_s18 + $0x540] ss:$16 sps:$4 sm:$0xff]  }
  0x8a   : > { %3519 = vmatpush1.bf16.msra.mxu1 %v4996_v59  ;;  %3479 = vmatprep.subr.bf16.mxu0 %v4997_v60  ;;  %v5078_v53 = vld [vmem:[%s5973_s18 + $0x744] ss:$16 sps:$4 sm:$0xff]   ;;  %v5076_v55 = vld [vmem:[%s5973_s18 + $0x740] ss:$16 sps:$4 sm:$0xff]  }
  0x8b   : > { %3520 = vmatprep.subr.bf16.mxu1 %v4999_v61  ;;  %v5081_v56 = vld [vmem:[%s5973_s18 + $0x564] ss:$16 sps:$4 sm:$0xff]   ;;  %v5079_v58 = vld [vmem:[%s5973_s18 + $0x560] ss:$16 sps:$4 sm:$0xff]  }
  0x8c   : > { %v5084_v57 = vld [vmem:[%s5973_s18 + $0x764] ss:$16 sps:$4 sm:$0xff]   ;;  %v5082_v59 = vld [vmem:[%s5973_s18 + $0x760] ss:$16 sps:$4 sm:$0xff]  }
  0x8d   : > { %3480 = vmatpush1.bf16.msra.mxu0 %v5001_v62  ;;  %v5087_v60 = vld [vmem:[%s5973_s18 + $0x584] ss:$16 sps:$4 sm:$0xff]   ;;  %v5085_v62 = vld [vmem:[%s5973_s18 + $0x580] ss:$16 sps:$4 sm:$0xff]  }
  0x8e   : > { %3521 = vmatpush1.bf16.msra.mxu1 %v5002_v63  ;;  %3481 = vmatprep.subr.bf16.mxu0 %v5003_v0  ;;  %v5090_v61 = vld [vmem:[%s5973_s18 + $0x784] ss:$16 sps:$4 sm:$0xff]   ;;  %v5088_v63 = vld [vmem:[%s5973_s18 + $0x780] ss:$16 sps:$4 sm:$0xff]  }
  0x8f   : > { %3522 = vmatprep.subr.bf16.mxu1 %v5005_v1  ;;  %v5093_v0 = vld [vmem:[%s5973_s18 + $0x5a4] ss:$16 sps:$4 sm:$0xff]  }
  0x90   : > { %v5096_v1 = vld [vmem:[%s5973_s18 + $0x7a4] ss:$16 sps:$4 sm:$0xff]  }
  0x91   : > { %3482 = vmatpush1.bf16.msra.mxu0 %v5007_v2  ;;  %v5091_v2 = vld [vmem:[%s5973_s18 + $0x5a0] ss:$16 sps:$4 sm:$0xff]  }
  0x92   : > { %3523 = vmatpush1.bf16.msra.mxu1 %v5008_v3  ;;  %3533 = vmatprep.subr.bf16.mxu0 %v5015_v4  ;;  %v5094_v3 = vld [vmem:[%s5973_s18 + $0x7a0] ss:$16 sps:$4 sm:$0xff]   ;;  %v5099_v4 = vld [vmem:[%s5973_s18 + $0x5c4] ss:$16 sps:$4 sm:$0xff]  }
  0x93   : > { %3574 = vmatprep.subr.bf16.mxu1 %v5018_v5  ;;  %v5102_v5 = vld [vmem:[%s5973_s18 + $0x7c4] ss:$16 sps:$4 sm:$0xff]  }
  0x94   : > { %3484 = vmatmul.mubr.bf16.vlgmr.msra.gmra.mrb[0].mxu0 %v6063_v6 }
  0x95   : > { %3525 = vmatmul.mubr.bf16.vlgmr.msra.gmra.mrb[0].mxu1 %v6065_v7  ;;  %3534 = vmatpush1.bf16.msra.mxu0 %v5013_v8  ;;  %v5097_v8 = vld [vmem:[%s5973_s18 + $0x5c0] ss:$16 sps:$4 sm:$0xff]  }
  0x96   : > { %3575 = vmatpush1.bf16.msra.mxu1 %v5016_v9  ;;  %3535 = vmatprep.subr.bf16.mxu0 %v5021_v10  ;;  %v5100_v9 = vld [vmem:[%s5973_s18 + $0x7c0] ss:$16 sps:$4 sm:$0xff]   ;;  %v5105_v10 = vld [vmem:[%s5973_s18 + $0x5e4] ss:$16 sps:$4 sm:$0xff]  }
  0x97   : > { %3576 = vmatprep.subr.bf16.mxu1 %v5024_v11  ;;  %3565 = vmatprep.mubr.bf16.mxu0 %v6107_v36  ;;  %v5108_v11 = vld [vmem:[%s5973_s18 + $0x7e4] ss:$16 sps:$4 sm:$0xff]  }
  0x98   : > { %3606 = vmatprep.mubr.bf16.mxu1 %v6111_v37 }
  0x99   : > { %3536 = vmatpush1.bf16.msra.mxu0 %v5019_v12  ;;  %v5103_v12 = vld [vmem:[%s5973_s18 + $0x5e0] ss:$16 sps:$4 sm:$0xff]  }
  0x9a   : > { %3577 = vmatpush1.bf16.msra.mxu1 %v5022_v13  ;;  %3537 = vmatprep.subr.bf16.mxu0 %v5027_v14  ;;  %v5106_v13 = vld [vmem:[%s5973_s18 + $0x7e0] ss:$16 sps:$4 sm:$0xff]   ;;  %v5115_v14 = vld [vmem:[%s5973_s18 + $0x804] ss:$16 sps:$4 sm:$0xff]  }
  0x9b   : > { %3578 = vmatprep.subr.bf16.mxu1 %v5030_v15  ;;  %v5118_v15 = vld [vmem:[%s5973_s18 + $0xa04] ss:$16 sps:$4 sm:$0xff]  }
  0x9d   : > { %3538 = vmatpush1.bf16.msra.mxu0 %v5025_v16  ;;  %v6155_v16 = vcombine.low %v6096_v32, %v6096_v32  ;;  %v5133_v32 = vld [vmem:[%s5973_s18 + $0x864] ss:$16 sps:$4 sm:$0xff]  }
  0x9e   : > { %3579 = vmatpush1.bf16.msra.mxu1 %v5028_v17  ;;  %3539 = vmatprep.subr.bf16.mxu0 %v5033_v18  ;;  %v6159_v17 = vcombine.low %v6101_v33, %v6101_v33  ;;  %v5113_v18 = vld [vmem:[%s5973_s18 + $0x800] ss:$16 sps:$4 sm:$0xff]   ;;  %v5136_v33 = vld [vmem:[%s5973_s18 + $0xa64] ss:$16 sps:$4 sm:$0xff]  }
  0x9f   : > { %3580 = vmatprep.subr.bf16.mxu1 %v5036_v19  ;;  %v5116_v19 = vld [vmem:[%s5973_s18 + $0xa00] ss:$16 sps:$4 sm:$0xff]  }
  0xa1   : > { %3540 = vmatpush1.bf16.msra.mxu0 %v5031_v20  ;;  %v5121_v20 = vld [vmem:[%s5973_s18 + $0x824] ss:$16 sps:$4 sm:$0xff]  }
  0xa2   : > { %3581 = vmatpush1.bf16.msra.mxu1 %v5034_v21  ;;  %3541 = vmatprep.subr.bf16.mxu0 %v5039_v22  ;;  %v5124_v21 = vld [vmem:[%s5973_s18 + $0xa24] ss:$16 sps:$4 sm:$0xff]  }
  0xa3   : > { %3582 = vmatprep.subr.bf16.mxu1 %v5042_v23  ;;  %v6168_v22 = vld [vmem:[%s6689_s0 + $0x20] sm:$0xff]  ;;  %v6173_v23 = vld [vmem:[%s6689_s0 + $0x28] sm:$0xff] }
  0xa5   : > { %3542 = vmatpush1.bf16.msra.mxu0 %v5037_v24  ;;  %v6177_v24 = vcombine.high %v6168_v22, %v6168_v22 }
  0xa6   : > { %3583 = vmatpush1.bf16.msra.mxu1 %v5040_v25  ;;  %3543 = vmatprep.subr.bf16.mxu0 %v5045_v26  ;;  %v6181_v25 = vcombine.high %v6173_v23, %v6173_v23  ;;  %v5119_v26 = vld [vmem:[%s5973_s18 + $0x820] ss:$16 sps:$4 sm:$0xff]  }
  0xa7   : > { %3584 = vmatprep.subr.bf16.mxu1 %v5048_v27  ;;  %v5122_v27 = vld [vmem:[%s5973_s18 + $0xa20] ss:$16 sps:$4 sm:$0xff]  }
  0xa9   : > { %3544 = vmatpush1.bf16.msra.mxu0 %v5043_v28  ;;  %v5127_v28 = vld [vmem:[%s5973_s18 + $0x844] ss:$16 sps:$4 sm:$0xff]  }
  0xaa   : > { %3585 = vmatpush1.bf16.msra.mxu1 %v5046_v29  ;;  %3545 = vmatprep.subr.bf16.mxu0 %v5051_v30  ;;  %v5130_v29 = vld [vmem:[%s5973_s18 + $0xa44] ss:$16 sps:$4 sm:$0xff]   ;;  %v5125_v30 = vld [vmem:[%s5973_s18 + $0x840] ss:$16 sps:$4 sm:$0xff]  }
  0xab   : > { %3586 = vmatprep.subr.bf16.mxu1 %v5054_v31  ;;  %v5128_v31 = vld [vmem:[%s5973_s18 + $0xa40] ss:$16 sps:$4 sm:$0xff]  }
  0xad   : > { %3546 = vmatpush1.bf16.msra.mxu0 %v5049_v34  ;;  %v5131_v34 = vld [vmem:[%s5973_s18 + $0x860] ss:$16 sps:$4 sm:$0xff]  }
  0xae   : > { %3587 = vmatpush1.bf16.msra.mxu1 %v5052_v35  ;;  %3547 = vmatprep.subr.bf16.mxu0 %v5057_v38  ;;  %v5134_v35 = vld [vmem:[%s5973_s18 + $0xa60] ss:$16 sps:$4 sm:$0xff]   ;;  %v5139_v38 = vld [vmem:[%s5973_s18 + $0x884] ss:$16 sps:$4 sm:$0xff]  }
  0xaf   : > { %3588 = vmatprep.subr.bf16.mxu1 %v5060_v39  ;;  %v5142_v39 = vld [vmem:[%s5973_s18 + $0xa84] ss:$16 sps:$4 sm:$0xff]  }
  0xb1   : > { %3548 = vmatpush1.bf16.msra.mxu0 %v5055_v40  ;;  %v5137_v40 = vld [vmem:[%s5973_s18 + $0x880] ss:$16 sps:$4 sm:$0xff]  }
  0xb2   : > { %3589 = vmatpush1.bf16.msra.mxu1 %v5058_v41  ;;  %3549 = vmatprep.subr.bf16.mxu0 %v5063_v42  ;;  %v5140_v41 = vld [vmem:[%s5973_s18 + $0xa80] ss:$16 sps:$4 sm:$0xff]   ;;  %v5145_v42 = vld [vmem:[%s5973_s18 + $0x8a4] ss:$16 sps:$4 sm:$0xff]  }
  0xb3   : > { %3590 = vmatprep.subr.bf16.mxu1 %v5066_v43  ;;  %v5148_v43 = vld [vmem:[%s5973_s18 + $0xaa4] ss:$16 sps:$4 sm:$0xff]  }
  0xb5   : > { %3550 = vmatpush1.bf16.msra.mxu0 %v5061_v44  ;;  %v5143_v44 = vld [vmem:[%s5973_s18 + $0x8a0] ss:$16 sps:$4 sm:$0xff]  }
  0xb6   : > { %3591 = vmatpush1.bf16.msra.mxu1 %v5064_v45  ;;  %3551 = vmatprep.subr.bf16.mxu0 %v5069_v46  ;;  %v5146_v45 = vld [vmem:[%s5973_s18 + $0xaa0] ss:$16 sps:$4 sm:$0xff]   ;;  %v5151_v46 = vld [vmem:[%s5973_s18 + $0x8c4] ss:$16 sps:$4 sm:$0xff]  }
  0xb7   : > { %3592 = vmatprep.subr.bf16.mxu1 %v5072_v48  ;;  %v5154_v48 = vld [vmem:[%s5973_s18 + $0xac4] ss:$16 sps:$4 sm:$0xff]  }
  0xb9   : > { %3552 = vmatpush1.bf16.msra.mxu0 %v5067_v49  ;;  %v5149_v49 = vld [vmem:[%s5973_s18 + $0x8c0] ss:$16 sps:$4 sm:$0xff]  }
  0xba   : > { %3593 = vmatpush1.bf16.msra.mxu1 %v5070_v50  ;;  %3553 = vmatprep.subr.bf16.mxu0 %v5075_v52  ;;  %v5152_v50 = vld [vmem:[%s5973_s18 + $0xac0] ss:$16 sps:$4 sm:$0xff]   ;;  %v5157_v52 = vld [vmem:[%s5973_s18 + $0x8e4] ss:$16 sps:$4 sm:$0xff]  }
  0xbb   : > { %3594 = vmatprep.subr.bf16.mxu1 %v5078_v53  ;;  %v5160_v53 = vld [vmem:[%s5973_s18 + $0xae4] ss:$16 sps:$4 sm:$0xff]  }
  0xbd   : > { %3554 = vmatpush1.bf16.msra.mxu0 %v5073_v54  ;;  %v5155_v54 = vld [vmem:[%s5973_s18 + $0x8e0] ss:$16 sps:$4 sm:$0xff]  }
  0xbe   : > { %3595 = vmatpush1.bf16.msra.mxu1 %v5076_v55  ;;  %3555 = vmatprep.subr.bf16.mxu0 %v5081_v56  ;;  %v5158_v55 = vld [vmem:[%s5973_s18 + $0xae0] ss:$16 sps:$4 sm:$0xff]   ;;  %v5163_v56 = vld [vmem:[%s5973_s18 + $0x904] ss:$16 sps:$4 sm:$0xff]  }
  0xbf   : > { %3596 = vmatprep.subr.bf16.mxu1 %v5084_v57  ;;  %v5166_v57 = vld [vmem:[%s5973_s18 + $0xb04] ss:$16 sps:$4 sm:$0xff]  }
  0xc1   : > { %3556 = vmatpush1.bf16.msra.mxu0 %v5079_v58  ;;  %v5161_v58 = vld [vmem:[%s5973_s18 + $0x900] ss:$16 sps:$4 sm:$0xff]  }
  0xc2   : > { %3597 = vmatpush1.bf16.msra.mxu1 %v5082_v59  ;;  %3557 = vmatprep.subr.bf16.mxu0 %v5087_v60  ;;  %v5164_v59 = vld [vmem:[%s5973_s18 + $0xb00] ss:$16 sps:$4 sm:$0xff]   ;;  %v5169_v60 = vld [vmem:[%s5973_s18 + $0x924] ss:$16 sps:$4 sm:$0xff]  }
  0xc3   : > { %3598 = vmatprep.subr.bf16.mxu1 %v5090_v61  ;;  %v5172_v61 = vld [vmem:[%s5973_s18 + $0xb24] ss:$16 sps:$4 sm:$0xff]  }
  0xc5   : > { %3558 = vmatpush1.bf16.msra.mxu0 %v5085_v62  ;;  %v5167_v62 = vld [vmem:[%s5973_s18 + $0x920] ss:$16 sps:$4 sm:$0xff]  }
  0xc6   : > { %3599 = vmatpush1.bf16.msra.mxu1 %v5088_v63  ;;  %3559 = vmatprep.subr.bf16.mxu0 %v5093_v0  ;;  %v5170_v63 = vld [vmem:[%s5973_s18 + $0xb20] ss:$16 sps:$4 sm:$0xff]   ;;  %v5175_v0 = vld [vmem:[%s5973_s18 + $0x944] ss:$16 sps:$4 sm:$0xff]  }
  0xc7   : > { %3600 = vmatprep.subr.bf16.mxu1 %v5096_v1  ;;  %v5178_v1 = vld [vmem:[%s5973_s18 + $0xb44] ss:$16 sps:$4 sm:$0xff]  }
  0xc9   : > { %3560 = vmatpush1.bf16.msra.mxu0 %v5091_v2  ;;  %v5173_v2 = vld [vmem:[%s5973_s18 + $0x940] ss:$16 sps:$4 sm:$0xff]  }
  0xca   : > { %3601 = vmatpush1.bf16.msra.mxu1 %v5094_v3  ;;  %3561 = vmatprep.subr.bf16.mxu0 %v5099_v4  ;;  %v5176_v3 = vld [vmem:[%s5973_s18 + $0xb40] ss:$16 sps:$4 sm:$0xff]   ;;  %v5181_v4 = vld [vmem:[%s5973_s18 + $0x964] ss:$16 sps:$4 sm:$0xff]  }
  0xcb   : > { %3602 = vmatprep.subr.bf16.mxu1 %v5102_v5  ;;  %v5184_v5 = vld [vmem:[%s5973_s18 + $0xb64] ss:$16 sps:$4 sm:$0xff]  }
  0xcd   : > { %3562 = vmatpush1.bf16.msra.mxu0 %v5097_v8  ;;  %v5179_v8 = vld [vmem:[%s5973_s18 + $0x960] ss:$16 sps:$4 sm:$0xff]  }
  0xce   : > { %3603 = vmatpush1.bf16.msra.mxu1 %v5100_v9  ;;  %3563 = vmatprep.subr.bf16.mxu0 %v5105_v10  ;;  %v5182_v9 = vld [vmem:[%s5973_s18 + $0xb60] ss:$16 sps:$4 sm:$0xff]   ;;  %v5187_v10 = vld [vmem:[%s5973_s18 + $0x984] ss:$16 sps:$4 sm:$0xff]  }
  0xcf   : > { %3604 = vmatprep.subr.bf16.mxu1 %v5108_v11  ;;  %v5190_v11 = vld [vmem:[%s5973_s18 + $0xb84] ss:$16 sps:$4 sm:$0xff]  }
  0xd1   : > { %3564 = vmatpush1.bf16.msra.mxu0 %v5103_v12  ;;  %v5185_v12 = vld [vmem:[%s5973_s18 + $0x980] ss:$16 sps:$4 sm:$0xff]  }
  0xd2   : > { %3605 = vmatpush1.bf16.msra.mxu1 %v5106_v13  ;;  %3615 = vmatprep.subr.bf16.mxu0 %v5115_v14  ;;  %v5188_v13 = vld [vmem:[%s5973_s18 + $0xb80] ss:$16 sps:$4 sm:$0xff]   ;;  %v5193_v14 = vld [vmem:[%s5973_s18 + $0x9a4] ss:$16 sps:$4 sm:$0xff]  }
  0xd3   : > { %3656 = vmatprep.subr.bf16.mxu1 %v5118_v15  ;;  %v5196_v15 = vld [vmem:[%s5973_s18 + $0xba4] ss:$16 sps:$4 sm:$0xff]  }
  0xd4   : > { %3566 = vmatmul.mubr.bf16.vlgmr.msra.gmra.mrb[4].mxu0 %v6155_v16 }
  0xd5   : > { %3607 = vmatmul.mubr.bf16.vlgmr.msra.gmra.mrb[4].mxu1 %v6159_v17  ;;  %3616 = vmatpush1.bf16.msra.mxu0 %v5113_v18  ;;  %v5191_v18 = vld [vmem:[%s5973_s18 + $0x9a0] ss:$16 sps:$4 sm:$0xff]  }
  0xd6   : > { %3657 = vmatpush1.bf16.msra.mxu1 %v5116_v19  ;;  %3617 = vmatprep.subr.bf16.mxu0 %v5121_v20  ;;  %v5194_v19 = vld [vmem:[%s5973_s18 + $0xba0] ss:$16 sps:$4 sm:$0xff]   ;;  %v5199_v20 = vld [vmem:[%s5973_s18 + $0x9c4] ss:$16 sps:$4 sm:$0xff]  }
  0xd7   : > { %3658 = vmatprep.subr.bf16.mxu1 %v5124_v21  ;;  %3647 = vmatprep.mubr.bf16.mxu0 %v6177_v24  ;;  %v5202_v21 = vld [vmem:[%s5973_s18 + $0xbc4] ss:$16 sps:$4 sm:$0xff]  }
  0xd8   : > { %3688 = vmatprep.mubr.bf16.mxu1 %v6181_v25 }
  0xd9   : > { %3618 = vmatpush1.bf16.msra.mxu0 %v5119_v26  ;;  %v5197_v26 = vld [vmem:[%s5973_s18 + $0x9c0] ss:$16 sps:$4 sm:$0xff]  }
  0xda   : > { %3659 = vmatpush1.bf16.msra.mxu1 %v5122_v27  ;;  %3619 = vmatprep.subr.bf16.mxu0 %v5127_v28  ;;  %v5200_v27 = vld [vmem:[%s5973_s18 + $0xbc0] ss:$16 sps:$4 sm:$0xff]   ;;  %v5205_v28 = vld [vmem:[%s5973_s18 + $0x9e4] ss:$16 sps:$4 sm:$0xff]  }
  0xdb   : > { %3660 = vmatprep.subr.bf16.mxu1 %v5130_v29  ;;  %v5208_v29 = vld [vmem:[%s5973_s18 + $0xbe4] ss:$16 sps:$4 sm:$0xff]  }
  0xdd   : > { %3620 = vmatpush1.bf16.msra.mxu0 %v5125_v30  ;;  %v5203_v30 = vld [vmem:[%s5973_s18 + $0x9e0] ss:$16 sps:$4 sm:$0xff]  }
  0xde   : > { %3661 = vmatpush1.bf16.msra.mxu1 %v5128_v31  ;;  %3621 = vmatprep.subr.bf16.mxu0 %v5133_v32  ;;  %v5206_v31 = vld [vmem:[%s5973_s18 + $0xbe0] ss:$16 sps:$4 sm:$0xff]   ;;  %v5215_v32 = vld [vmem:[%s5973_s18 + $0xc04] ss:$16 sps:$4 sm:$0xff]  }
  0xdf   : > { %3662 = vmatprep.subr.bf16.mxu1 %v5136_v33  ;;  %v5218_v33 = vld [vmem:[%s5973_s18 + $0xe04] ss:$16 sps:$4 sm:$0xff]  }
  0xe1   : > { %3622 = vmatpush1.bf16.msra.mxu0 %v5131_v34  ;;  %v5213_v34 = vld [vmem:[%s5973_s18 + $0xc00] ss:$16 sps:$4 sm:$0xff]  }
  0xe2   : > { %3663 = vmatpush1.bf16.msra.mxu1 %v5134_v35  ;;  %3623 = vmatprep.subr.bf16.mxu0 %v5139_v38  ;;  %v5216_v35 = vld [vmem:[%s5973_s18 + $0xe00] ss:$16 sps:$4 sm:$0xff]   ;;  %v6251_v38 = vcombine.low %v6168_v22, %v6168_v22  ;;  %v5221_v22 = vld [vmem:[%s5973_s18 + $0xc24] ss:$16 sps:$4 sm:$0xff]  }
  0xe3   : > { %3664 = vmatprep.subr.bf16.mxu1 %v5142_v39  ;;  %v6255_v39 = vcombine.low %v6173_v23, %v6173_v23  ;;  %v5224_v23 = vld [vmem:[%s5973_s18 + $0xe24] ss:$16 sps:$4 sm:$0xff]  }
  0xe5   : > { %3624 = vmatpush1.bf16.msra.mxu0 %v5137_v40  ;;  %v6260_v40 = vld [vmem:[%s6689_s0 + $0x30] sm:$0xff] }
  0xe6   : > { %3665 = vmatpush1.bf16.msra.mxu1 %v5140_v41  ;;  %3625 = vmatprep.subr.bf16.mxu0 %v5145_v42  ;;  %v6265_v41 = vld [vmem:[%s6689_s0 + $0x38] sm:$0xff]  ;;  %v6271_v42 = vcombine.high %v6260_v40, %v6260_v40 }
  0xe7   : > { %3666 = vmatprep.subr.bf16.mxu1 %v5148_v43  ;;  %v6275_v43 = vcombine.high %v6265_v41, %v6265_v41 }
  0xe9   : > { %3626 = vmatpush1.bf16.msra.mxu0 %v5143_v44  ;;  %v5219_v44 = vld [vmem:[%s5973_s18 + $0xc20] ss:$16 sps:$4 sm:$0xff]  }
  0xea   : > { %3667 = vmatpush1.bf16.msra.mxu1 %v5146_v45  ;;  %3627 = vmatprep.subr.bf16.mxu0 %v5151_v46  ;;  %v5222_v45 = vld [vmem:[%s5973_s18 + $0xe20] ss:$16 sps:$4 sm:$0xff]   ;;  %v5227_v46 = vld [vmem:[%s5973_s18 + $0xc44] ss:$16 sps:$4 sm:$0xff]  }
  0xeb   : > { %3668 = vmatprep.subr.bf16.mxu1 %v5154_v48  ;;  %v5230_v48 = vld [vmem:[%s5973_s18 + $0xe44] ss:$16 sps:$4 sm:$0xff]  }
  0xed   : > { %3628 = vmatpush1.bf16.msra.mxu0 %v5149_v49  ;;  %v5225_v49 = vld [vmem:[%s5973_s18 + $0xc40] ss:$16 sps:$4 sm:$0xff]  }
  0xee   : > { %3669 = vmatpush1.bf16.msra.mxu1 %v5152_v50  ;;  %3629 = vmatprep.subr.bf16.mxu0 %v5157_v52  ;;  %v5228_v50 = vld [vmem:[%s5973_s18 + $0xe40] ss:$16 sps:$4 sm:$0xff]   ;;  %v5233_v52 = vld [vmem:[%s5973_s18 + $0xc64] ss:$16 sps:$4 sm:$0xff]  }
  0xef   : > { %3670 = vmatprep.subr.bf16.mxu1 %v5160_v53  ;;  %v5236_v53 = vld [vmem:[%s5973_s18 + $0xe64] ss:$16 sps:$4 sm:$0xff]  }
  0xf1   : > { %3630 = vmatpush1.bf16.msra.mxu0 %v5155_v54  ;;  %v5231_v54 = vld [vmem:[%s5973_s18 + $0xc60] ss:$16 sps:$4 sm:$0xff]  }
  0xf2   : > { %3671 = vmatpush1.bf16.msra.mxu1 %v5158_v55  ;;  %3631 = vmatprep.subr.bf16.mxu0 %v5163_v56  ;;  %v5234_v55 = vld [vmem:[%s5973_s18 + $0xe60] ss:$16 sps:$4 sm:$0xff]   ;;  %v5239_v56 = vld [vmem:[%s5973_s18 + $0xc84] ss:$16 sps:$4 sm:$0xff]  }
  0xf3   : > { %3672 = vmatprep.subr.bf16.mxu1 %v5166_v57  ;;  %v5242_v57 = vld [vmem:[%s5973_s18 + $0xe84] ss:$16 sps:$4 sm:$0xff]  }
  0xf5   : > { %3632 = vmatpush1.bf16.msra.mxu0 %v5161_v58  ;;  %v5237_v58 = vld [vmem:[%s5973_s18 + $0xc80] ss:$16 sps:$4 sm:$0xff]  }
  0xf6   : > { %3673 = vmatpush1.bf16.msra.mxu1 %v5164_v59  ;;  %3633 = vmatprep.subr.bf16.mxu0 %v5169_v60  ;;  %v5240_v59 = vld [vmem:[%s5973_s18 + $0xe80] ss:$16 sps:$4 sm:$0xff]   ;;  %v5245_v60 = vld [vmem:[%s5973_s18 + $0xca4] ss:$16 sps:$4 sm:$0xff]  }
  0xf7   : > { %3674 = vmatprep.subr.bf16.mxu1 %v5172_v61  ;;  %v5248_v61 = vld [vmem:[%s5973_s18 + $0xea4] ss:$16 sps:$4 sm:$0xff]  }
  0xf9   : > { %3634 = vmatpush1.bf16.msra.mxu0 %v5167_v62  ;;  %v5243_v62 = vld [vmem:[%s5973_s18 + $0xca0] ss:$16 sps:$4 sm:$0xff]  }
  0xfa   : > { %3675 = vmatpush1.bf16.msra.mxu1 %v5170_v63  ;;  %3635 = vmatprep.subr.bf16.mxu0 %v5175_v0  ;;  %v5246_v63 = vld [vmem:[%s5973_s18 + $0xea0] ss:$16 sps:$4 sm:$0xff]   ;;  %v5251_v0 = vld [vmem:[%s5973_s18 + $0xcc4] ss:$16 sps:$4 sm:$0xff]  }
  0xfb   : > { %3676 = vmatprep.subr.bf16.mxu1 %v5178_v1  ;;  %v5254_v1 = vld [vmem:[%s5973_s18 + $0xec4] ss:$16 sps:$4 sm:$0xff]  }
  0xfd   : > { %3636 = vmatpush1.bf16.msra.mxu0 %v5173_v2  ;;  %v5249_v2 = vld [vmem:[%s5973_s18 + $0xcc0] ss:$16 sps:$4 sm:$0xff]  }
  0xfe   : > { %3677 = vmatpush1.bf16.msra.mxu1 %v5176_v3  ;;  %3637 = vmatprep.subr.bf16.mxu0 %v5181_v4  ;;  %v5252_v3 = vld [vmem:[%s5973_s18 + $0xec0] ss:$16 sps:$4 sm:$0xff]   ;;  %v5257_v4 = vld [vmem:[%s5973_s18 + $0xce4] ss:$16 sps:$4 sm:$0xff]  }
  0xff   : > { %3678 = vmatprep.subr.bf16.mxu1 %v5184_v5  ;;  %v5260_v5 = vld [vmem:[%s5973_s18 + $0xee4] ss:$16 sps:$4 sm:$0xff]  }
 0x101   : > { %3638 = vmatpush1.bf16.msra.mxu0 %v5179_v8  ;;  %v5255_v8 = vld [vmem:[%s5973_s18 + $0xce0] ss:$16 sps:$4 sm:$0xff]  }
 0x102   : > { %3679 = vmatpush1.bf16.msra.mxu1 %v5182_v9  ;;  %3639 = vmatprep.subr.bf16.mxu0 %v5187_v10  ;;  %v5258_v9 = vld [vmem:[%s5973_s18 + $0xee0] ss:$16 sps:$4 sm:$0xff]   ;;  %v5263_v10 = vld [vmem:[%s5973_s18 + $0xd04] ss:$16 sps:$4 sm:$0xff]  }
 0x103   : > { %3680 = vmatprep.subr.bf16.mxu1 %v5190_v11  ;;  %v5266_v11 = vld [vmem:[%s5973_s18 + $0xf04] ss:$16 sps:$4 sm:$0xff]  }
 0x105   : > { %3640 = vmatpush1.bf16.msra.mxu0 %v5185_v12  ;;  %v5261_v12 = vld [vmem:[%s5973_s18 + $0xd00] ss:$16 sps:$4 sm:$0xff]  }
 0x106   : > { %3681 = vmatpush1.bf16.msra.mxu1 %v5188_v13  ;;  %3641 = vmatprep.subr.bf16.mxu0 %v5193_v14  ;;  %v5264_v13 = vld [vmem:[%s5973_s18 + $0xf00] ss:$16 sps:$4 sm:$0xff]   ;;  %v5269_v14 = vld [vmem:[%s5973_s18 + $0xd24] ss:$16 sps:$4 sm:$0xff]  }
 0x107   : > { %3682 = vmatprep.subr.bf16.mxu1 %v5196_v15  ;;  %v5272_v15 = vld [vmem:[%s5973_s18 + $0xf24] ss:$16 sps:$4 sm:$0xff]  }
 0x109   : > { %3642 = vmatpush1.bf16.msra.mxu0 %v5191_v18  ;;  %v5267_v18 = vld [vmem:[%s5973_s18 + $0xd20] ss:$16 sps:$4 sm:$0xff]  }
 0x10a   : > { %3683 = vmatpush1.bf16.msra.mxu1 %v5194_v19  ;;  %3643 = vmatprep.subr.bf16.mxu0 %v5199_v20  ;;  %v5270_v19 = vld [vmem:[%s5973_s18 + $0xf20] ss:$16 sps:$4 sm:$0xff]   ;;  %v5275_v20 = vld [vmem:[%s5973_s18 + $0xd44] ss:$16 sps:$4 sm:$0xff]  }
 0x10b   : > { %3684 = vmatprep.subr.bf16.mxu1 %v5202_v21  ;;  %v5278_v21 = vld [vmem:[%s5973_s18 + $0xf44] ss:$16 sps:$4 sm:$0xff]  }
 0x10d   : > { %3644 = vmatpush1.bf16.msra.mxu0 %v5197_v26  ;;  %v5273_v26 = vld [vmem:[%s5973_s18 + $0xd40] ss:$16 sps:$4 sm:$0xff]  }
 0x10e   : > { %3685 = vmatpush1.bf16.msra.mxu1 %v5200_v27  ;;  %3645 = vmatprep.subr.bf16.mxu0 %v5205_v28  ;;  %v5276_v27 = vld [vmem:[%s5973_s18 + $0xf40] ss:$16 sps:$4 sm:$0xff]   ;;  %v5281_v28 = vld [vmem:[%s5973_s18 + $0xd64] ss:$16 sps:$4 sm:$0xff]  }
 0x10f   : > { %3686 = vmatprep.subr.bf16.mxu1 %v5208_v29  ;;  %v5284_v29 = vld [vmem:[%s5973_s18 + $0xf64] ss:$16 sps:$4 sm:$0xff]  }
 0x111   : > { %3646 = vmatpush1.bf16.msra.mxu0 %v5203_v30  ;;  %v5279_v30 = vld [vmem:[%s5973_s18 + $0xd60] ss:$16 sps:$4 sm:$0xff]  }
 0x112   : > { %3687 = vmatpush1.bf16.msra.mxu1 %v5206_v31  ;;  %3697 = vmatprep.subr.bf16.mxu0 %v5215_v32  ;;  %v5282_v31 = vld [vmem:[%s5973_s18 + $0xf60] ss:$16 sps:$4 sm:$0xff]   ;;  %v5287_v32 = vld [vmem:[%s5973_s18 + $0xd84] ss:$16 sps:$4 sm:$0xff]  }
 0x113   : > { %3738 = vmatprep.subr.bf16.mxu1 %v5218_v33  ;;  %v5290_v33 = vld [vmem:[%s5973_s18 + $0xf84] ss:$16 sps:$4 sm:$0xff]  }
 0x114   : > { %3648 = vmatmul.mubr.bf16.vlgmr.msra.gmra.mrb[8].mxu0 %v6251_v38 }
 0x115   : > { %3689 = vmatmul.mubr.bf16.vlgmr.msra.gmra.mrb[8].mxu1 %v6255_v39  ;;  %3698 = vmatpush1.bf16.msra.mxu0 %v5213_v34  ;;  %v5285_v34 = vld [vmem:[%s5973_s18 + $0xd80] ss:$16 sps:$4 sm:$0xff]  }
 0x116   : > { %3739 = vmatpush1.bf16.msra.mxu1 %v5216_v35  ;;  %3699 = vmatprep.subr.bf16.mxu0 %v5221_v22  ;;  %v5288_v35 = vld [vmem:[%s5973_s18 + $0xf80] ss:$16 sps:$4 sm:$0xff]   ;;  %v5293_v22 = vld [vmem:[%s5973_s18 + $0xda4] ss:$16 sps:$4 sm:$0xff]  }
 0x117   : > { %3740 = vmatprep.subr.bf16.mxu1 %v5224_v23  ;;  %3729 = vmatprep.mubr.bf16.mxu0 %v6271_v42  ;;  %v5296_v23 = vld [vmem:[%s5973_s18 + $0xfa4] ss:$16 sps:$4 sm:$0xff]  }
 0x118   : > { %3770 = vmatprep.mubr.bf16.mxu1 %v6275_v43 }
 0x119   : > { %3700 = vmatpush1.bf16.msra.mxu0 %v5219_v44  ;;  %v5291_v44 = vld [vmem:[%s5973_s18 + $0xda0] ss:$16 sps:$4 sm:$0xff]  }
 0x11a   : > { %3741 = vmatpush1.bf16.msra.mxu1 %v5222_v45  ;;  %3701 = vmatprep.subr.bf16.mxu0 %v5227_v46  ;;  %v5294_v45 = vld [vmem:[%s5973_s18 + $0xfa0] ss:$16 sps:$4 sm:$0xff]   ;;  %v5299_v46 = vld [vmem:[%s5973_s18 + $0xdc4] ss:$16 sps:$4 sm:$0xff]  }
 0x11b   : > { %3742 = vmatprep.subr.bf16.mxu1 %v5230_v48  ;;  %v5302_v48 = vld [vmem:[%s5973_s18 + $0xfc4] ss:$16 sps:$4 sm:$0xff]  }
 0x11d   : > { %3702 = vmatpush1.bf16.msra.mxu0 %v5225_v49  ;;  %v5297_v49 = vld [vmem:[%s5973_s18 + $0xdc0] ss:$16 sps:$4 sm:$0xff]  }
 0x11e   : > { %3743 = vmatpush1.bf16.msra.mxu1 %v5228_v50  ;;  %3703 = vmatprep.subr.bf16.mxu0 %v5233_v52  ;;  %v5300_v50 = vld [vmem:[%s5973_s18 + $0xfc0] ss:$16 sps:$4 sm:$0xff]   ;;  %v5305_v52 = vld [vmem:[%s5973_s18 + $0xde4] ss:$16 sps:$4 sm:$0xff]  }
 0x11f   : > { %3744 = vmatprep.subr.bf16.mxu1 %v5236_v53  ;;  %v5308_v53 = vld [vmem:[%s5973_s18 + $0xfe4] ss:$16 sps:$4 sm:$0xff]  }
 0x121   : > { %3704 = vmatpush1.bf16.msra.mxu0 %v5231_v54  ;;  %v5303_v54 = vld [vmem:[%s5973_s18 + $0xde0] ss:$16 sps:$4 sm:$0xff]  }
 0x122   : > { %3745 = vmatpush1.bf16.msra.mxu1 %v5234_v55  ;;  %3705 = vmatprep.subr.bf16.mxu0 %v5239_v56  ;;  %v5306_v55 = vld [vmem:[%s5973_s18 + $0xfe0] ss:$16 sps:$4 sm:$0xff]   ;;  %v5315_v56 = vld [vmem:[%s5973_s18 + $0xc] ss:$16 sps:$4 sm:$0xff]  }
 0x123   : > { %3746 = vmatprep.subr.bf16.mxu1 %v5242_v57  ;;  %v5318_v57 = vld [vmem:[%s5973_s18 + $0x20c] ss:$16 sps:$4 sm:$0xff]  }
 0x125   : > { %3706 = vmatpush1.bf16.msra.mxu0 %v5237_v58  ;;  %v6343_v58 = vcombine.low %v6260_v40, %v6260_v40  ;;  %v5319_v40 = vld [vmem:[%s5973_s18 + $0x28] ss:$16 sps:$4 sm:$0xff]  }
 0x126   : > { %3747 = vmatpush1.bf16.msra.mxu1 %v5240_v59  ;;  %3707 = vmatprep.subr.bf16.mxu0 %v5245_v60  ;;  %v6347_v59 = vcombine.low %v6265_v41, %v6265_v41  ;;  %v5313_v60 = vld [vmem:[%s5973_s18 + $0x8] ss:$16 sps:$4 sm:$0xff]   ;;  %v5327_v41 = vld [vmem:[%s5973_s18 + $0x4c] ss:$16 sps:$4 sm:$0xff]  }
 0x127   : > { %3748 = vmatprep.subr.bf16.mxu1 %v5248_v61  ;;  %v5316_v61 = vld [vmem:[%s5973_s18 + $0x208] ss:$16 sps:$4 sm:$0xff]  }
 0x129   : > { %3708 = vmatpush1.bf16.msra.mxu0 %v5243_v62  ;;  %v5321_v62 = vld [vmem:[%s5973_s18 + $0x2c] ss:$16 sps:$4 sm:$0xff]  }
 0x12a   : > { %3749 = vmatpush1.bf16.msra.mxu1 %v5246_v63  ;;  %3709 = vmatprep.subr.bf16.mxu0 %v5251_v0  ;;  %v5324_v63 = vld [vmem:[%s5973_s18 + $0x22c] ss:$16 sps:$4 sm:$0xff]   ;;  %v5322_v0 = vld [vmem:[%s5973_s18 + $0x228] ss:$16 sps:$4 sm:$0xff]  }
 0x12b   : > { %3750 = vmatprep.subr.bf16.mxu1 %v5254_v1  ;;  %v5330_v1 = vld [vmem:[%s5973_s18 + $0x24c] ss:$16 sps:$4 sm:$0xff]  }
 0x12d   : > { %3710 = vmatpush1.bf16.msra.mxu0 %v5249_v2  ;;  %v5325_v2 = vld [vmem:[%s5973_s18 + $0x48] ss:$16 sps:$4 sm:$0xff]  }
 0x12e   : > { %3751 = vmatpush1.bf16.msra.mxu1 %v5252_v3  ;;  %3711 = vmatprep.subr.bf16.mxu0 %v5257_v4  ;;  %v5328_v3 = vld [vmem:[%s5973_s18 + $0x248] ss:$16 sps:$4 sm:$0xff]   ;;  %v5333_v4 = vld [vmem:[%s5973_s18 + $0x6c] ss:$16 sps:$4 sm:$0xff]  }
 0x12f   : > { %3752 = vmatprep.subr.bf16.mxu1 %v5260_v5  ;;  %v5336_v5 = vld [vmem:[%s5973_s18 + $0x26c] ss:$16 sps:$4 sm:$0xff]  }
 0x131   : > { %3712 = vmatpush1.bf16.msra.mxu0 %v5255_v8  ;;  %v5334_v8 = vld [vmem:[%s5973_s18 + $0x268] ss:$16 sps:$4 sm:$0xff]  }
 0x132   : > { %3753 = vmatpush1.bf16.msra.mxu1 %v5258_v9  ;;  %3713 = vmatprep.subr.bf16.mxu0 %v5263_v10  ;;  %v5342_v9 = vld [vmem:[%s5973_s18 + $0x28c] ss:$16 sps:$4 sm:$0xff]   ;;  %v5337_v10 = vld [vmem:[%s5973_s18 + $0x88] ss:$16 sps:$4 sm:$0xff]  }
 0x133   : > { %3754 = vmatprep.subr.bf16.mxu1 %v5266_v11  ;;  %v5340_v11 = vld [vmem:[%s5973_s18 + $0x288] ss:$16 sps:$4 sm:$0xff]  }
 0x135   : > { %3714 = vmatpush1.bf16.msra.mxu0 %v5261_v12  ;;  %v5345_v12 = vld [vmem:[%s5973_s18 + $0xac] ss:$16 sps:$4 sm:$0xff]  }
 0x136   : > { %3755 = vmatpush1.bf16.msra.mxu1 %v5264_v13  ;;  %3715 = vmatprep.subr.bf16.mxu0 %v5269_v14  ;;  %v5348_v13 = vld [vmem:[%s5973_s18 + $0x2ac] ss:$16 sps:$4 sm:$0xff]   ;;  %v5343_v14 = vld [vmem:[%s5973_s18 + $0xa8] ss:$16 sps:$4 sm:$0xff]  }
 0x137   : > { %3756 = vmatprep.subr.bf16.mxu1 %v5272_v15  ;;  %v5346_v15 = vld [vmem:[%s5973_s18 + $0x2a8] ss:$16 sps:$4 sm:$0xff]  }
 0x139   : > { %3716 = vmatpush1.bf16.msra.mxu0 %v5267_v18  ;;  %v5351_v18 = vld [vmem:[%s5973_s18 + $0xcc] ss:$16 sps:$4 sm:$0xff]  }
 0x13a   : > { %3757 = vmatpush1.bf16.msra.mxu1 %v5270_v19  ;;  %3717 = vmatprep.subr.bf16.mxu0 %v5275_v20  ;;  %v5354_v19 = vld [vmem:[%s5973_s18 + $0x2cc] ss:$16 sps:$4 sm:$0xff]  }
 0x13b   : > { %3758 = vmatprep.subr.bf16.mxu1 %v5278_v21 }
 0x13d   : > { %3718 = vmatpush1.bf16.msra.mxu0 %v5273_v26  ;;  %v5349_v26 = vld [vmem:[%s5973_s18 + $0xc8] ss:$16 sps:$4 sm:$0xff]  }
 0x13e   : > { %3759 = vmatpush1.bf16.msra.mxu1 %v5276_v27  ;;  %3719 = vmatprep.subr.bf16.mxu0 %v5281_v28  ;;  %v5352_v27 = vld [vmem:[%s5973_s18 + $0x2c8] ss:$16 sps:$4 sm:$0xff]  }
 0x13f   : > { %3760 = vmatprep.subr.bf16.mxu1 %v5284_v29 }
 0x141   : > { %3720 = vmatpush1.bf16.msra.mxu0 %v5279_v30 }
 0x142   : > { %3761 = vmatpush1.bf16.msra.mxu1 %v5282_v31  ;;  %3721 = vmatprep.subr.bf16.mxu0 %v5287_v32 }
 0x143   : > { %3762 = vmatprep.subr.bf16.mxu1 %v5290_v33 }
 0x145   : > { %3722 = vmatpush1.bf16.msra.mxu0 %v5285_v34 }
 0x146   : > { %3763 = vmatpush1.bf16.msra.mxu1 %v5288_v35  ;;  %3723 = vmatprep.subr.bf16.mxu0 %v5293_v22  ;;  %v5357_v22 = vld [vmem:[%s5973_s18 + $0xec] ss:$16 sps:$4 sm:$0xff]  }
 0x147   : > { %3764 = vmatprep.subr.bf16.mxu1 %v5296_v23  ;;  %v5360_v23 = vld [vmem:[%s5973_s18 + $0x2ec] ss:$16 sps:$4 sm:$0xff]  }
 0x149   : > { %3724 = vmatpush1.bf16.msra.mxu0 %v5291_v44  ;;  %v5355_v44 = vld [vmem:[%s5973_s18 + $0xe8] ss:$16 sps:$4 sm:$0xff]  }
 0x14a   : > { %3765 = vmatpush1.bf16.msra.mxu1 %v5294_v45  ;;  %3725 = vmatprep.subr.bf16.mxu0 %v5299_v46  ;;  %v5358_v45 = vld [vmem:[%s5973_s18 + $0x2e8] ss:$16 sps:$4 sm:$0xff]   ;;  %v5363_v46 = vld [vmem:[%s5973_s18 + $0x10c] ss:$16 sps:$4 sm:$0xff]  }
 0x14b   : > { %3766 = vmatprep.subr.bf16.mxu1 %v5302_v48  ;;  %v5366_v48 = vld [vmem:[%s5973_s18 + $0x30c] ss:$16 sps:$4 sm:$0xff]  }
 0x14d   : > { %3726 = vmatpush1.bf16.msra.mxu0 %v5297_v49  ;;  %v5361_v49 = vld [vmem:[%s5973_s18 + $0x108] ss:$16 sps:$4 sm:$0xff]  }
 0x14e   : > { %3767 = vmatpush1.bf16.msra.mxu1 %v5300_v50  ;;  %3727 = vmatprep.subr.bf16.mxu0 %v5305_v52  ;;  %v5364_v50 = vld [vmem:[%s5973_s18 + $0x308] ss:$16 sps:$4 sm:$0xff]   ;;  %v5369_v52 = vld [vmem:[%s5973_s18 + $0x12c] ss:$16 sps:$4 sm:$0xff]  }
 0x14f   : > { %3768 = vmatprep.subr.bf16.mxu1 %v5308_v53  ;;  %v5372_v53 = vld [vmem:[%s5973_s18 + $0x32c] ss:$16 sps:$4 sm:$0xff]  }
 0x151   : > { %3728 = vmatpush1.bf16.msra.mxu0 %v5303_v54  ;;  %v5367_v54 = vld [vmem:[%s5973_s18 + $0x128] ss:$16 sps:$4 sm:$0xff]  }
 0x152   : > { %3769 = vmatpush1.bf16.msra.mxu1 %v5306_v55  ;;  %3779 = vmatprep.subr.bf16.mxu0 %v5315_v56  ;;  %v5370_v55 = vld [vmem:[%s5973_s18 + $0x328] ss:$16 sps:$4 sm:$0xff]   ;;  %v5375_v56 = vld [vmem:[%s5973_s18 + $0x14c] ss:$16 sps:$4 sm:$0xff]  }
 0x153   : > { %3820 = vmatprep.subr.bf16.mxu1 %v5318_v57  ;;  %v5378_v57 = vld [vmem:[%s5973_s18 + $0x34c] ss:$16 sps:$4 sm:$0xff]  }
 0x154   : > { %3730 = vmatmul.mubr.bf16.vlgmr.msra.gmra.mrb[12].mxu0 %v6343_v58 }
 0x155   : > { %3771 = vmatmul.mubr.bf16.vlgmr.msra.gmra.mrb[12].mxu1 %v6347_v59  ;;  %3780 = vmatpush1.bf16.msra.mxu0 %v5313_v60  ;;  %v5373_v60 = vld [vmem:[%s5973_s18 + $0x148] ss:$16 sps:$4 sm:$0xff]  }
 0x156   : > { %3821 = vmatpush1.bf16.msra.mxu1 %v5316_v61  ;;  %3781 = vmatprep.subr.bf16.mxu0 %v5321_v62  ;;  %v5376_v61 = vld [vmem:[%s5973_s18 + $0x348] ss:$16 sps:$4 sm:$0xff]   ;;  %v5381_v62 = vld [vmem:[%s5973_s18 + $0x16c] ss:$16 sps:$4 sm:$0xff]  }
 0x157   : > { %3822 = vmatprep.subr.bf16.mxu1 %v5324_v63  ;;  %3811 = vmatprep.mubr.bf16.mxu0 %v6034_v47  ;;  %v5331_v47 = vld [vmem:[%s5973_s18 + $0x68] ss:$16 sps:$4 sm:$0xff]   ;;  %v5384_v63 = vld [vmem:[%s5973_s18 + $0x36c] ss:$16 sps:$4 sm:$0xff]  }
 0x158   : > { %3852 = vmatprep.mubr.bf16.mxu1 %v6041_v51  ;;  %v5339_v51 = vld [vmem:[%s5973_s18 + $0x8c] ss:$16 sps:$4 sm:$0xff]  }
 0x159   : > { %3782 = vmatpush1.bf16.msra.mxu0 %v5319_v40  ;;  %v5379_v40 = vld [vmem:[%s5973_s18 + $0x168] ss:$16 sps:$4 sm:$0xff]  }
 0x15a   : > { %3823 = vmatpush1.bf16.msra.mxu1 %v5322_v0  ;;  %3783 = vmatprep.subr.bf16.mxu0 %v5327_v41  ;;  %v5382_v0 = vld [vmem:[%s5973_s18 + $0x368] ss:$16 sps:$4 sm:$0xff]   ;;  %v5387_v41 = vld [vmem:[%s5973_s18 + $0x18c] ss:$16 sps:$4 sm:$0xff]  }
 0x15b   : > { %3824 = vmatprep.subr.bf16.mxu1 %v5330_v1  ;;  %v5390_v1 = vld [vmem:[%s5973_s18 + $0x38c] ss:$16 sps:$4 sm:$0xff]  }
 0x15d   : > { %3784 = vmatpush1.bf16.msra.mxu0 %v5325_v2  ;;  %v5385_v2 = vld [vmem:[%s5973_s18 + $0x188] ss:$16 sps:$4 sm:$0xff]  }
 0x15e   : > { %3825 = vmatpush1.bf16.msra.mxu1 %v5328_v3  ;;  %3785 = vmatprep.subr.bf16.mxu0 %v5333_v4  ;;  %v5388_v3 = vld [vmem:[%s5973_s18 + $0x388] ss:$16 sps:$4 sm:$0xff]   ;;  %v5393_v4 = vld [vmem:[%s5973_s18 + $0x1ac] ss:$16 sps:$4 sm:$0xff]  }
 0x15f   : > { %3826 = vmatprep.subr.bf16.mxu1 %v5336_v5  ;;  %v5396_v5 = vld [vmem:[%s5973_s18 + $0x3ac] ss:$16 sps:$4 sm:$0xff]  }
 0x161   : > { %3786 = vmatpush1.bf16.msra.mxu0 %v5331_v47  ;;  %v5391_v47 = vld [vmem:[%s5973_s18 + $0x1a8] ss:$16 sps:$4 sm:$0xff]  }
 0x162   : > { %3827 = vmatpush1.bf16.msra.mxu1 %v5334_v8  ;;  %3787 = vmatprep.subr.bf16.mxu0 %v5339_v51  ;;  %v5394_v8 = vld [vmem:[%s5973_s18 + $0x3a8] ss:$16 sps:$4 sm:$0xff]   ;;  %v5399_v51 = vld [vmem:[%s5973_s18 + $0x1cc] ss:$16 sps:$4 sm:$0xff]  }
 0x163   : > { %3828 = vmatprep.subr.bf16.mxu1 %v5342_v9  ;;  %v5402_v9 = vld [vmem:[%s5973_s18 + $0x3cc] ss:$16 sps:$4 sm:$0xff]  }
 0x165   : > { %3788 = vmatpush1.bf16.msra.mxu0 %v5337_v10  ;;  %v5397_v10 = vld [vmem:[%s5973_s18 + $0x1c8] ss:$16 sps:$4 sm:$0xff]  }
 0x166   : > { %3829 = vmatpush1.bf16.msra.mxu1 %v5340_v11  ;;  %3789 = vmatprep.subr.bf16.mxu0 %v5345_v12  ;;  %v5400_v11 = vld [vmem:[%s5973_s18 + $0x3c8] ss:$16 sps:$4 sm:$0xff]   ;;  %v5405_v12 = vld [vmem:[%s5973_s18 + $0x1ec] ss:$16 sps:$4 sm:$0xff]  }
 0x167   : > { %3830 = vmatprep.subr.bf16.mxu1 %v5348_v13  ;;  %v3485_v20 = vpop.f32.mrb[0].mxu0  ;;  %v5408_v13 = vld [vmem:[%s5973_s18 + $0x3ec] ss:$16 sps:$4 sm:$0xff]  }
 0x168   : > { %v3526_v21 = vpop.f32.mrb[0].mxu1  ;;  %v3487_v29 = vpop.f32.mrb[1].mxu0 }
 0x169   : > { %v6379_v28 = vadd.f32 %v3526_v21, %v3485_v20  ;;  %v3528_v30 = vpop.f32.mrb[1].mxu1  ;;  %v3489_v32 = vpop.f32.mrb[2].mxu0  ;;  %3790 = vmatpush1.bf16.msra.mxu0 %v5343_v14  ;;  %v5403_v14 = vld [vmem:[%s5973_s18 + $0x1e8] ss:$16 sps:$4 sm:$0xff]  }
 0x16a   : > { %v6381_v31 = vadd.f32 %v3528_v30, %v3487_v29  ;;  %v3530_v33 = vpop.f32.mrb[2].mxu1  ;;  %3831 = vmatpush1.bf16.msra.mxu1 %v5346_v15  ;;  %v3490_v34 = vpop.f32.mrb[3].mxu0  ;;  %3791 = vmatprep.subr.bf16.mxu0 %v5351_v18  ;;  %v5406_v15 = vld [vmem:[%s5973_s18 + $0x3e8] ss:$16 sps:$4 sm:$0xff]   ;;  %v5411_v18 = vld [vmem:[%s5973_s18 + $0x40c] ss:$16 sps:$4 sm:$0xff]  }
 0x16b   : > { %v3531_v35 = vpop.f32.mrb[3].mxu1  ;;  %3832 = vmatprep.subr.bf16.mxu1 %v5354_v19  ;;  %v5414_v19 = vld [vmem:[%s5973_s18 + $0x60c] ss:$16 sps:$4 sm:$0xff]   ;;  %v5409_v20 = vld [vmem:[%s5973_s18 + $0x408] ss:$16 sps:$4 sm:$0xff]  }
 0x16c   : > { %v5412_v21 = vld [vmem:[%s5973_s18 + $0x608] ss:$16 sps:$4 sm:$0xff]   ;;  %v5423_v32 = vld [vmem:[%s5973_s18 + $0x44c] ss:$16 sps:$4 sm:$0xff]  }
 0x16d   : > { %3792 = vmatpush1.bf16.msra.mxu0 %v5349_v26  ;;  %v5417_v26 = vld [vmem:[%s5973_s18 + $0x42c] ss:$16 sps:$4 sm:$0xff]   ;;  %v5415_v29 = vld [vmem:[%s5973_s18 + $0x428] ss:$16 sps:$4 sm:$0xff]  }
 0x16e   : > { %3833 = vmatpush1.bf16.msra.mxu1 %v5352_v27  ;;  %3793 = vmatprep.subr.bf16.mxu0 %v5357_v22  ;;  %v5420_v27 = vld [vmem:[%s5973_s18 + $0x62c] ss:$16 sps:$4 sm:$0xff]   ;;  %v5418_v30 = vld [vmem:[%s5973_s18 + $0x628] ss:$16 sps:$4 sm:$0xff]  }
 0x16f   : > { %3834 = vmatprep.subr.bf16.mxu1 %v5360_v23  ;;  %v5426_v33 = vld [vmem:[%s5973_s18 + $0x64c] ss:$16 sps:$4 sm:$0xff]   ;;  %v5427_v22 = vld [vmem:[%s5973_s18 + $0x468] ss:$16 sps:$4 sm:$0xff]  }
 0x170   : > { %v5429_v34 = vld [vmem:[%s5973_s18 + $0x46c] ss:$16 sps:$4 sm:$0xff]  }
 0x171   : > { %3794 = vmatpush1.bf16.msra.mxu0 %v5355_v44  ;;  %v5432_v35 = vld [vmem:[%s5973_s18 + $0x66c] ss:$16 sps:$4 sm:$0xff]   ;;  %v5433_v44 = vld [vmem:[%s5973_s18 + $0x488] ss:$16 sps:$4 sm:$0xff]  }
 0x172   : > { %3835 = vmatpush1.bf16.msra.mxu1 %v5358_v45  ;;  %3795 = vmatprep.subr.bf16.mxu0 %v5363_v46  ;;  %v5438_v23 = vld [vmem:[%s5973_s18 + $0x68c] ss:$16 sps:$4 sm:$0xff]   ;;  %v5436_v45 = vld [vmem:[%s5973_s18 + $0x688] ss:$16 sps:$4 sm:$0xff]  }
 0x173   : > { %3836 = vmatprep.subr.bf16.mxu1 %v5366_v48  ;;  %v5441_v46 = vld [vmem:[%s5973_s18 + $0x4ac] ss:$16 sps:$4 sm:$0xff]  }
 0x174   : > { %v5444_v48 = vld [vmem:[%s5973_s18 + $0x6ac] ss:$16 sps:$4 sm:$0xff]  }
 0x175   : > { %3796 = vmatpush1.bf16.msra.mxu0 %v5361_v49  ;;  %v5439_v49 = vld [vmem:[%s5973_s18 + $0x4a8] ss:$16 sps:$4 sm:$0xff]  }
 0x176   : > { %3837 = vmatpush1.bf16.msra.mxu1 %v5364_v50  ;;  %3797 = vmatprep.subr.bf16.mxu0 %v5369_v52  ;;  %v5442_v50 = vld [vmem:[%s5973_s18 + $0x6a8] ss:$16 sps:$4 sm:$0xff]   ;;  %v5447_v52 = vld [vmem:[%s5973_s18 + $0x4cc] ss:$16 sps:$4 sm:$0xff]  }
 0x177   : > { %3838 = vmatprep.subr.bf16.mxu1 %v5372_v53  ;;  %v5450_v53 = vld [vmem:[%s5973_s18 + $0x6cc] ss:$16 sps:$4 sm:$0xff]  }
 0x179   : > { %3798 = vmatpush1.bf16.msra.mxu0 %v5367_v54 }
 0x17a   : > { %3839 = vmatpush1.bf16.msra.mxu1 %v5370_v55  ;;  %3799 = vmatprep.subr.bf16.mxu0 %v5375_v56 }
 0x17b   : > { %3840 = vmatprep.subr.bf16.mxu1 %v5378_v57 }
 0x17d   : > { %3800 = vmatpush1.bf16.msra.mxu0 %v5373_v60 }
 0x17e   : > { %3841 = vmatpush1.bf16.msra.mxu1 %v5376_v61  ;;  %3801 = vmatprep.subr.bf16.mxu0 %v5381_v62 }
 0x17f   : > { %3842 = vmatprep.subr.bf16.mxu1 %v5384_v63 }
 0x181   : > { %3802 = vmatpush1.bf16.msra.mxu0 %v5379_v40  ;;  %v5445_v40 = vld [vmem:[%s5973_s18 + $0x4c8] ss:$16 sps:$4 sm:$0xff]  }
 0x182   : > { %3843 = vmatpush1.bf16.msra.mxu1 %v5382_v0  ;;  %3803 = vmatprep.subr.bf16.mxu0 %v5387_v41  ;;  %v5448_v0 = vld [vmem:[%s5973_s18 + $0x6c8] ss:$16 sps:$4 sm:$0xff]  }
 0x183   : > { %3844 = vmatprep.subr.bf16.mxu1 %v5390_v1 }
 0x185   : > { %3804 = vmatpush1.bf16.msra.mxu0 %v5385_v2 }
 0x186   : > { %3845 = vmatpush1.bf16.msra.mxu1 %v5388_v3  ;;  %3805 = vmatprep.subr.bf16.mxu0 %v5393_v4  ;;  %v5451_v4 = vld [vmem:[%s5973_s18 + $0x4e8] ss:$16 sps:$4 sm:$0xff]  }
 0x187   : > { %3846 = vmatprep.subr.bf16.mxu1 %v5396_v5  ;;  %v5454_v5 = vld [vmem:[%s5973_s18 + $0x6e8] ss:$16 sps:$4 sm:$0xff]  }
 0x189   : > { %3806 = vmatpush1.bf16.msra.mxu0 %v5391_v47  ;;  %v5459_v47 = vld [vmem:[%s5973_s18 + $0x50c] ss:$16 sps:$4 sm:$0xff]  }
 0x18a   : > { %3847 = vmatpush1.bf16.msra.mxu1 %v5394_v8  ;;  %3807 = vmatprep.subr.bf16.mxu0 %v5399_v51  ;;  %v5462_v8 = vld [vmem:[%s5973_s18 + $0x70c] ss:$16 sps:$4 sm:$0xff]   ;;  %v5457_v51 = vld [vmem:[%s5973_s18 + $0x508] ss:$16 sps:$4 sm:$0xff]  }
 0x18b   : > { %3848 = vmatprep.subr.bf16.mxu1 %v5402_v9  ;;  %v5460_v9 = vld [vmem:[%s5973_s18 + $0x708] ss:$16 sps:$4 sm:$0xff]  }
 0x18d   : > { %3808 = vmatpush1.bf16.msra.mxu0 %v5397_v10  ;;  %v5465_v10 = vld [vmem:[%s5973_s18 + $0x52c] ss:$16 sps:$4 sm:$0xff]  }
 0x18e   : > { %3849 = vmatpush1.bf16.msra.mxu1 %v5400_v11  ;;  %3809 = vmatprep.subr.bf16.mxu0 %v5405_v12  ;;  %v5468_v11 = vld [vmem:[%s5973_s18 + $0x72c] ss:$16 sps:$4 sm:$0xff]   ;;  %v5463_v12 = vld [vmem:[%s5973_s18 + $0x528] ss:$16 sps:$4 sm:$0xff]  }
 0x18f   : > { %3850 = vmatprep.subr.bf16.mxu1 %v5408_v13  ;;  %v5466_v13 = vld [vmem:[%s5973_s18 + $0x728] ss:$16 sps:$4 sm:$0xff]  }
 0x191   : > { %3810 = vmatpush1.bf16.msra.mxu0 %v5403_v14  ;;  %v5471_v14 = vld [vmem:[%s5973_s18 + $0x54c] ss:$16 sps:$4 sm:$0xff]  }
 0x192   : > { %3851 = vmatpush1.bf16.msra.mxu1 %v5406_v15  ;;  %3861 = vmatprep.subr.bf16.mxu0 %v5411_v18  ;;  %v5474_v15 = vld [vmem:[%s5973_s18 + $0x74c] ss:$16 sps:$4 sm:$0xff]   ;;  %v5469_v18 = vld [vmem:[%s5973_s18 + $0x548] ss:$16 sps:$4 sm:$0xff]  }
 0x193   : > { %3902 = vmatprep.subr.bf16.mxu1 %v5414_v19  ;;  %v5472_v19 = vld [vmem:[%s5973_s18 + $0x748] ss:$16 sps:$4 sm:$0xff]  }
 0x194   : > { %3812 = vmatmul.mubr.bf16.vlgmr.msra.gmra.mrb[16].mxu0 %v6063_v6  ;;  %v5421_v6 = vld [vmem:[%s5973_s18 + $0x448] ss:$16 sps:$4 sm:$0xff]  }
 0x195   : > { %3853 = vmatmul.mubr.bf16.vlgmr.msra.gmra.mrb[16].mxu1 %v6065_v7  ;;  %3862 = vmatpush1.bf16.msra.mxu0 %v5409_v20  ;;  %v5424_v7 = vld [vmem:[%s5973_s18 + $0x648] ss:$16 sps:$4 sm:$0xff]   ;;  %v5477_v20 = vld [vmem:[%s5973_s18 + $0x56c] ss:$16 sps:$4 sm:$0xff]  }
 0x196   : > { %3903 = vmatpush1.bf16.msra.mxu1 %v5412_v21  ;;  %3863 = vmatprep.subr.bf16.mxu0 %v5417_v26  ;;  %v5480_v21 = vld [vmem:[%s5973_s18 + $0x76c] ss:$16 sps:$4 sm:$0xff]   ;;  %v5475_v26 = vld [vmem:[%s5973_s18 + $0x568] ss:$16 sps:$4 sm:$0xff]  }
 0x197   : > { %3904 = vmatprep.subr.bf16.mxu1 %v5420_v27  ;;  %3893 = vmatprep.mubr.bf16.mxu0 %v6107_v36  ;;  %v5430_v36 = vld [vmem:[%s5973_s18 + $0x668] ss:$16 sps:$4 sm:$0xff]  }
 0x198   : > { %3934 = vmatprep.mubr.bf16.mxu1 %v6111_v37  ;;  %v5435_v37 = vld [vmem:[%s5973_s18 + $0x48c] ss:$16 sps:$4 sm:$0xff]   ;;  %v5478_v27 = vld [vmem:[%s5973_s18 + $0x768] ss:$16 sps:$4 sm:$0xff]  }
 0x199   : > { %3864 = vmatpush1.bf16.msra.mxu0 %v5415_v29  ;;  %v5483_v29 = vld [vmem:[%s5973_s18 + $0x58c] ss:$16 sps:$4 sm:$0xff]  }
 0x19a   : > { %3905 = vmatpush1.bf16.msra.mxu1 %v5418_v30  ;;  %3865 = vmatprep.subr.bf16.mxu0 %v5423_v32  ;;  %v5486_v30 = vld [vmem:[%s5973_s18 + $0x78c] ss:$16 sps:$4 sm:$0xff]   ;;  %v5481_v32 = vld [vmem:[%s5973_s18 + $0x588] ss:$16 sps:$4 sm:$0xff]  }
 0x19b   : > { %3906 = vmatprep.subr.bf16.mxu1 %v5426_v33  ;;  %v5484_v33 = vld [vmem:[%s5973_s18 + $0x788] ss:$16 sps:$4 sm:$0xff]  }
 0x19d   : > { %3866 = vmatpush1.bf16.msra.mxu0 %v5421_v6  ;;  %v5489_v6 = vld [vmem:[%s5973_s18 + $0x5ac] ss:$16 sps:$4 sm:$0xff]  }
 0x19e   : > { %3907 = vmatpush1.bf16.msra.mxu1 %v5424_v7  ;;  %3867 = vmatprep.subr.bf16.mxu0 %v5429_v34  ;;  %v5492_v7 = vld [vmem:[%s5973_s18 + $0x7ac] ss:$16 sps:$4 sm:$0xff]   ;;  %v5487_v34 = vld [vmem:[%s5973_s18 + $0x5a8] ss:$16 sps:$4 sm:$0xff]  }
 0x19f   : > { %3908 = vmatprep.subr.bf16.mxu1 %v5432_v35  ;;  %v5490_v35 = vld [vmem:[%s5973_s18 + $0x7a8] ss:$16 sps:$4 sm:$0xff]  }
 0x1a1   : > { %3868 = vmatpush1.bf16.msra.mxu0 %v5427_v22  ;;  %v5495_v22 = vld [vmem:[%s5973_s18 + $0x5cc] ss:$16 sps:$4 sm:$0xff]  }
 0x1a2   : > { %3909 = vmatpush1.bf16.msra.mxu1 %v5430_v36  ;;  %3869 = vmatprep.subr.bf16.mxu0 %v5435_v37  ;;  %v5498_v36 = vld [vmem:[%s5973_s18 + $0x7cc] ss:$16 sps:$4 sm:$0xff]   ;;  %v5493_v37 = vld [vmem:[%s5973_s18 + $0x5c8] ss:$16 sps:$4 sm:$0xff]  }
 0x1a3   : > { %3910 = vmatprep.subr.bf16.mxu1 %v5438_v23  ;;  %v5496_v23 = vld [vmem:[%s5973_s18 + $0x7c8] ss:$16 sps:$4 sm:$0xff]  }
 0x1a5   : > { %3870 = vmatpush1.bf16.msra.mxu0 %v5433_v44  ;;  %v5501_v44 = vld [vmem:[%s5973_s18 + $0x5ec] ss:$16 sps:$4 sm:$0xff]  }
 0x1a6   : > { %3911 = vmatpush1.bf16.msra.mxu1 %v5436_v45  ;;  %3871 = vmatprep.subr.bf16.mxu0 %v5441_v46  ;;  %v5504_v45 = vld [vmem:[%s5973_s18 + $0x7ec] ss:$16 sps:$4 sm:$0xff]   ;;  %v5499_v46 = vld [vmem:[%s5973_s18 + $0x5e8] ss:$16 sps:$4 sm:$0xff]  }
 0x1a7   : > { %3912 = vmatprep.subr.bf16.mxu1 %v5444_v48  ;;  %v3567_v54 = vpop.f32.mrb[4].mxu0  ;;  %v5502_v48 = vld [vmem:[%s5973_s18 + $0x7e8] ss:$16 sps:$4 sm:$0xff]  }
 0x1a8   : > { %v3608_v55 = vpop.f32.mrb[4].mxu1  ;;  %v3568_v56 = vadd.f32 %v3567_v54, %v6379_v28  ;;  %v3569_v57 = vpop.f32.mrb[5].mxu0  ;;  %v5453_v28 = vld [vmem:[%s5973_s18 + $0x4ec] ss:$16 sps:$4 sm:$0xff]  }
 0x1a9   : > { %v3610_v60 = vpop.f32.mrb[5].mxu1  ;;  %v3570_v61 = vadd.f32 %v3569_v57, %v6381_v31  ;;  %v3571_v62 = vpop.f32.mrb[6].mxu0  ;;  %3872 = vmatpush1.bf16.msra.mxu0 %v5439_v49  ;;  %v5456_v31 = vld [vmem:[%s5973_s18 + $0x6ec] ss:$16 sps:$4 sm:$0xff]   ;;  %v5514_v57 = vld [vmem:[%s5973_s18 + $0xa28] ss:$16 sps:$4 sm:$0xff]  }
 0x1aa   : > { %v3612_v63 = vpop.f32.mrb[6].mxu1  ;;  %3913 = vmatpush1.bf16.msra.mxu1 %v5442_v50  ;;  %v6453_v41 = vadd.f32 %v3608_v55, %v3568_v56  ;;  %v3572_v1 = vpop.f32.mrb[7].mxu0  ;;  %3873 = vmatprep.subr.bf16.mxu0 %v5447_v52  ;;  %v5507_v49 = vld [vmem:[%s5973_s18 + $0x80c] ss:$16 sps:$4 sm:$0xff]   ;;  %v5505_v52 = vld [vmem:[%s5973_s18 + $0x808] ss:$16 sps:$4 sm:$0xff]  }
 0x1ab   : > { %v3613_v2 = vpop.f32.mrb[7].mxu1  ;;  %3914 = vmatprep.subr.bf16.mxu1 %v5450_v53  ;;  %v6457_v3 = vadd.f32 %v3610_v60, %v3570_v61  ;;  %v5510_v50 = vld [vmem:[%s5973_s18 + $0xa0c] ss:$16 sps:$4 sm:$0xff]   ;;  %v5508_v53 = vld [vmem:[%s5973_s18 + $0xa08] ss:$16 sps:$4 sm:$0xff]  }
 0x1ac   : > { %v5513_v54 = vld [vmem:[%s5973_s18 + $0x82c] ss:$16 sps:$4 sm:$0xff]   ;;  %v5511_v56 = vld [vmem:[%s5973_s18 + $0x828] ss:$16 sps:$4 sm:$0xff]  }
 0x1ad   : > { %3874 = vmatpush1.bf16.msra.mxu0 %v5445_v40  ;;  %v5516_v55 = vld [vmem:[%s5973_s18 + $0xa2c] ss:$16 sps:$4 sm:$0xff]   ;;  %v5523_v40 = vld [vmem:[%s5973_s18 + $0x868] ss:$16 sps:$4 sm:$0xff]  }
 0x1ae   : > { %3915 = vmatpush1.bf16.msra.mxu1 %v5448_v0  ;;  %3875 = vmatprep.subr.bf16.mxu0 %v5453_v28  ;;  %v5519_v60 = vld [vmem:[%s5973_s18 + $0x84c] ss:$16 sps:$4 sm:$0xff]   ;;  %v5529_v1 = vld [vmem:[%s5973_s18 + $0x888] ss:$16 sps:$4 sm:$0xff]  }
 0x1af   : > { %3916 = vmatprep.subr.bf16.mxu1 %v5456_v31  ;;  %v5522_v61 = vld [vmem:[%s5973_s18 + $0xa4c] ss:$16 sps:$4 sm:$0xff]   ;;  %v5532_v2 = vld [vmem:[%s5973_s18 + $0xa88] ss:$16 sps:$4 sm:$0xff]  }
 0x1b0   : > { %v5525_v62 = vld [vmem:[%s5973_s18 + $0x86c] ss:$16 sps:$4 sm:$0xff]  }
 0x1b1   : > { %3876 = vmatpush1.bf16.msra.mxu0 %v5451_v4  ;;  %v5528_v63 = vld [vmem:[%s5973_s18 + $0xa6c] ss:$16 sps:$4 sm:$0xff]   ;;  %v5535_v4 = vld [vmem:[%s5973_s18 + $0x8a8] ss:$16 sps:$4 sm:$0xff]  }
 0x1b2   : > { %3917 = vmatpush1.bf16.msra.mxu1 %v5454_v5  ;;  %3877 = vmatprep.subr.bf16.mxu0 %v5459_v47  ;;  %v5534_v0 = vld [vmem:[%s5973_s18 + $0xa8c] ss:$16 sps:$4 sm:$0xff]   ;;  %v5538_v5 = vld [vmem:[%s5973_s18 + $0xaa8] ss:$16 sps:$4 sm:$0xff]  }
 0x1b3   : > { %3918 = vmatprep.subr.bf16.mxu1 %v5462_v8  ;;  %v5537_v28 = vld [vmem:[%s5973_s18 + $0x8ac] ss:$16 sps:$4 sm:$0xff]  }
 0x1b4   : > { %v5540_v31 = vld [vmem:[%s5973_s18 + $0xaac] ss:$16 sps:$4 sm:$0xff]  }
 0x1b5   : > { %3878 = vmatpush1.bf16.msra.mxu0 %v5457_v51  ;;  %v5543_v47 = vld [vmem:[%s5973_s18 + $0x8cc] ss:$16 sps:$4 sm:$0xff]  }
 0x1b6   : > { %3919 = vmatpush1.bf16.msra.mxu1 %v5460_v9  ;;  %3879 = vmatprep.subr.bf16.mxu0 %v5465_v10  ;;  %v5546_v8 = vld [vmem:[%s5973_s18 + $0xacc] ss:$16 sps:$4 sm:$0xff]  }
 0x1b7   : > { %3920 = vmatprep.subr.bf16.mxu1 %v5468_v11 }
 0x1b9   : > { %3880 = vmatpush1.bf16.msra.mxu0 %v5463_v12 }
 0x1ba   : > { %3921 = vmatpush1.bf16.msra.mxu1 %v5466_v13  ;;  %3881 = vmatprep.subr.bf16.mxu0 %v5471_v14 }
 0x1bb   : > { %3922 = vmatprep.subr.bf16.mxu1 %v5474_v15 }
 0x1bd   : > { %3882 = vmatpush1.bf16.msra.mxu0 %v5469_v18  ;;  %v5541_v18 = vld [vmem:[%s5973_s18 + $0x8c8] ss:$16 sps:$4 sm:$0xff]  }
 0x1be   : > { %3923 = vmatpush1.bf16.msra.mxu1 %v5472_v19  ;;  %3883 = vmatprep.subr.bf16.mxu0 %v5477_v20  ;;  %v5544_v19 = vld [vmem:[%s5973_s18 + $0xac8] ss:$16 sps:$4 sm:$0xff]  }
 0x1bf   : > { %3924 = vmatprep.subr.bf16.mxu1 %v5480_v21 }
 0x1c1   : > { %3884 = vmatpush1.bf16.msra.mxu0 %v5475_v26 }
 0x1c2   : > { %3925 = vmatpush1.bf16.msra.mxu1 %v5478_v27  ;;  %3885 = vmatprep.subr.bf16.mxu0 %v5483_v29  ;;  %v5547_v29 = vld [vmem:[%s5973_s18 + $0x8e8] ss:$16 sps:$4 sm:$0xff]  }
 0x1c3   : > { %3926 = vmatprep.subr.bf16.mxu1 %v5486_v30  ;;  %v5550_v30 = vld [vmem:[%s5973_s18 + $0xae8] ss:$16 sps:$4 sm:$0xff]  }
 0x1c5   : > { %3886 = vmatpush1.bf16.msra.mxu0 %v5481_v32  ;;  %v5555_v32 = vld [vmem:[%s5973_s18 + $0x90c] ss:$16 sps:$4 sm:$0xff]  }
 0x1c6   : > { %3927 = vmatpush1.bf16.msra.mxu1 %v5484_v33  ;;  %3887 = vmatprep.subr.bf16.mxu0 %v5489_v6  ;;  %v5558_v33 = vld [vmem:[%s5973_s18 + $0xb0c] ss:$16 sps:$4 sm:$0xff]   ;;  %v5553_v6 = vld [vmem:[%s5973_s18 + $0x908] ss:$16 sps:$4 sm:$0xff]  }
 0x1c7   : > { %3928 = vmatprep.subr.bf16.mxu1 %v5492_v7  ;;  %v5556_v7 = vld [vmem:[%s5973_s18 + $0xb08] ss:$16 sps:$4 sm:$0xff]  }
 0x1c9   : > { %3888 = vmatpush1.bf16.msra.mxu0 %v5487_v34  ;;  %v5561_v34 = vld [vmem:[%s5973_s18 + $0x92c] ss:$16 sps:$4 sm:$0xff]  }
 0x1ca   : > { %3929 = vmatpush1.bf16.msra.mxu1 %v5490_v35  ;;  %3889 = vmatprep.subr.bf16.mxu0 %v5495_v22  ;;  %v5564_v35 = vld [vmem:[%s5973_s18 + $0xb2c] ss:$16 sps:$4 sm:$0xff]   ;;  %v5559_v22 = vld [vmem:[%s5973_s18 + $0x928] ss:$16 sps:$4 sm:$0xff]  }
 0x1cb   : > { %3930 = vmatprep.subr.bf16.mxu1 %v5498_v36  ;;  %v5562_v36 = vld [vmem:[%s5973_s18 + $0xb28] ss:$16 sps:$4 sm:$0xff]  }
 0x1cd   : > { %3890 = vmatpush1.bf16.msra.mxu0 %v5493_v37  ;;  %v5567_v37 = vld [vmem:[%s5973_s18 + $0x94c] ss:$16 sps:$4 sm:$0xff]  }
 0x1ce   : > { %3931 = vmatpush1.bf16.msra.mxu1 %v5496_v23  ;;  %3891 = vmatprep.subr.bf16.mxu0 %v5501_v44  ;;  %v5570_v23 = vld [vmem:[%s5973_s18 + $0xb4c] ss:$16 sps:$4 sm:$0xff]   ;;  %v5565_v44 = vld [vmem:[%s5973_s18 + $0x948] ss:$16 sps:$4 sm:$0xff]  }
 0x1cf   : > { %3932 = vmatprep.subr.bf16.mxu1 %v5504_v45  ;;  %v5568_v45 = vld [vmem:[%s5973_s18 + $0xb48] ss:$16 sps:$4 sm:$0xff]  }
 0x1d1   : > { %3892 = vmatpush1.bf16.msra.mxu0 %v5499_v46  ;;  %v5573_v46 = vld [vmem:[%s5973_s18 + $0x96c] ss:$16 sps:$4 sm:$0xff]  }
 0x1d2   : > { %3933 = vmatpush1.bf16.msra.mxu1 %v5502_v48  ;;  %3943 = vmatprep.subr.bf16.mxu0 %v5507_v49  ;;  %v5576_v48 = vld [vmem:[%s5973_s18 + $0xb6c] ss:$16 sps:$4 sm:$0xff]   ;;  %v5571_v49 = vld [vmem:[%s5973_s18 + $0x968] ss:$16 sps:$4 sm:$0xff]  }
 0x1d3   : > { %3984 = vmatprep.subr.bf16.mxu1 %v5510_v50  ;;  %v5574_v50 = vld [vmem:[%s5973_s18 + $0xb68] ss:$16 sps:$4 sm:$0xff]  }
 0x1d4   : > { %3894 = vmatmul.mubr.bf16.vlgmr.msra.gmra.mrb[20].mxu0 %v6155_v16  ;;  %v5517_v16 = vld [vmem:[%s5973_s18 + $0x848] ss:$16 sps:$4 sm:$0xff]  }
 0x1d5   : > { %3935 = vmatmul.mubr.bf16.vlgmr.msra.gmra.mrb[20].mxu1 %v6159_v17  ;;  %3944 = vmatpush1.bf16.msra.mxu0 %v5505_v52  ;;  %v5520_v17 = vld [vmem:[%s5973_s18 + $0xa48] ss:$16 sps:$4 sm:$0xff]   ;;  %v5579_v52 = vld [vmem:[%s5973_s18 + $0x98c] ss:$16 sps:$4 sm:$0xff]  }
 0x1d6   : > { %3985 = vmatpush1.bf16.msra.mxu1 %v5508_v53  ;;  %3945 = vmatprep.subr.bf16.mxu0 %v5513_v54  ;;  %v5582_v53 = vld [vmem:[%s5973_s18 + $0xb8c] ss:$16 sps:$4 sm:$0xff]   ;;  %v5577_v54 = vld [vmem:[%s5973_s18 + $0x988] ss:$16 sps:$4 sm:$0xff]  }
 0x1d7   : > { %3986 = vmatprep.subr.bf16.mxu1 %v5516_v55  ;;  %3975 = vmatprep.mubr.bf16.mxu0 %v6177_v24  ;;  %v5526_v24 = vld [vmem:[%s5973_s18 + $0xa68] ss:$16 sps:$4 sm:$0xff]  }
 0x1d8   : > { %4016 = vmatprep.mubr.bf16.mxu1 %v6181_v25  ;;  %v5531_v25 = vld [vmem:[%s5973_s18 + $0x88c] ss:$16 sps:$4 sm:$0xff]   ;;  %v5580_v55 = vld [vmem:[%s5973_s18 + $0xb88] ss:$16 sps:$4 sm:$0xff]  }
 0x1d9   : > { %3946 = vmatpush1.bf16.msra.mxu0 %v5511_v56  ;;  %v5585_v56 = vld [vmem:[%s5973_s18 + $0x9ac] ss:$16 sps:$4 sm:$0xff]  }
 0x1da   : > { %3987 = vmatpush1.bf16.msra.mxu1 %v5514_v57  ;;  %3947 = vmatprep.subr.bf16.mxu0 %v5519_v60  ;;  %v5588_v57 = vld [vmem:[%s5973_s18 + $0xbac] ss:$16 sps:$4 sm:$0xff]   ;;  %v5583_v60 = vld [vmem:[%s5973_s18 + $0x9a8] ss:$16 sps:$4 sm:$0xff]  }
 0x1db   : > { %3988 = vmatprep.subr.bf16.mxu1 %v5522_v61  ;;  %v5586_v61 = vld [vmem:[%s5973_s18 + $0xba8] ss:$16 sps:$4 sm:$0xff]  }
 0x1dd   : > { %3948 = vmatpush1.bf16.msra.mxu0 %v5517_v16  ;;  %v5591_v16 = vld [vmem:[%s5973_s18 + $0x9cc] ss:$16 sps:$4 sm:$0xff]  }
 0x1de   : > { %3989 = vmatpush1.bf16.msra.mxu1 %v5520_v17  ;;  %3949 = vmatprep.subr.bf16.mxu0 %v5525_v62  ;;  %v5594_v17 = vld [vmem:[%s5973_s18 + $0xbcc] ss:$16 sps:$4 sm:$0xff]   ;;  %v5589_v62 = vld [vmem:[%s5973_s18 + $0x9c8] ss:$16 sps:$4 sm:$0xff]  }
 0x1df   : > { %3990 = vmatprep.subr.bf16.mxu1 %v5528_v63  ;;  %v5592_v63 = vld [vmem:[%s5973_s18 + $0xbc8] ss:$16 sps:$4 sm:$0xff]  }
 0x1e1   : > { %3950 = vmatpush1.bf16.msra.mxu0 %v5523_v40  ;;  %v5597_v40 = vld [vmem:[%s5973_s18 + $0x9ec] ss:$16 sps:$4 sm:$0xff]  }
 0x1e2   : > { %3991 = vmatpush1.bf16.msra.mxu1 %v5526_v24  ;;  %3951 = vmatprep.subr.bf16.mxu0 %v5531_v25  ;;  %v5600_v24 = vld [vmem:[%s5973_s18 + $0xbec] ss:$16 sps:$4 sm:$0xff]   ;;  %v5595_v25 = vld [vmem:[%s5973_s18 + $0x9e8] ss:$16 sps:$4 sm:$0xff]  }
 0x1e3   : > { %3992 = vmatprep.subr.bf16.mxu1 %v5534_v0  ;;  %v5598_v0 = vld [vmem:[%s5973_s18 + $0xbe8] ss:$16 sps:$4 sm:$0xff]  }
 0x1e5   : > { %3952 = vmatpush1.bf16.msra.mxu0 %v5529_v1  ;;  %v5603_v1 = vld [vmem:[%s5973_s18 + $0xc0c] ss:$16 sps:$4 sm:$0xff]  }
 0x1e6   : > { %3993 = vmatpush1.bf16.msra.mxu1 %v5532_v2  ;;  %3953 = vmatprep.subr.bf16.mxu0 %v5537_v28  ;;  %v5606_v2 = vld [vmem:[%s5973_s18 + $0xe0c] ss:$16 sps:$4 sm:$0xff]   ;;  %v5601_v28 = vld [vmem:[%s5973_s18 + $0xc08] ss:$16 sps:$4 sm:$0xff]  }
 0x1e7   : > { %3994 = vmatprep.subr.bf16.mxu1 %v5540_v31  ;;  %v3649_v51 = vpop.f32.mrb[8].mxu0  ;;  %v5604_v31 = vld [vmem:[%s5973_s18 + $0xe08] ss:$16 sps:$4 sm:$0xff]  }
 0x1e8   : > { %v3690_v9 = vpop.f32.mrb[8].mxu1  ;;  %v3650_v10 = vadd.f32 %v3649_v51, %v6453_v41  ;;  %v3651_v11 = vpop.f32.mrb[9].mxu0  ;;  %v5549_v41 = vld [vmem:[%s5973_s18 + $0x8ec] ss:$16 sps:$4 sm:$0xff]  }
 0x1e9   : > { %v3692_v12 = vpop.f32.mrb[9].mxu1  ;;  %v3652_v13 = vadd.f32 %v3651_v11, %v6457_v3  ;;  %v3653_v14 = vpop.f32.mrb[10].mxu0  ;;  %3954 = vmatpush1.bf16.msra.mxu0 %v5535_v4  ;;  %v5552_v3 = vld [vmem:[%s5973_s18 + $0xaec] ss:$16 sps:$4 sm:$0xff]  }
 0x1ea   : > { %v3694_v15 = vpop.f32.mrb[10].mxu1  ;;  %3995 = vmatpush1.bf16.msra.mxu1 %v5538_v5  ;;  %v6527_v20 = vadd.f32 %v3690_v9, %v3650_v10  ;;  %v3654_v21 = vpop.f32.mrb[11].mxu0  ;;  %3955 = vmatprep.subr.bf16.mxu0 %v5543_v47  ;;  %v5609_v4 = vld [vmem:[%s5973_s18 + $0xc2c] ss:$16 sps:$4 sm:$0xff]   ;;  %v5607_v47 = vld [vmem:[%s5973_s18 + $0xc28] ss:$16 sps:$4 sm:$0xff]  }
 0x1eb   : > { %v3695_v26 = vpop.f32.mrb[11].mxu1  ;;  %3996 = vmatprep.subr.bf16.mxu1 %v5546_v8  ;;  %v6531_v27 = vadd.f32 %v3692_v12, %v3652_v13  ;;  %v5612_v5 = vld [vmem:[%s5973_s18 + $0xe2c] ss:$16 sps:$4 sm:$0xff]   ;;  %v5610_v8 = vld [vmem:[%s5973_s18 + $0xe28] ss:$16 sps:$4 sm:$0xff]   ;;  %v4124_v12 = vlaneseq }
 0x1ec   : > { %v5615_v51 = vld [vmem:[%s5973_s18 + $0xc4c] ss:$16 sps:$4 sm:$0xff]  }
 0x1ed   : > { %3956 = vmatpush1.bf16.msra.mxu0 %v5541_v18  ;;  %v5618_v9 = vld [vmem:[%s5973_s18 + $0xe4c] ss:$16 sps:$4 sm:$0xff]   ;;  %v6589_v15 = vshrl.u32 %v4124_v12, 7  ;;  %v5625_v18 = vld [vmem:[%s5973_s18 + $0xc88] ss:$16 sps:$4 sm:$0xff]  }
 0x1ee   : > { %3997 = vmatpush1.bf16.msra.mxu1 %v5544_v19  ;;  %3957 = vmatprep.subr.bf16.mxu0 %v5549_v41  ;;  %v5621_v10 = vld [vmem:[%s5973_s18 + $0xc6c] ss:$16 sps:$4 sm:$0xff]   ;;  %v5628_v19 = vld [vmem:[%s5973_s18 + $0xe88] ss:$16 sps:$4 sm:$0xff]  }
 0x1ef   : > { %3998 = vmatprep.subr.bf16.mxu1 %v5552_v3  ;;  %v5624_v11 = vld [vmem:[%s5973_s18 + $0xe6c] ss:$16 sps:$4 sm:$0xff]   ;;  %v4126_v41 = vsub.s32 0, %v6589_v15  ;;  %v5631_v3 = vld [vmem:[%s5973_s18 + $0xca8] ss:$16 sps:$4 sm:$0xff]  }
 0x1f0   : > { %v5627_v13 = vld [vmem:[%s5973_s18 + $0xc8c] ss:$16 sps:$4 sm:$0xff]   ;;  %v5676_v12 = vld [vmem:[%s5973_s18 + $0xf88] ss:$16 sps:$4 sm:$0xff]  }
 0x1f1   : > { %3958 = vmatpush1.bf16.msra.mxu0 %v5547_v29  ;;  %v5630_v14 = vld [vmem:[%s5973_s18 + $0xe8c] ss:$16 sps:$4 sm:$0xff]   ;;  %v6603_v29 = vld [vmem:[%s5979_s7] sm:$0xf] }
 0x1f2   : > { %3999 = vmatpush1.bf16.msra.mxu1 %v5550_v30  ;;  %3959 = vmatprep.subr.bf16.mxu0 %v5555_v32  ;;  %v5633_v21 = vld [vmem:[%s5973_s18 + $0xcac] ss:$16 sps:$4 sm:$0xff]   ;;  %v4130_v30 = vsub.s32 1, %v6589_v15  ;;  %v5634_v32 = vld [vmem:[%s5973_s18 + $0xea8] ss:$16 sps:$4 sm:$0xff]  }
 0x1f3   : > { %4000 = vmatprep.subr.bf16.mxu1 %v5558_v33  ;;  %v5636_v26 = vld [vmem:[%s5973_s18 + $0xeac] ss:$16 sps:$4 sm:$0xff]  }
 0x1f4   : > { %v5639_v33 = vld [vmem:[%s5973_s18 + $0xccc] ss:$16 sps:$4 sm:$0xff]  }
 0x1f5   : > { %3960 = vmatpush1.bf16.msra.mxu0 %v5553_v6  ;;  %v5642_v6 = vld [vmem:[%s5973_s18 + $0xecc] ss:$16 sps:$4 sm:$0xff]  }
 0x1f6   : > { %4001 = vmatpush1.bf16.msra.mxu1 %v5556_v7  ;;  %3961 = vmatprep.subr.bf16.mxu0 %v5561_v34 }
 0x1f7   : > { %4002 = vmatprep.subr.bf16.mxu1 %v5564_v35 }
 0x1f9   : > { %3962 = vmatpush1.bf16.msra.mxu0 %v5559_v22  ;;  %v4127_v22 = vrot.slane %v6603_v29, %v4126_v41  ;;  %v5693_v41 = vld [vmem:[%s5973_s18 + $0xdec] ss:$16 sps:$4 sm:$0xff]  }
 0x1fa   : > { %4003 = vmatpush1.bf16.msra.mxu1 %v5562_v36  ;;  %3963 = vmatprep.subr.bf16.mxu0 %v5567_v37 }
 0x1fb   : > { %4004 = vmatprep.subr.bf16.mxu1 %v5570_v23 }
 0x1fd   : > { %3964 = vmatpush1.bf16.msra.mxu0 %v5565_v44  ;;  %v4131_v44 = vrot.slane %v6603_v29, %v4130_v30  ;;  %v5691_v30 = vld [vmem:[%s5973_s18 + $0xde8] ss:$16 sps:$4 sm:$0xff]  }
 0x1fe   : > { %4005 = vmatpush1.bf16.msra.mxu1 %v5568_v45  ;;  %3965 = vmatprep.subr.bf16.mxu0 %v5573_v46 }
 0x1ff   : > { %4006 = vmatprep.subr.bf16.mxu1 %v5576_v48  ;;  %v5640_v48 = vld [vmem:[%s5973_s18 + $0xec8] ss:$16 sps:$4 sm:$0xff]  }
 0x201   : > { %3966 = vmatpush1.bf16.msra.mxu0 %v5571_v49 }
 0x202   : > { %4007 = vmatpush1.bf16.msra.mxu1 %v5574_v50  ;;  %3967 = vmatprep.subr.bf16.mxu0 %v5579_v52 }
 0x203   : > { %4008 = vmatprep.subr.bf16.mxu1 %v5582_v53  ;;  %v5645_v53 = vld [vmem:[%s5973_s18 + $0xcec] ss:$16 sps:$4 sm:$0xff]  }
 0x205   : > { %3968 = vmatpush1.bf16.msra.mxu0 %v5577_v54 }
 0x206   : > { %4009 = vmatpush1.bf16.msra.mxu1 %v5580_v55  ;;  %3969 = vmatprep.subr.bf16.mxu0 %v5585_v56 }
 0x207   : > { %4010 = vmatprep.subr.bf16.mxu1 %v5588_v57  ;;  %v5643_v57 = vld [vmem:[%s5973_s18 + $0xce8] ss:$16 sps:$4 sm:$0xff]  }
 0x209   : > { %3970 = vmatpush1.bf16.msra.mxu0 %v5583_v60  ;;  %v5646_v60 = vld [vmem:[%s5973_s18 + $0xee8] ss:$16 sps:$4 sm:$0xff]  }
 0x20a   : > { %4011 = vmatpush1.bf16.msra.mxu1 %v5586_v61  ;;  %3971 = vmatprep.subr.bf16.mxu0 %v5591_v16  ;;  %v5651_v16 = vld [vmem:[%s5973_s18 + $0xd0c] ss:$16 sps:$4 sm:$0xff]  }
 0x20b   : > { %4012 = vmatprep.subr.bf16.mxu1 %v5594_v17  ;;  %v5654_v17 = vld [vmem:[%s5973_s18 + $0xf0c] ss:$16 sps:$4 sm:$0xff]  }
 0x20d   : > { %3972 = vmatpush1.bf16.msra.mxu0 %v5589_v62 }
 0x20e   : > { %4013 = vmatpush1.bf16.msra.mxu1 %v5592_v63  ;;  %3973 = vmatprep.subr.bf16.mxu0 %v5597_v40 }
 0x20f   : > { %4014 = vmatprep.subr.bf16.mxu1 %v5600_v24  ;;  %v5649_v24 = vld [vmem:[%s5973_s18 + $0xd08] ss:$16 sps:$4 sm:$0xff]  }
 0x211   : > { %3974 = vmatpush1.bf16.msra.mxu0 %v5595_v25  ;;  %v5652_v25 = vld [vmem:[%s5973_s18 + $0xf08] ss:$16 sps:$4 sm:$0xff]  }
 0x212   : > { %4015 = vmatpush1.bf16.msra.mxu1 %v5598_v0  ;;  %4025 = vmatprep.subr.bf16.mxu0 %v5603_v1  ;;  %v5657_v0 = vld [vmem:[%s5973_s18 + $0xd2c] ss:$16 sps:$4 sm:$0xff]  }
 0x213   : > { %4066 = vmatprep.subr.bf16.mxu1 %v5606_v2  ;;  %v5660_v1 = vld [vmem:[%s5973_s18 + $0xf2c] ss:$16 sps:$4 sm:$0xff]   ;;  %v5655_v2 = vld [vmem:[%s5973_s18 + $0xd28] ss:$16 sps:$4 sm:$0xff]  }
 0x214   : > { %3976 = vmatmul.mubr.bf16.vlgmr.msra.gmra.mrb[24].mxu0 %v6251_v38  ;;  %v5613_v38 = vld [vmem:[%s5973_s18 + $0xc48] ss:$16 sps:$4 sm:$0xff]  }
 0x215   : > { %4017 = vmatmul.mubr.bf16.vlgmr.msra.gmra.mrb[24].mxu1 %v6255_v39  ;;  %4026 = vmatpush1.bf16.msra.mxu0 %v5601_v28  ;;  %v5616_v39 = vld [vmem:[%s5973_s18 + $0xe48] ss:$16 sps:$4 sm:$0xff]  }
 0x216   : > { %4067 = vmatpush1.bf16.msra.mxu1 %v5604_v31  ;;  %4027 = vmatprep.subr.bf16.mxu0 %v5609_v4  ;;  %v5658_v28 = vld [vmem:[%s5973_s18 + $0xf28] ss:$16 sps:$4 sm:$0xff]   ;;  %v5663_v31 = vld [vmem:[%s5973_s18 + $0xd4c] ss:$16 sps:$4 sm:$0xff]  }
 0x217   : > { %4068 = vmatprep.subr.bf16.mxu1 %v5612_v5  ;;  %4057 = vmatprep.mubr.bf16.mxu0 %v6271_v42  ;;  %v5619_v42 = vld [vmem:[%s5973_s18 + $0xc68] ss:$16 sps:$4 sm:$0xff]   ;;  %v5666_v4 = vld [vmem:[%s5973_s18 + $0xf4c] ss:$16 sps:$4 sm:$0xff]  }
 0x218   : > { %4098 = vmatprep.mubr.bf16.mxu1 %v6275_v43  ;;  %v5622_v43 = vld [vmem:[%s5973_s18 + $0xe68] ss:$16 sps:$4 sm:$0xff]  }
 0x219   : > { %4028 = vmatpush1.bf16.msra.mxu0 %v5607_v47  ;;  %v5661_v5 = vld [vmem:[%s5973_s18 + $0xd48] ss:$16 sps:$4 sm:$0xff]  }
 0x21a   : > { %4069 = vmatpush1.bf16.msra.mxu1 %v5610_v8  ;;  %4029 = vmatprep.subr.bf16.mxu0 %v5615_v51  ;;  %v5664_v47 = vld [vmem:[%s5973_s18 + $0xf48] ss:$16 sps:$4 sm:$0xff]   ;;  %v5669_v8 = vld [vmem:[%s5973_s18 + $0xd6c] ss:$16 sps:$4 sm:$0xff]  }
 0x21b   : > { %4070 = vmatprep.subr.bf16.mxu1 %v5618_v9  ;;  %v5672_v51 = vld [vmem:[%s5973_s18 + $0xf6c] ss:$16 sps:$4 sm:$0xff]   ;;  %v5667_v9 = vld [vmem:[%s5973_s18 + $0xd68] ss:$16 sps:$4 sm:$0xff]  }
 0x21d   : > { %4030 = vmatpush1.bf16.msra.mxu0 %v5613_v38  ;;  %v5670_v38 = vld [vmem:[%s5973_s18 + $0xf68] ss:$16 sps:$4 sm:$0xff]  }
 0x21e   : > { %4071 = vmatpush1.bf16.msra.mxu1 %v5616_v39  ;;  %4031 = vmatprep.subr.bf16.mxu0 %v5621_v10  ;;  %v5675_v39 = vld [vmem:[%s5973_s18 + $0xd8c] ss:$16 sps:$4 sm:$0xff]  }
 0x21f   : > { %4072 = vmatprep.subr.bf16.mxu1 %v5624_v11  ;;  %v5678_v10 = vld [vmem:[%s5973_s18 + $0xf8c] ss:$16 sps:$4 sm:$0xff]   ;;  %v5673_v11 = vld [vmem:[%s5973_s18 + $0xd88] ss:$16 sps:$4 sm:$0xff]  }
 0x221   : > { %4032 = vmatpush1.bf16.msra.mxu0 %v5619_v42  ;;  %v5681_v42 = vld [vmem:[%s5973_s18 + $0xdac] ss:$16 sps:$4 sm:$0xff]  }
 0x222   : > { %4073 = vmatpush1.bf16.msra.mxu1 %v5622_v43  ;;  %4033 = vmatprep.subr.bf16.mxu0 %v5627_v13  ;;  %v5684_v43 = vld [vmem:[%s5973_s18 + $0xfac] ss:$16 sps:$4 sm:$0xff]   ;;  %v5679_v13 = vld [vmem:[%s5973_s18 + $0xda8] ss:$16 sps:$4 sm:$0xff]  }
 0x223   : > { %4074 = vmatprep.subr.bf16.mxu1 %v5630_v14  ;;  %v5682_v14 = vld [vmem:[%s5973_s18 + $0xfa8] ss:$16 sps:$4 sm:$0xff]  }
 0x225   : > { %4034 = vmatpush1.bf16.msra.mxu0 %v5625_v18  ;;  %v5687_v18 = vld [vmem:[%s5973_s18 + $0xdcc] ss:$16 sps:$4 sm:$0xff]  }
 0x226   : > { %4075 = vmatpush1.bf16.msra.mxu1 %v5628_v19  ;;  %4035 = vmatprep.subr.bf16.mxu0 %v5633_v21  ;;  %v5690_v19 = vld [vmem:[%s5973_s18 + $0xfcc] ss:$16 sps:$4 sm:$0xff]   ;;  %v5685_v21 = vld [vmem:[%s5973_s18 + $0xdc8] ss:$16 sps:$4 sm:$0xff]  }
 0x227   : > { %4076 = vmatprep.subr.bf16.mxu1 %v5636_v26  ;;  %v3731_v7 = vpop.f32.mrb[12].mxu0  ;;  %v5688_v26 = vld [vmem:[%s5973_s18 + $0xfc8] ss:$16 sps:$4 sm:$0xff]  }
 0x228   : > { %v3772_v34 = vpop.f32.mrb[12].mxu1  ;;  %v3732_v35 = vadd.f32 %v3731_v7, %v6527_v20  ;;  %v3733_v36 = vpop.f32.mrb[13].mxu0  ;;  %v5637_v20 = vld [vmem:[%s5973_s18 + $0xcc8] ss:$16 sps:$4 sm:$0xff]  }
 0x229   : > { %v3774_v37 = vpop.f32.mrb[13].mxu1  ;;  %v3734_v23 = vadd.f32 %v3733_v36, %v6531_v27  ;;  %v3735_v45 = vpop.f32.mrb[14].mxu0  ;;  %4036 = vmatpush1.bf16.msra.mxu0 %v5631_v3  ;;  %v5648_v27 = vld [vmem:[%s5973_s18 + $0xeec] ss:$16 sps:$4 sm:$0xff]  }
 0x22a   : > { %v3776_v46 = vpop.f32.mrb[14].mxu1  ;;  %4077 = vmatpush1.bf16.msra.mxu1 %v5634_v32  ;;  %v3773_v49 = vadd.f32 %v3772_v34, %v3732_v35  ;;  %v3736_v50 = vpop.f32.mrb[15].mxu0  ;;  %4037 = vmatprep.subr.bf16.mxu0 %v5639_v33  ;;  %v5696_v3 = vld [vmem:[%s5973_s18 + $0xfec] ss:$16 sps:$4 sm:$0xff]   ;;  %v5694_v32 = vld [vmem:[%s5973_s18 + $0xfe8] ss:$16 sps:$4 sm:$0xff]  }
 0x22b   : > { %v3777_v52 = vpop.f32.mrb[15].mxu1  ;;  %4078 = vmatprep.subr.bf16.mxu1 %v5642_v6  ;;  %v3775_v54 = vadd.f32 %v3774_v37, %v3734_v23 }
 0x22c   : > { %v4144_v55 = vadd.f32 %v4127_v22, %v3773_v49 }
 0x22d   : > { %v4145_v56 = vadd.f32 %v4131_v44, %v3775_v54  ;;  %4038 = vmatpush1.bf16.msra.mxu0 %v5637_v20 }
 0x22e   : > { %4079 = vmatpush1.bf16.msra.mxu1 %v5640_v48  ;;  %v4148_v61 = vmul.f32 0.2, %v4144_v55  ;;  %4039 = vmatprep.subr.bf16.mxu0 %v5645_v53 }
 0x22f   : > { %4080 = vmatprep.subr.bf16.mxu1 %v5648_v27  ;;  %v4149_v62 = vmul.f32 0.2, %v4145_v56 }
 0x230   : > { %v4152_v63 = vmax.f32 %v4144_v55, %v4148_v61 }
 0x231   : > { %v4153_v40 = vmax.f32 %v4145_v56, %v4149_v62  ;;  %4040 = vmatpush1.bf16.msra.mxu0 %v5643_v57 }
 0x232   : > { %4081 = vmatpush1.bf16.msra.mxu1 %v5646_v60  ;;  %4156 = vst [vmem:[%s6629_s9] sm:$0xff] %v4152_v63  ;;  %4041 = vmatprep.subr.bf16.mxu0 %v5651_v16 }
 0x233   : > { %4082 = vmatprep.subr.bf16.mxu1 %v5654_v17  ;;  %4157 = vst [vmem:[%s6629_s9 + $0x8] sm:$0xff] %v4153_v40 }
 0x235   : > { %4042 = vmatpush1.bf16.msra.mxu0 %v5649_v24 }
 0x236   : > { %4083 = vmatpush1.bf16.msra.mxu1 %v5652_v25  ;;  %4043 = vmatprep.subr.bf16.mxu0 %v5657_v0  ;;  %v4134_v0 = vsub.s32 2, %v6589_v15 }
 0x237   : > { %4084 = vmatprep.subr.bf16.mxu1 %v5660_v1  ;;  %v4138_v1 = vsub.s32 3, %v6589_v15 }
 0x239   : > { %4044 = vmatpush1.bf16.msra.mxu0 %v5655_v2 }
 0x23a   : > { %4085 = vmatpush1.bf16.msra.mxu1 %v5658_v28  ;;  %4045 = vmatprep.subr.bf16.mxu0 %v5663_v31 }
 0x23b   : > { %4086 = vmatprep.subr.bf16.mxu1 %v5666_v4  ;;  %v4135_v4 = vrot.slane %v6603_v29, %v4134_v0 }
 0x23d   : > { %4046 = vmatpush1.bf16.msra.mxu0 %v5661_v5 }
 0x23e   : > { %4087 = vmatpush1.bf16.msra.mxu1 %v5664_v47  ;;  %4047 = vmatprep.subr.bf16.mxu0 %v5669_v8 }
 0x23f   : > { %4088 = vmatprep.subr.bf16.mxu1 %v5672_v51  ;;  %v4139_v51 = vrot.slane %v6603_v29, %v4138_v1 }
 0x241   : > { %4048 = vmatpush1.bf16.msra.mxu0 %v5667_v9 }
 0x242   : > { %4089 = vmatpush1.bf16.msra.mxu1 %v5670_v38  ;;  %4049 = vmatprep.subr.bf16.mxu0 %v5675_v39 }
 0x243   : > { %4090 = vmatprep.subr.bf16.mxu1 %v5678_v10 }
 0x245   : > { %4050 = vmatpush1.bf16.msra.mxu0 %v5673_v11 }
 0x246   : > { %4091 = vmatpush1.bf16.msra.mxu1 %v5676_v12  ;;  %4051 = vmatprep.subr.bf16.mxu0 %v5681_v42 }
 0x247   : > { %4092 = vmatprep.subr.bf16.mxu1 %v5684_v43 }
 0x249   : > { %4052 = vmatpush1.bf16.msra.mxu0 %v5679_v13 }
 0x24a   : > { %4093 = vmatpush1.bf16.msra.mxu1 %v5682_v14  ;;  %4053 = vmatprep.subr.bf16.mxu0 %v5687_v18 }
 0x24b   : > { %4094 = vmatprep.subr.bf16.mxu1 %v5690_v19 }
 0x24d   : > { %4054 = vmatpush1.bf16.msra.mxu0 %v5685_v21 }
 0x24e   : > { %4095 = vmatpush1.bf16.msra.mxu1 %v5688_v26  ;;  %4055 = vmatprep.subr.bf16.mxu0 %v5693_v41 }
 0x24f   : > { %4096 = vmatprep.subr.bf16.mxu1 %v5696_v3 }
 0x251   : > { %4056 = vmatpush1.bf16.msra.mxu0 %v5691_v30 }
 0x252   : > { %4097 = vmatpush1.bf16.msra.mxu1 %v5694_v32 }
 0x254   : > { %4058 = vmatmul.mubr.bf16.vlgmr.msra.gmra.mrb[28].mxu0 %v6343_v58 }
 0x255   : > { %4099 = vmatmul.mubr.bf16.vlgmr.msra.gmra.mrb[28].mxu1 %v6347_v59 }
 0x267   : > { %v3813_v33 = vpop.f32.mrb[16].mxu0 }
 0x268   : > { %v3854_v6 = vpop.f32.mrb[16].mxu1  ;;  %v3815_v34 = vpop.f32.mrb[17].mxu0 }
 0x269   : > { %v3855_v7 = vadd.f32 %v3854_v6, %v3813_v33  ;;  %v3856_v35 = vpop.f32.mrb[17].mxu1  ;;  %v3817_v36 = vpop.f32.mrb[18].mxu0 }
 0x26a   : > { %v3857_v22 = vadd.f32 %v3856_v35, %v3815_v34  ;;  %v3858_v37 = vpop.f32.mrb[18].mxu1  ;;  %v3818_v23 = vpop.f32.mrb[19].mxu0 }
 0x26b   : > { %v3859_v44 = vpop.f32.mrb[19].mxu1 }
 0x2a7   : > { %v3895_v45 = vpop.f32.mrb[20].mxu0 }
 0x2a8   : > { %v3936_v46 = vpop.f32.mrb[20].mxu1  ;;  %v3896_v20 = vadd.f32 %v3895_v45, %v3855_v7  ;;  %v3897_v48 = vpop.f32.mrb[21].mxu0 }
 0x2a9   : > { %v3938_v49 = vpop.f32.mrb[21].mxu1  ;;  %v3898_v50 = vadd.f32 %v3897_v48, %v3857_v22  ;;  %v3899_v52 = vpop.f32.mrb[22].mxu0 }
 0x2aa   : > { %v3940_v58 = vpop.f32.mrb[22].mxu1  ;;  %v3937_v53 = vadd.f32 %v3936_v46, %v3896_v20  ;;  %v3900_v59 = vpop.f32.mrb[23].mxu0 }
 0x2ab   : > { %v3941_v27 = vpop.f32.mrb[23].mxu1  ;;  %v3939_v54 = vadd.f32 %v3938_v49, %v3898_v50 }
 0x2e7   : > { %v3977_v55 = vpop.f32.mrb[24].mxu0 }
 0x2e8   : > { %v4018_v56 = vpop.f32.mrb[24].mxu1  ;;  %v3978_v57 = vadd.f32 %v3977_v55, %v3937_v53  ;;  %v3979_v60 = vpop.f32.mrb[25].mxu0 }
 0x2e9   : > { %v4020_v61 = vpop.f32.mrb[25].mxu1  ;;  %v3980_v16 = vadd.f32 %v3979_v60, %v3939_v54  ;;  %v3981_v17 = vpop.f32.mrb[26].mxu0 }
 0x2ea   : > { %v4022_v62 = vpop.f32.mrb[26].mxu1  ;;  %v4019_v63 = vadd.f32 %v4018_v56, %v3978_v57  ;;  %v3982_v40 = vpop.f32.mrb[27].mxu0 }
 0x2eb   : > { %v4023_v24 = vpop.f32.mrb[27].mxu1  ;;  %v4021_v25 = vadd.f32 %v4020_v61, %v3980_v16 }
 0x327   : > { %v4059_v2 = vpop.f32.mrb[28].mxu0 }
 0x328   : > { %v4100_v28 = vpop.f32.mrb[28].mxu1  ;;  %v4060_v31 = vadd.f32 %v4059_v2, %v4019_v63  ;;  %v4061_v5 = vpop.f32.mrb[29].mxu0 }
 0x329   : > { %v4102_v47 = vpop.f32.mrb[29].mxu1  ;;  %v4062_v8 = vadd.f32 %v4061_v5, %v4021_v25  ;;  %v4063_v9 = vpop.f32.mrb[30].mxu0 }
 0x32a   : > { %v4104_v38 = vpop.f32.mrb[30].mxu1  ;;  %v4101_v39 = vadd.f32 %v4100_v28, %v4060_v31  ;;  %v4064_v10 = vpop.f32.mrb[31].mxu0 }
 0x32b   : > { %v4105_v11 = vpop.f32.mrb[31].mxu1  ;;  %v4103_v12 = vadd.f32 %v4102_v47, %v4062_v8 }
 0x32c   : > { %v4146_v42 = vadd.f32 %v4135_v4, %v4101_v39 }
 0x32d   : > { %v4147_v15 = vadd.f32 %v4139_v51, %v4103_v12 }
 0x32e   : > { %v4150_v43 = vmul.f32 0.2, %v4146_v42 }
 0x32f   : > { %v4151_v13 = vmul.f32 0.2, %v4147_v15 }
 0x330   : > { %v4154_v14 = vmax.f32 %v4146_v42, %v4150_v43 }
 0x331   : > { %v4155_v18 = vmax.f32 %v4147_v15, %v4151_v13 }
 0x332   : > { %4158 = vst [vmem:[%s6629_s9 + $0x10] sm:$0xff] %v4154_v14 }
 0x333   : > { %4159 = vst [vmem:[%s6629_s9 + $0x18] sm:$0xff] %v4155_v18 }
 0x334 PF: > { %s19_s17 = sadd.s32 1, %s5811_s17   ;;  %s6702_s12 = smov %s5795_s13 }
 0x335   : > { %p16_p9 = scmp.ge.s32.totalorder %s19_s17, 4   ;;  %s6703_s13 = smov %s5799_s14 }
 0x336   : > { %s6704_s14 = smov %s5887_s24  ;;  %s6705_s15 = smov %s5807_s16 }
 0x337   : > { %s6706_s16 = smov %s6708_s19  ;;  %18 = sbr.rel (!%p16_p9) target bundleno = 6 (0x6), region = 96 }
 0x33e   :  { %4190 = vsyncpa [#allocation4], 1 }
 0x33f   :  { %4192 = vsyncpa [#allocation4 + $0x1], 1 }
 0x340   :  { %4193 = vsyncpa [#allocation6], 1 }
 0x341   :  { %4195 = vsyncpa [#allocation6 + $0x1], 1 }

</bundles_post_ra>
